<compile_context>
chip_gen: v7x
topology: tpu7x:2x2x1
jax: 0.10.0
libtpu: 0.0.40
codegen_flags: <defaults>
</compile_context>

<pallas_src>
import jax
import jax.numpy as jnp
from jax.experimental import pallas as pl
from jax.experimental.pallas import tpu as pltpu

# ---- synthetic hyperparameters (stand-ins for N_MFCC / hidden / Ages.N_Class)
N_MFCC = 16
HIDDEN = 32
N_CLASS = 8
BATCH = 2
T_IN = 40                    # conv output length: 40 - 6 - 4 - 2 = 28
K1, K2, K3 = 7, 5, 3


# ------------------------------ fused kernel ---------------------------------
def _fused_kernel(x_ref,
                  cw1_ref, cw2_ref, cw3_ref, caux_ref,
                  wih_ref, whh_ref, lb_ref,
                  aw_ref, aaux_ref,
                  mw1_ref, mw2_ref, mw3_ref, mb_ref,
                  o_ref,
                  cols1_ref, cols2_ref, cols3_ref):
    """Processes ONE batch element per grid step; everything stays in VMEM."""
    f32 = jnp.float32
    bf16 = jnp.bfloat16
    x = x_ref[0]                                   # (T_IN, N_MFCC), f32

    # ----- Conv1d -> ReLU -> BatchNorm1d(eval) via im2col + one fat matmul ----
    def conv_relu_bn(inp, w_ref, aux, k, cols_ref):
        t_in, cin = inp.shape
        t_out = t_in - k + 1
        for j in range(k):                         # static lane-offset stores
            cols_ref[:, j * cin:(j + 1) * cin] = inp[j:j + t_out, :]
        y = jnp.dot(cols_ref[...].astype(bf16), w_ref[...],
                    preferred_element_type=f32)    # (t_out, Cout)
        y = jnp.maximum(y + aux[0:1, :], 0.0)      # conv bias + ReLU
        return y * aux[1:2, :] + aux[2:3, :]       # folded eval BatchNorm

    caux = caux_ref[...]
    h1 = conv_relu_bn(x, cw1_ref, caux[0:3, :], K1, cols1_ref)   # (34, H)
    h2 = conv_relu_bn(h1, cw2_ref, caux[3:6, :], K2, cols2_ref)  # (30, H)
    h3 = conv_relu_bn(h2, cw3_ref, caux[6:9, :], K3, cols3_ref)  # (28, H)

    T, H = h3.shape

    # ---------------------------------- LSTM ---------------------------------
    # Input projection for all timesteps in a single (T,H)@(H,4H) matmul.
    xg = jnp.dot(h3.astype(bf16), wih_ref[...],
                 preferred_element_type=f32) + lb_ref[...]       # (T, 4H)
    whh = whh_ref[...]
    h = jnp.zeros((1, H), f32)
    c = jnp.zeros((1, H), f32)
    hs = []
    # Static unroll of the short recurrence (T=28); per-step h kept in VMEM and
    # concatenated once (no masked per-timestep HBM stores).
    for t in range(T):
        g = xg[t:t + 1, :] + jnp.dot(h.astype(bf16), whh,
                                     preferred_element_type=f32)  # (1, 4H)
        i_g = jax.nn.sigmoid(g[:, 0 * H:1 * H])
        f_g = jax.nn.sigmoid(g[:, 1 * H:2 * H])
        g_g = jnp.tanh(g[:, 2 * H:3 * H])
        o_g = jax.nn.sigmoid(g[:, 3 * H:4 * H])
        c = f_g * c + i_g * g_g
        h = o_g * jnp.tanh(c)
        hs.append(h)
    out = jnp.concatenate(hs, axis=0)              # (T, H), stays in VMEM

    # ----------------------------- SoftAttention -----------------------------
    aaux = aaux_ref[...]
    s = jnp.tanh(jnp.dot(out.astype(bf16), aw_ref[...],
                         preferred_element_type=f32) + aaux[0:1, :])  # (T, A)
    e = jnp.sum(s * aaux[1:2, :], axis=1, keepdims=True)              # (T, 1)
    e = e - jnp.max(e, axis=0, keepdims=True)
    p = jnp.exp(e)
    attn = p / jnp.sum(p, axis=0, keepdims=True)   # softmax over time
    rep = jnp.sum(attn * out, axis=0, keepdims=True)                  # (1, H)

    # ------------------------ age regressor MLP + softmax --------------------
    mb = mb_ref[...]
    z = jnp.maximum(jnp.dot(rep.astype(bf16), mw1_ref[...],
                            preferred_element_type=f32) + mb[0:1, :], 0.0)
    # Dropout(0.25) is identity in eval mode.
    z = jnp.maximum(jnp.dot(z.astype(bf16), mw2_ref[...],
                            preferred_element_type=f32) + mb[1:2, :], 0.0)
    n_class = mw3_ref.shape[1]
    logits = jnp.dot(z.astype(bf16), mw3_ref[...],
                     preferred_element_type=f32) + mb[2:3, 0:n_class]
    logits = logits - jnp.max(logits, axis=1, keepdims=True)
    pe = jnp.exp(logits)
    o_ref[0] = pe / jnp.sum(pe, axis=1, keepdims=True)   # Softmax(dim=1)


# --------------------------------- wrapper -----------------------------------
def _w_spec(shape):
    return pl.BlockSpec(shape, lambda i: tuple(0 for _ in shape))


@jax.jit
def forward(x, params):
    (cw1, cw2, cw3, caux, wih_t, whh_t, lb, aw, aaux,
     mw1, mw2, mw3, mb) = params
    x = jnp.squeeze(x, axis=1)                  # (B, N_MFCC, T)
    x = jnp.transpose(x, (0, 2, 1))             # (B, T, N_MFCC) channels-last
    B, T_in, C_in = x.shape
    t1 = T_in - K1 + 1
    t2 = t1 - K2 + 1
    t3 = t2 - K3 + 1
    n_class = mw3.shape[1]

    out = pl.pallas_call(
        _fused_kernel,
        out_shape=jax.ShapeDtypeStruct((B, 1, n_class), jnp.float32),
        grid=(B,),                               # one sample per grid step
        in_specs=[
            pl.BlockSpec((1, T_in, C_in), lambda i: (i, 0, 0)),
            _w_spec(cw1.shape), _w_spec(cw2.shape), _w_spec(cw3.shape),
            _w_spec(caux.shape),
            _w_spec(wih_t.shape), _w_spec(whh_t.shape), _w_spec(lb.shape),
            _w_spec(aw.shape), _w_spec(aaux.shape),
            _w_spec(mw1.shape), _w_spec(mw2.shape), _w_spec(mw3.shape),
            _w_spec(mb.shape),
        ],
        out_specs=pl.BlockSpec((1, 1, n_class), lambda i: (i, 0, 0)),
        scratch_shapes=[
            pltpu.VMEM((t1, K1 * C_in), jnp.float32),    # im2col buffers
            pltpu.VMEM((t2, K2 * HIDDEN), jnp.float32),
            pltpu.VMEM((t3, K3 * HIDDEN), jnp.float32),
        ],
        compiler_params=pltpu.CompilerParams(
            dimension_semantics=("parallel",)),          # shards over v7x TCs
    )(x, cw1, cw2, cw3, caux, wih_t, whh_t, lb, aw, aaux, mw1, mw2, mw3, mb)
    return out[:, 0, :]


# ------------------------------ parameter init -------------------------------
def init_params(key):
    ks = iter(jax.random.split(key, 32))
    bf16 = jnp.bfloat16

    def conv_bn(cin, cout, k):
        w = jax.random.normal(next(ks), (k, cin, cout), jnp.float32) \
            * (1.0 / (cin * k) ** 0.5)
        b = jax.random.normal(next(ks), (cout,), jnp.float32) * 0.1
        gamma = 1.0 + 0.1 * jax.random.normal(next(ks), (cout,), jnp.float32)
        beta = 0.1 * jax.random.normal(next(ks), (cout,), jnp.float32)
        rmean = 0.1 * jax.random.normal(next(ks), (cout,), jnp.float32)
        rvar = jax.random.uniform(next(ks), (cout,), jnp.float32, 0.5, 1.5)
        scale = gamma / jnp.sqrt(rvar + 1e-5)
        shift = beta - rmean * scale
        # im2col weight layout (K*Cin, Cout) + packed [bias; scale; shift] rows
        return w.reshape(k * cin, cout).astype(bf16), \
            jnp.stack([b, scale, shift], axis=0)

    cw1, a1 = conv_bn(N_MFCC, HIDDEN, K1)
    cw2, a2 = conv_bn(HIDDEN, HIDDEN, K2)
    cw3, a3 = conv_bn(HIDDEN, HIDDEN, K3)
    caux = jnp.concatenate([a1, a2, a3], axis=0)         # (9, HIDDEN)

    s = 1.0 / HIDDEN ** 0.5
    w_ih = jax.random.uniform(next(ks), (4 * HIDDEN, HIDDEN), jnp.float32, -s, s)
    w_hh = jax.random.uniform(next(ks), (4 * HIDDEN, HIDDEN), jnp.float32, -s, s)
    b_ih = jax.random.uniform(next(ks), (4 * HIDDEN,), jnp.float32, -s, s)
    b_hh = jax.random.uniform(next(ks), (4 * HIDDEN,), jnp.float32, -s, s)
    wih_t = jnp.transpose(w_ih).astype(bf16)             # hoisted: done once
    whh_t = jnp.transpose(w_hh).astype(bf16)
    lb = (b_ih + b_hh).reshape(1, 4 * HIDDEN)            # hoisted: done once

    aw = jax.random.uniform(next(ks), (HIDDEN, HIDDEN), jnp.float32, -s, s)
    wb = jax.random.uniform(next(ks), (HIDDEN,), jnp.float32, -s, s)
    v = jax.random.uniform(next(ks), (HIDDEN,), jnp.float32, -s, s)
    aaux = jnp.stack([wb, v], axis=0)                    # (2, HIDDEN)

    h2 = HIDDEN // 2
    mw1 = jax.random.normal(next(ks), (HIDDEN, h2), jnp.float32) * s
    mb1 = jax.random.normal(next(ks), (h2,), jnp.float32) * 0.1
    mw2 = jax.random.normal(next(ks), (h2, h2), jnp.float32) * (1.0 / h2 ** 0.5)
    mb2 = jax.random.normal(next(ks), (h2,), jnp.float32) * 0.1
    mw3 = jax.random.normal(next(ks), (h2, N_CLASS), jnp.float32) * (1.0 / h2 ** 0.5)
    mb3 = jax.random.normal(next(ks), (N_CLASS,), jnp.float32) * 0.1
    mb = jnp.zeros((3, h2), jnp.float32)                 # packed MLP biases
    mb = mb.at[0, :].set(mb1).at[1, :].set(mb2).at[2, :N_CLASS].set(mb3)

    return (cw1, cw2, cw3, caux, wih_t.astype(bf16), whh_t.astype(bf16), lb,
            aw.astype(bf16), aaux,
            mw1.astype(bf16), mw2.astype(bf16), mw3.astype(bf16), mb)


# ----------------------------------- main -------------------------------------
if __name__ == "__main__":
    key = jax.random.PRNGKey(0)
    kx, kp = jax.random.split(key)
    x = jax.random.normal(kx, (BATCH, 1, N_MFCC, T_IN), jnp.float32)
    params = init_params(kp)
    probs = jax.block_until_ready(forward(x, params))
    assert probs.shape == (BATCH, N_CLASS)
    assert bool(jnp.all(jnp.isfinite(probs)))
    assert bool(jnp.allclose(jnp.sum(probs, axis=1), 1.0, atol=1e-5))
    print("KERNEL_OK")
</pallas_src>

<mosaic_0001>
module attributes {stable_mosaic.version = 11 : i64} {
  func.func @_fused_kernel(%arg0: i32, %arg1: memref<1x40x16xf32, #tpu.memory_space<vmem>>, %arg2: memref<112x32xbf16, #tpu.memory_space<vmem>>, %arg3: memref<160x32xbf16, #tpu.memory_space<vmem>>, %arg4: memref<96x32xbf16, #tpu.memory_space<vmem>>, %arg5: memref<9x32xf32, #tpu.memory_space<vmem>>, %arg6: memref<32x128xbf16, #tpu.memory_space<vmem>>, %arg7: memref<32x128xbf16, #tpu.memory_space<vmem>>, %arg8: memref<1x128xf32, #tpu.memory_space<vmem>>, %arg9: memref<32x32xbf16, #tpu.memory_space<vmem>>, %arg10: memref<2x32xf32, #tpu.memory_space<vmem>>, %arg11: memref<32x16xbf16, #tpu.memory_space<vmem>>, %arg12: memref<16x16xbf16, #tpu.memory_space<vmem>>, %arg13: memref<16x8xbf16, #tpu.memory_space<vmem>>, %arg14: memref<3x16xf32, #tpu.memory_space<vmem>>, %arg15: memref<1x1x8xf32, #tpu.memory_space<vmem>>, %arg16: memref<34x112xf32, #tpu.memory_space<vmem>>, %arg17: memref<30x160xf32, #tpu.memory_space<vmem>>, %arg18: memref<28x96xf32, #tpu.memory_space<vmem>>) attributes {dimension_semantics = [#tpu.dimension_semantics<parallel>], iteration_bounds = array<i64: 2>, scalar_prefetch = 0 : i64, scratch_operands = 3 : i64, tpu.core_type = #tpu.core_type<tc>, window_params = [{transform_indices = @transform_0, window_bounds = array<i64: 1, 40, 16>}, {pipeline_mode = #tpu.pipeline_mode<synchronous>, transform_indices = @transform_1, window_bounds = array<i64: 112, 32>}, {pipeline_mode = #tpu.pipeline_mode<synchronous>, transform_indices = @transform_2, window_bounds = array<i64: 160, 32>}, {pipeline_mode = #tpu.pipeline_mode<synchronous>, transform_indices = @transform_3, window_bounds = array<i64: 96, 32>}, {pipeline_mode = #tpu.pipeline_mode<synchronous>, transform_indices = @transform_4, window_bounds = array<i64: 9, 32>}, {pipeline_mode = #tpu.pipeline_mode<synchronous>, transform_indices = @transform_5, window_bounds = array<i64: 32, 128>}, {pipeline_mode = #tpu.pipeline_mode<synchronous>, transform_indices = @transform_6, window_bounds = array<i64: 32, 128>}, {pipeline_mode = #tpu.pipeline_mode<synchronous>, transform_indices = @transform_7, window_bounds = array<i64: 1, 128>}, {pipeline_mode = #tpu.pipeline_mode<synchronous>, transform_indices = @transform_8, window_bounds = array<i64: 32, 32>}, {pipeline_mode = #tpu.pipeline_mode<synchronous>, transform_indices = @transform_9, window_bounds = array<i64: 2, 32>}, {pipeline_mode = #tpu.pipeline_mode<synchronous>, transform_indices = @transform_10, window_bounds = array<i64: 32, 16>}, {pipeline_mode = #tpu.pipeline_mode<synchronous>, transform_indices = @transform_11, window_bounds = array<i64: 16, 16>}, {pipeline_mode = #tpu.pipeline_mode<synchronous>, transform_indices = @transform_12, window_bounds = array<i64: 16, 8>}, {pipeline_mode = #tpu.pipeline_mode<synchronous>, transform_indices = @transform_13, window_bounds = array<i64: 3, 16>}, {transform_indices = @transform_14, window_bounds = array<i64: 1, 1, 8>}]} {
    %c0 = arith.constant 0 : index
    %c0_0 = arith.constant 0 : index
    %c0_1 = arith.constant 0 : index
    %0 = vector.load %arg1[%c0, %c0_0, %c0_1] : memref<1x40x16xf32, #tpu.memory_space<vmem>>, vector<1x40x16xf32>
    %1 = vector.shape_cast %0 : vector<1x40x16xf32> to vector<40x16xf32>
    %c0_2 = arith.constant 0 : index
    %c0_3 = arith.constant 0 : index
    %2 = vector.load %arg5[%c0_2, %c0_3] : memref<9x32xf32, #tpu.memory_space<vmem>>, vector<9x32xf32>
    %3 = vector.extract_strided_slice %2 {offsets = [0, 0], sizes = [3, 32], strides = [1, 1]} : vector<9x32xf32> to vector<3x32xf32>
    %4 = vector.extract_strided_slice %1 {offsets = [0, 0], sizes = [34, 16], strides = [1, 1]} : vector<40x16xf32> to vector<34x16xf32>
    %c0_4 = arith.constant 0 : index
    %c0_5 = arith.constant 0 : index
    %5 = vector.load %arg16[%c0_4, %c0_5] : memref<34x112xf32, #tpu.memory_space<vmem>>, vector<34x16xf32>
    tpu.vector_store %arg16[%c0_4, %c0_5], %4 {strides = array<i32>} : memref<34x112xf32, #tpu.memory_space<vmem>>, vector<34x16xf32>,
    %6 = vector.extract_strided_slice %1 {offsets = [1, 0], sizes = [34, 16], strides = [1, 1]} : vector<40x16xf32> to vector<34x16xf32>
    %c0_6 = arith.constant 0 : index
    %c16 = arith.constant 16 : index
    %7 = vector.load %arg16[%c0_6, %c16] : memref<34x112xf32, #tpu.memory_space<vmem>>, vector<34x16xf32>
    tpu.vector_store %arg16[%c0_6, %c16], %6 {strides = array<i32>} : memref<34x112xf32, #tpu.memory_space<vmem>>, vector<34x16xf32>,
    %8 = vector.extract_strided_slice %1 {offsets = [2, 0], sizes = [34, 16], strides = [1, 1]} : vector<40x16xf32> to vector<34x16xf32>
    %c0_7 = arith.constant 0 : index
    %c32 = arith.constant 32 : index
    %9 = vector.load %arg16[%c0_7, %c32] : memref<34x112xf32, #tpu.memory_space<vmem>>, vector<34x16xf32>
    tpu.vector_store %arg16[%c0_7, %c32], %8 {strides = array<i32>} : memref<34x112xf32, #tpu.memory_space<vmem>>, vector<34x16xf32>,
    %10 = vector.extract_strided_slice %1 {offsets = [3, 0], sizes = [34, 16], strides = [1, 1]} : vector<40x16xf32> to vector<34x16xf32>
    %c0_8 = arith.constant 0 : index
    %c48 = arith.constant 48 : index
    %11 = vector.load %arg16[%c0_8, %c48] : memref<34x112xf32, #tpu.memory_space<vmem>>, vector<34x16xf32>
    tpu.vector_store %arg16[%c0_8, %c48], %10 {strides = array<i32>} : memref<34x112xf32, #tpu.memory_space<vmem>>, vector<34x16xf32>,
    %12 = vector.extract_strided_slice %1 {offsets = [4, 0], sizes = [34, 16], strides = [1, 1]} : vector<40x16xf32> to vector<34x16xf32>
    %c0_9 = arith.constant 0 : index
    %c64 = arith.constant 64 : index
    %13 = vector.load %arg16[%c0_9, %c64] : memref<34x112xf32, #tpu.memory_space<vmem>>, vector<34x16xf32>
    tpu.vector_store %arg16[%c0_9, %c64], %12 {strides = array<i32>} : memref<34x112xf32, #tpu.memory_space<vmem>>, vector<34x16xf32>,
    %14 = vector.extract_strided_slice %1 {offsets = [5, 0], sizes = [34, 16], strides = [1, 1]} : vector<40x16xf32> to vector<34x16xf32>
    %c0_10 = arith.constant 0 : index
    %c80 = arith.constant 80 : index
    %15 = vector.load %arg16[%c0_10, %c80] : memref<34x112xf32, #tpu.memory_space<vmem>>, vector<34x16xf32>
    tpu.vector_store %arg16[%c0_10, %c80], %14 {strides = array<i32>} : memref<34x112xf32, #tpu.memory_space<vmem>>, vector<34x16xf32>,
    %16 = vector.extract_strided_slice %1 {offsets = [6, 0], sizes = [34, 16], strides = [1, 1]} : vector<40x16xf32> to vector<34x16xf32>
    %c0_11 = arith.constant 0 : index
    %c96 = arith.constant 96 : index
    %17 = vector.load %arg16[%c0_11, %c96] : memref<34x112xf32, #tpu.memory_space<vmem>>, vector<34x16xf32>
    tpu.vector_store %arg16[%c0_11, %c96], %16 {strides = array<i32>} : memref<34x112xf32, #tpu.memory_space<vmem>>, vector<34x16xf32>,
    %c0_12 = arith.constant 0 : index
    %c0_13 = arith.constant 0 : index
    %18 = vector.load %arg16[%c0_12, %c0_13] : memref<34x112xf32, #tpu.memory_space<vmem>>, vector<34x112xf32>
    %19 = arith.truncf %18 : vector<34x112xf32> to vector<34x112xbf16>
    %c0_14 = arith.constant 0 : index
    %c0_15 = arith.constant 0 : index
    %20 = vector.load %arg2[%c0_14, %c0_15] : memref<112x32xbf16, #tpu.memory_space<vmem>>, vector<112x32xbf16>
    %cst = arith.constant dense<0.000000e+00> : vector<34x32xf32>
    %21 = tpu.matmul %19, %20, %cst {dimension_numbers = #tpu.dot_dimension_numbers<[1], [0], [0], [1], [0, 0, 1, 1], [], []>} : vector<34x112xbf16>, vector<112x32xbf16>, vector<34x32xf32> -> vector<34x32xf32>
    %22 = vector.extract_strided_slice %3 {offsets = [0, 0], sizes = [1, 32], strides = [1, 1]} : vector<3x32xf32> to vector<1x32xf32>
    %23 = vector.broadcast %22 : vector<1x32xf32> to vector<34x32xf32>
    %24 = arith.addf %21, %23 : vector<34x32xf32>
    %cst_16 = arith.constant 0.000000e+00 : f32
    %25 = vector.broadcast %cst_16 : f32 to vector<34x32xf32>
    %26 = arith.maximumf %24, %25 : vector<34x32xf32>
    %27 = vector.extract_strided_slice %3 {offsets = [1, 0], sizes = [1, 32], strides = [1, 1]} : vector<3x32xf32> to vector<1x32xf32>
    %28 = vector.broadcast %27 : vector<1x32xf32> to vector<34x32xf32>
    %29 = arith.mulf %26, %28 : vector<34x32xf32>
    %30 = vector.extract_strided_slice %3 {offsets = [2, 0], sizes = [1, 32], strides = [1, 1]} : vector<3x32xf32> to vector<1x32xf32>
    %31 = vector.broadcast %30 : vector<1x32xf32> to vector<34x32xf32>
    %32 = arith.addf %29, %31 : vector<34x32xf32>
    %33 = vector.extract_strided_slice %2 {offsets = [3, 0], sizes = [3, 32], strides = [1, 1]} : vector<9x32xf32> to vector<3x32xf32>
    %34 = vector.extract_strided_slice %32 {offsets = [0, 0], sizes = [30, 32], strides = [1, 1]} : vector<34x32xf32> to vector<30x32xf32>
    %c0_17 = arith.constant 0 : index
    %c0_18 = arith.constant 0 : index
    %35 = vector.load %arg17[%c0_17, %c0_18] : memref<30x160xf32, #tpu.memory_space<vmem>>, vector<30x32xf32>
    tpu.vector_store %arg17[%c0_17, %c0_18], %34 {strides = array<i32>} : memref<30x160xf32, #tpu.memory_space<vmem>>, vector<30x32xf32>,
    %36 = vector.extract_strided_slice %32 {offsets = [1, 0], sizes = [30, 32], strides = [1, 1]} : vector<34x32xf32> to vector<30x32xf32>
    %c0_19 = arith.constant 0 : index
    %c32_20 = arith.constant 32 : index
    %37 = vector.load %arg17[%c0_19, %c32_20] : memref<30x160xf32, #tpu.memory_space<vmem>>, vector<30x32xf32>
    tpu.vector_store %arg17[%c0_19, %c32_20], %36 {strides = array<i32>} : memref<30x160xf32, #tpu.memory_space<vmem>>, vector<30x32xf32>,
    %38 = vector.extract_strided_slice %32 {offsets = [2, 0], sizes = [30, 32], strides = [1, 1]} : vector<34x32xf32> to vector<30x32xf32>
    %c0_21 = arith.constant 0 : index
    %c64_22 = arith.constant 64 : index
    %39 = vector.load %arg17[%c0_21, %c64_22] : memref<30x160xf32, #tpu.memory_space<vmem>>, vector<30x32xf32>
    tpu.vector_store %arg17[%c0_21, %c64_22], %38 {strides = array<i32>} : memref<30x160xf32, #tpu.memory_space<vmem>>, vector<30x32xf32>,
    %40 = vector.extract_strided_slice %32 {offsets = [3, 0], sizes = [30, 32], strides = [1, 1]} : vector<34x32xf32> to vector<30x32xf32>
    %c0_23 = arith.constant 0 : index
    %c96_24 = arith.constant 96 : index
    %41 = vector.load %arg17[%c0_23, %c96_24] : memref<30x160xf32, #tpu.memory_space<vmem>>, vector<30x32xf32>
    tpu.vector_store %arg17[%c0_23, %c96_24], %40 {strides = array<i32>} : memref<30x160xf32, #tpu.memory_space<vmem>>, vector<30x32xf32>,
    %42 = vector.extract_strided_slice %32 {offsets = [4, 0], sizes = [30, 32], strides = [1, 1]} : vector<34x32xf32> to vector<30x32xf32>
    %c0_25 = arith.constant 0 : index
    %c128 = arith.constant 128 : index
    %43 = vector.load %arg17[%c0_25, %c128] : memref<30x160xf32, #tpu.memory_space<vmem>>, vector<30x32xf32>
    tpu.vector_store %arg17[%c0_25, %c128], %42 {strides = array<i32>} : memref<30x160xf32, #tpu.memory_space<vmem>>, vector<30x32xf32>,
    %c0_26 = arith.constant 0 : index
    %c0_27 = arith.constant 0 : index
    %44 = vector.load %arg17[%c0_26, %c0_27] : memref<30x160xf32, #tpu.memory_space<vmem>>, vector<30x160xf32>
    %45 = arith.truncf %44 : vector<30x160xf32> to vector<30x160xbf16>
    %c0_28 = arith.constant 0 : index
    %c0_29 = arith.constant 0 : index
    %46 = vector.load %arg3[%c0_28, %c0_29] : memref<160x32xbf16, #tpu.memory_space<vmem>>, vector<160x32xbf16>
    %cst_30 = arith.constant dense<0.000000e+00> : vector<30x32xf32>
    %47 = tpu.matmul %45, %46, %cst_30 {dimension_numbers = #tpu.dot_dimension_numbers<[1], [0], [0], [1], [0, 0, 1, 1], [], []>} : vector<30x160xbf16>, vector<160x32xbf16>, vector<30x32xf32> -> vector<30x32xf32>
    %48 = vector.extract_strided_slice %33 {offsets = [0, 0], sizes = [1, 32], strides = [1, 1]} : vector<3x32xf32> to vector<1x32xf32>
    %49 = vector.broadcast %48 : vector<1x32xf32> to vector<30x32xf32>
    %50 = arith.addf %47, %49 : vector<30x32xf32>
    %cst_31 = arith.constant 0.000000e+00 : f32
    %51 = vector.broadcast %cst_31 : f32 to vector<30x32xf32>
    %52 = arith.maximumf %50, %51 : vector<30x32xf32>
    %53 = vector.extract_strided_slice %33 {offsets = [1, 0], sizes = [1, 32], strides = [1, 1]} : vector<3x32xf32> to vector<1x32xf32>
    %54 = vector.broadcast %53 : vector<1x32xf32> to vector<30x32xf32>
    %55 = arith.mulf %52, %54 : vector<30x32xf32>
    %56 = vector.extract_strided_slice %33 {offsets = [2, 0], sizes = [1, 32], strides = [1, 1]} : vector<3x32xf32> to vector<1x32xf32>
    %57 = vector.broadcast %56 : vector<1x32xf32> to vector<30x32xf32>
    %58 = arith.addf %55, %57 : vector<30x32xf32>
    %59 = vector.extract_strided_slice %2 {offsets = [6, 0], sizes = [3, 32], strides = [1, 1]} : vector<9x32xf32> to vector<3x32xf32>
    %60 = vector.extract_strided_slice %58 {offsets = [0, 0], sizes = [28, 32], strides = [1, 1]} : vector<30x32xf32> to vector<28x32xf32>
    %c0_32 = arith.constant 0 : index
    %c0_33 = arith.constant 0 : index
    %61 = vector.load %arg18[%c0_32, %c0_33] : memref<28x96xf32, #tpu.memory_space<vmem>>, vector<28x32xf32>
    tpu.vector_store %arg18[%c0_32, %c0_33], %60 {strides = array<i32>} : memref<28x96xf32, #tpu.memory_space<vmem>>, vector<28x32xf32>,
    %62 = vector.extract_strided_slice %58 {offsets = [1, 0], sizes = [28, 32], strides = [1, 1]} : vector<30x32xf32> to vector<28x32xf32>
    %c0_34 = arith.constant 0 : index
    %c32_35 = arith.constant 32 : index
    %63 = vector.load %arg18[%c0_34, %c32_35] : memref<28x96xf32, #tpu.memory_space<vmem>>, vector<28x32xf32>
    tpu.vector_store %arg18[%c0_34, %c32_35], %62 {strides = array<i32>} : memref<28x96xf32, #tpu.memory_space<vmem>>, vector<28x32xf32>,
    %64 = vector.extract_strided_slice %58 {offsets = [2, 0], sizes = [28, 32], strides = [1, 1]} : vector<30x32xf32> to vector<28x32xf32>
    %c0_36 = arith.constant 0 : index
    %c64_37 = arith.constant 64 : index
    %65 = vector.load %arg18[%c0_36, %c64_37] : memref<28x96xf32, #tpu.memory_space<vmem>>, vector<28x32xf32>
    tpu.vector_store %arg18[%c0_36, %c64_37], %64 {strides = array<i32>} : memref<28x96xf32, #tpu.memory_space<vmem>>, vector<28x32xf32>,
    %c0_38 = arith.constant 0 : index
    %c0_39 = arith.constant 0 : index
    %66 = vector.load %arg18[%c0_38, %c0_39] : memref<28x96xf32, #tpu.memory_space<vmem>>, vector<28x96xf32>
    %67 = arith.truncf %66 : vector<28x96xf32> to vector<28x96xbf16>
    %c0_40 = arith.constant 0 : index
    %c0_41 = arith.constant 0 : index
    %68 = vector.load %arg4[%c0_40, %c0_41] : memref<96x32xbf16, #tpu.memory_space<vmem>>, vector<96x32xbf16>
    %cst_42 = arith.constant dense<0.000000e+00> : vector<28x32xf32>
    %69 = tpu.matmul %67, %68, %cst_42 {dimension_numbers = #tpu.dot_dimension_numbers<[1], [0], [0], [1], [0, 0, 1, 1], [], []>} : vector<28x96xbf16>, vector<96x32xbf16>, vector<28x32xf32> -> vector<28x32xf32>
    %70 = vector.extract_strided_slice %59 {offsets = [0, 0], sizes = [1, 32], strides = [1, 1]} : vector<3x32xf32> to vector<1x32xf32>
    %71 = vector.broadcast %70 : vector<1x32xf32> to vector<28x32xf32>
    %72 = arith.addf %69, %71 : vector<28x32xf32>
    %cst_43 = arith.constant 0.000000e+00 : f32
    %73 = vector.broadcast %cst_43 : f32 to vector<28x32xf32>
    %74 = arith.maximumf %72, %73 : vector<28x32xf32>
    %75 = vector.extract_strided_slice %59 {offsets = [1, 0], sizes = [1, 32], strides = [1, 1]} : vector<3x32xf32> to vector<1x32xf32>
    %76 = vector.broadcast %75 : vector<1x32xf32> to vector<28x32xf32>
    %77 = arith.mulf %74, %76 : vector<28x32xf32>
    %78 = vector.extract_strided_slice %59 {offsets = [2, 0], sizes = [1, 32], strides = [1, 1]} : vector<3x32xf32> to vector<1x32xf32>
    %79 = vector.broadcast %78 : vector<1x32xf32> to vector<28x32xf32>
    %80 = arith.addf %77, %79 : vector<28x32xf32>
    %81 = arith.truncf %80 : vector<28x32xf32> to vector<28x32xbf16>
    %c0_44 = arith.constant 0 : index
    %c0_45 = arith.constant 0 : index
    %82 = vector.load %arg6[%c0_44, %c0_45] : memref<32x128xbf16, #tpu.memory_space<vmem>>, vector<32x128xbf16>
    %cst_46 = arith.constant dense<0.000000e+00> : vector<28x128xf32>
    %83 = tpu.matmul %81, %82, %cst_46 {dimension_numbers = #tpu.dot_dimension_numbers<[1], [0], [0], [1], [0, 0, 1, 1], [], []>} : vector<28x32xbf16>, vector<32x128xbf16>, vector<28x128xf32> -> vector<28x128xf32>
    %c0_47 = arith.constant 0 : index
    %c0_48 = arith.constant 0 : index
    %84 = vector.load %arg8[%c0_47, %c0_48] : memref<1x128xf32, #tpu.memory_space<vmem>>, vector<1x128xf32>
    %85 = vector.broadcast %84 : vector<1x128xf32> to vector<28x128xf32>
    %86 = arith.addf %83, %85 : vector<28x128xf32>
    %c0_49 = arith.constant 0 : index
    %c0_50 = arith.constant 0 : index
    %87 = vector.load %arg7[%c0_49, %c0_50] : memref<32x128xbf16, #tpu.memory_space<vmem>>, vector<32x128xbf16>
    %cst_51 = arith.constant 0.000000e+00 : f32
    %88 = vector.broadcast %cst_51 : f32 to vector<1x32xf32>
    %cst_52 = arith.constant 0.000000e+00 : f32
    %89 = vector.broadcast %cst_52 : f32 to vector<1x32xf32>
    %90 = vector.extract_strided_slice %86 {offsets = [0, 0], sizes = [1, 128], strides = [1, 1]} : vector<28x128xf32> to vector<1x128xf32>
    %91 = arith.truncf %88 : vector<1x32xf32> to vector<1x32xbf16>
    %cst_53 = arith.constant dense<0.000000e+00> : vector<1x128xf32>
    %92 = tpu.matmul %91, %87, %cst_53 {dimension_numbers = #tpu.dot_dimension_numbers<[1], [0], [0], [1], [0, 0, 1, 1], [], []>} : vector<1x32xbf16>, vector<32x128xbf16>, vector<1x128xf32> -> vector<1x128xf32>
    %93 = arith.addf %90, %92 : vector<1x128xf32>
    %94 = vector.extract_strided_slice %93 {offsets = [0, 0], sizes = [1, 32], strides = [1, 1]} : vector<1x128xf32> to vector<1x32xf32>
    %95 = arith.negf %94 : vector<1x32xf32>
    %96 = math.exp %95 : vector<1x32xf32>
    %cst_54 = arith.constant 1.000000e+00 : f32
    %97 = vector.broadcast %cst_54 : f32 to vector<1x32xf32>
    %98 = arith.addf %97, %96 : vector<1x32xf32>
    %99 = arith.divf %97, %98 : vector<1x32xf32>
    %100 = vector.extract_strided_slice %93 {offsets = [0, 32], sizes = [1, 32], strides = [1, 1]} : vector<1x128xf32> to vector<1x32xf32>
    %101 = arith.negf %100 : vector<1x32xf32>
    %102 = math.exp %101 : vector<1x32xf32>
    %cst_55 = arith.constant 1.000000e+00 : f32
    %103 = vector.broadcast %cst_55 : f32 to vector<1x32xf32>
    %104 = arith.addf %103, %102 : vector<1x32xf32>
    %105 = arith.divf %103, %104 : vector<1x32xf32>
    %106 = vector.extract_strided_slice %93 {offsets = [0, 64], sizes = [1, 32], strides = [1, 1]} : vector<1x128xf32> to vector<1x32xf32>
    %107 = math.tanh %106 : vector<1x32xf32>
    %108 = vector.extract_strided_slice %93 {offsets = [0, 96], sizes = [1, 32], strides = [1, 1]} : vector<1x128xf32> to vector<1x32xf32>
    %109 = arith.negf %108 : vector<1x32xf32>
    %110 = math.exp %109 : vector<1x32xf32>
    %cst_56 = arith.constant 1.000000e+00 : f32
    %111 = vector.broadcast %cst_56 : f32 to vector<1x32xf32>
    %112 = arith.addf %111, %110 : vector<1x32xf32>
    %113 = arith.divf %111, %112 : vector<1x32xf32>
    %114 = arith.mulf %105, %89 : vector<1x32xf32>
    %115 = arith.mulf %99, %107 : vector<1x32xf32>
    %116 = arith.addf %114, %115 : vector<1x32xf32>
    %117 = math.tanh %116 : vector<1x32xf32>
    %118 = arith.mulf %113, %117 : vector<1x32xf32>
    %119 = vector.extract_strided_slice %86 {offsets = [1, 0], sizes = [1, 128], strides = [1, 1]} : vector<28x128xf32> to vector<1x128xf32>
    %120 = arith.truncf %118 : vector<1x32xf32> to vector<1x32xbf16>
    %cst_57 = arith.constant dense<0.000000e+00> : vector<1x128xf32>
    %121 = tpu.matmul %120, %87, %cst_57 {dimension_numbers = #tpu.dot_dimension_numbers<[1], [0], [0], [1], [0, 0, 1, 1], [], []>} : vector<1x32xbf16>, vector<32x128xbf16>, vector<1x128xf32> -> vector<1x128xf32>
    %122 = arith.addf %119, %121 : vector<1x128xf32>
    %123 = vector.extract_strided_slice %122 {offsets = [0, 0], sizes = [1, 32], strides = [1, 1]} : vector<1x128xf32> to vector<1x32xf32>
    %124 = arith.negf %123 : vector<1x32xf32>
    %125 = math.exp %124 : vector<1x32xf32>
    %cst_58 = arith.constant 1.000000e+00 : f32
    %126 = vector.broadcast %cst_58 : f32 to vector<1x32xf32>
    %127 = arith.addf %126, %125 : vector<1x32xf32>
    %128 = arith.divf %126, %127 : vector<1x32xf32>
    %129 = vector.extract_strided_slice %122 {offsets = [0, 32], sizes = [1, 32], strides = [1, 1]} : vector<1x128xf32> to vector<1x32xf32>
    %130 = arith.negf %129 : vector<1x32xf32>
    %131 = math.exp %130 : vector<1x32xf32>
    %cst_59 = arith.constant 1.000000e+00 : f32
    %132 = vector.broadcast %cst_59 : f32 to vector<1x32xf32>
    %133 = arith.addf %132, %131 : vector<1x32xf32>
    %134 = arith.divf %132, %133 : vector<1x32xf32>
    %135 = vector.extract_strided_slice %122 {offsets = [0, 64], sizes = [1, 32], strides = [1, 1]} : vector<1x128xf32> to vector<1x32xf32>
    %136 = math.tanh %135 : vector<1x32xf32>
    %137 = vector.extract_strided_slice %122 {offsets = [0, 96], sizes = [1, 32], strides = [1, 1]} : vector<1x128xf32> to vector<1x32xf32>
    %138 = arith.negf %137 : vector<1x32xf32>
    %139 = math.exp %138 : vector<1x32xf32>
    %cst_60 = arith.constant 1.000000e+00 : f32
    %140 = vector.broadcast %cst_60 : f32 to vector<1x32xf32>
    %141 = arith.addf %140, %139 : vector<1x32xf32>
    %142 = arith.divf %140, %141 : vector<1x32xf32>
    %143 = arith.mulf %134, %116 : vector<1x32xf32>
    %144 = arith.mulf %128, %136 : vector<1x32xf32>
    %145 = arith.addf %143, %144 : vector<1x32xf32>
    %146 = math.tanh %145 : vector<1x32xf32>
    %147 = arith.mulf %142, %146 : vector<1x32xf32>
    %148 = vector.extract_strided_slice %86 {offsets = [2, 0], sizes = [1, 128], strides = [1, 1]} : vector<28x128xf32> to vector<1x128xf32>
    %149 = arith.truncf %147 : vector<1x32xf32> to vector<1x32xbf16>
    %cst_61 = arith.constant dense<0.000000e+00> : vector<1x128xf32>
    %150 = tpu.matmul %149, %87, %cst_61 {dimension_numbers = #tpu.dot_dimension_numbers<[1], [0], [0], [1], [0, 0, 1, 1], [], []>} : vector<1x32xbf16>, vector<32x128xbf16>, vector<1x128xf32> -> vector<1x128xf32>
    %151 = arith.addf %148, %150 : vector<1x128xf32>
    %152 = vector.extract_strided_slice %151 {offsets = [0, 0], sizes = [1, 32], strides = [1, 1]} : vector<1x128xf32> to vector<1x32xf32>
    %153 = arith.negf %152 : vector<1x32xf32>
    %154 = math.exp %153 : vector<1x32xf32>
    %cst_62 = arith.constant 1.000000e+00 : f32
    %155 = vector.broadcast %cst_62 : f32 to vector<1x32xf32>
    %156 = arith.addf %155, %154 : vector<1x32xf32>
    %157 = arith.divf %155, %156 : vector<1x32xf32>
    %158 = vector.extract_strided_slice %151 {offsets = [0, 32], sizes = [1, 32], strides = [1, 1]} : vector<1x128xf32> to vector<1x32xf32>
    %159 = arith.negf %158 : vector<1x32xf32>
    %160 = math.exp %159 : vector<1x32xf32>
    %cst_63 = arith.constant 1.000000e+00 : f32
    %161 = vector.broadcast %cst_63 : f32 to vector<1x32xf32>
    %162 = arith.addf %161, %160 : vector<1x32xf32>
    %163 = arith.divf %161, %162 : vector<1x32xf32>
    %164 = vector.extract_strided_slice %151 {offsets = [0, 64], sizes = [1, 32], strides = [1, 1]} : vector<1x128xf32> to vector<1x32xf32>
    %165 = math.tanh %164 : vector<1x32xf32>
    %166 = vector.extract_strided_slice %151 {offsets = [0, 96], sizes = [1, 32], strides = [1, 1]} : vector<1x128xf32> to vector<1x32xf32>
    %167 = arith.negf %166 : vector<1x32xf32>
    %168 = math.exp %167 : vector<1x32xf32>
    %cst_64 = arith.constant 1.000000e+00 : f32
    %169 = vector.broadcast %cst_64 : f32 to vector<1x32xf32>
    %170 = arith.addf %169, %168 : vector<1x32xf32>
    %171 = arith.divf %169, %170 : vector<1x32xf32>
    %172 = arith.mulf %163, %145 : vector<1x32xf32>
    %173 = arith.mulf %157, %165 : vector<1x32xf32>
    %174 = arith.addf %172, %173 : vector<1x32xf32>
    %175 = math.tanh %174 : vector<1x32xf32>
    %176 = arith.mulf %171, %175 : vector<1x32xf32>
    %177 = vector.extract_strided_slice %86 {offsets = [3, 0], sizes = [1, 128], strides = [1, 1]} : vector<28x128xf32> to vector<1x128xf32>
    %178 = arith.truncf %176 : vector<1x32xf32> to vector<1x32xbf16>
    %cst_65 = arith.constant dense<0.000000e+00> : vector<1x128xf32>
    %179 = tpu.matmul %178, %87, %cst_65 {dimension_numbers = #tpu.dot_dimension_numbers<[1], [0], [0], [1], [0, 0, 1, 1], [], []>} : vector<1x32xbf16>, vector<32x128xbf16>, vector<1x128xf32> -> vector<1x128xf32>
    %180 = arith.addf %177, %179 : vector<1x128xf32>
    %181 = vector.extract_strided_slice %180 {offsets = [0, 0], sizes = [1, 32], strides = [1, 1]} : vector<1x128xf32> to vector<1x32xf32>
    %182 = arith.negf %181 : vector<1x32xf32>
    %183 = math.exp %182 : vector<1x32xf32>
    %cst_66 = arith.constant 1.000000e+00 : f32
    %184 = vector.broadcast %cst_66 : f32 to vector<1x32xf32>
    %185 = arith.addf %184, %183 : vector<1x32xf32>
    %186 = arith.divf %184, %185 : vector<1x32xf32>
    %187 = vector.extract_strided_slice %180 {offsets = [0, 32], sizes = [1, 32], strides = [1, 1]} : vector<1x128xf32> to vector<1x32xf32>
    %188 = arith.negf %187 : vector<1x32xf32>
    %189 = math.exp %188 : vector<1x32xf32>
    %cst_67 = arith.constant 1.000000e+00 : f32
    %190 = vector.broadcast %cst_67 : f32 to vector<1x32xf32>
    %191 = arith.addf %190, %189 : vector<1x32xf32>
    %192 = arith.divf %190, %191 : vector<1x32xf32>
    %193 = vector.extract_strided_slice %180 {offsets = [0, 64], sizes = [1, 32], strides = [1, 1]} : vector<1x128xf32> to vector<1x32xf32>
    %194 = math.tanh %193 : vector<1x32xf32>
    %195 = vector.extract_strided_slice %180 {offsets = [0, 96], sizes = [1, 32], strides = [1, 1]} : vector<1x128xf32> to vector<1x32xf32>
    %196 = arith.negf %195 : vector<1x32xf32>
    %197 = math.exp %196 : vector<1x32xf32>
    %cst_68 = arith.constant 1.000000e+00 : f32
    %198 = vector.broadcast %cst_68 : f32 to vector<1x32xf32>
    %199 = arith.addf %198, %197 : vector<1x32xf32>
    %200 = arith.divf %198, %199 : vector<1x32xf32>
    %201 = arith.mulf %192, %174 : vector<1x32xf32>
    %202 = arith.mulf %186, %194 : vector<1x32xf32>
    %203 = arith.addf %201, %202 : vector<1x32xf32>
    %204 = math.tanh %203 : vector<1x32xf32>
    %205 = arith.mulf %200, %204 : vector<1x32xf32>
    %206 = vector.extract_strided_slice %86 {offsets = [4, 0], sizes = [1, 128], strides = [1, 1]} : vector<28x128xf32> to vector<1x128xf32>
    %207 = arith.truncf %205 : vector<1x32xf32> to vector<1x32xbf16>
    %cst_69 = arith.constant dense<0.000000e+00> : vector<1x128xf32>
    %208 = tpu.matmul %207, %87, %cst_69 {dimension_numbers = #tpu.dot_dimension_numbers<[1], [0], [0], [1], [0, 0, 1, 1], [], []>} : vector<1x32xbf16>, vector<32x128xbf16>, vector<1x128xf32> -> vector<1x128xf32>
    %209 = arith.addf %206, %208 : vector<1x128xf32>
    %210 = vector.extract_strided_slice %209 {offsets = [0, 0], sizes = [1, 32], strides = [1, 1]} : vector<1x128xf32> to vector<1x32xf32>
    %211 = arith.negf %210 : vector<1x32xf32>
    %212 = math.exp %211 : vector<1x32xf32>
    %cst_70 = arith.constant 1.000000e+00 : f32
    %213 = vector.broadcast %cst_70 : f32 to vector<1x32xf32>
    %214 = arith.addf %213, %212 : vector<1x32xf32>
    %215 = arith.divf %213, %214 : vector<1x32xf32>
    %216 = vector.extract_strided_slice %209 {offsets = [0, 32], sizes = [1, 32], strides = [1, 1]} : vector<1x128xf32> to vector<1x32xf32>
    %217 = arith.negf %216 : vector<1x32xf32>
    %218 = math.exp %217 : vector<1x32xf32>
    %cst_71 = arith.constant 1.000000e+00 : f32
    %219 = vector.broadcast %cst_71 : f32 to vector<1x32xf32>
    %220 = arith.addf %219, %218 : vector<1x32xf32>
    %221 = arith.divf %219, %220 : vector<1x32xf32>
    %222 = vector.extract_strided_slice %209 {offsets = [0, 64], sizes = [1, 32], strides = [1, 1]} : vector<1x128xf32> to vector<1x32xf32>
    %223 = math.tanh %222 : vector<1x32xf32>
    %224 = vector.extract_strided_slice %209 {offsets = [0, 96], sizes = [1, 32], strides = [1, 1]} : vector<1x128xf32> to vector<1x32xf32>
    %225 = arith.negf %224 : vector<1x32xf32>
    %226 = math.exp %225 : vector<1x32xf32>
    %cst_72 = arith.constant 1.000000e+00 : f32
    %227 = vector.broadcast %cst_72 : f32 to vector<1x32xf32>
    %228 = arith.addf %227, %226 : vector<1x32xf32>
    %229 = arith.divf %227, %228 : vector<1x32xf32>
    %230 = arith.mulf %221, %203 : vector<1x32xf32>
    %231 = arith.mulf %215, %223 : vector<1x32xf32>
    %232 = arith.addf %230, %231 : vector<1x32xf32>
    %233 = math.tanh %232 : vector<1x32xf32>
    %234 = arith.mulf %229, %233 : vector<1x32xf32>
    %235 = vector.extract_strided_slice %86 {offsets = [5, 0], sizes = [1, 128], strides = [1, 1]} : vector<28x128xf32> to vector<1x128xf32>
    %236 = arith.truncf %234 : vector<1x32xf32> to vector<1x32xbf16>
    %cst_73 = arith.constant dense<0.000000e+00> : vector<1x128xf32>
    %237 = tpu.matmul %236, %87, %cst_73 {dimension_numbers = #tpu.dot_dimension_numbers<[1], [0], [0], [1], [0, 0, 1, 1], [], []>} : vector<1x32xbf16>, vector<32x128xbf16>, vector<1x128xf32> -> vector<1x128xf32>
    %238 = arith.addf %235, %237 : vector<1x128xf32>
    %239 = vector.extract_strided_slice %238 {offsets = [0, 0], sizes = [1, 32], strides = [1, 1]} : vector<1x128xf32> to vector<1x32xf32>
    %240 = arith.negf %239 : vector<1x32xf32>
    %241 = math.exp %240 : vector<1x32xf32>
    %cst_74 = arith.constant 1.000000e+00 : f32
    %242 = vector.broadcast %cst_74 : f32 to vector<1x32xf32>
    %243 = arith.addf %242, %241 : vector<1x32xf32>
    %244 = arith.divf %242, %243 : vector<1x32xf32>
    %245 = vector.extract_strided_slice %238 {offsets = [0, 32], sizes = [1, 32], strides = [1, 1]} : vector<1x128xf32> to vector<1x32xf32>
    %246 = arith.negf %245 : vector<1x32xf32>
    %247 = math.exp %246 : vector<1x32xf32>
    %cst_75 = arith.constant 1.000000e+00 : f32
    %248 = vector.broadcast %cst_75 : f32 to vector<1x32xf32>
    %249 = arith.addf %248, %247 : vector<1x32xf32>
    %250 = arith.divf %248, %249 : vector<1x32xf32>
    %251 = vector.extract_strided_slice %238 {offsets = [0, 64], sizes = [1, 32], strides = [1, 1]} : vector<1x128xf32> to vector<1x32xf32>
    %252 = math.tanh %251 : vector<1x32xf32>
    %253 = vector.extract_strided_slice %238 {offsets = [0, 96], sizes = [1, 32], strides = [1, 1]} : vector<1x128xf32> to vector<1x32xf32>
    %254 = arith.negf %253 : vector<1x32xf32>
    %255 = math.exp %254 : vector<1x32xf32>
    %cst_76 = arith.constant 1.000000e+00 : f32
    %256 = vector.broadcast %cst_76 : f32 to vector<1x32xf32>
    %257 = arith.addf %256, %255 : vector<1x32xf32>
    %258 = arith.divf %256, %257 : vector<1x32xf32>
    %259 = arith.mulf %250, %232 : vector<1x32xf32>
    %260 = arith.mulf %244, %252 : vector<1x32xf32>
    %261 = arith.addf %259, %260 : vector<1x32xf32>
    %262 = math.tanh %261 : vector<1x32xf32>
    %263 = arith.mulf %258, %262 : vector<1x32xf32>
    %264 = vector.extract_strided_slice %86 {offsets = [6, 0], sizes = [1, 128], strides = [1, 1]} : vector<28x128xf32> to vector<1x128xf32>
    %265 = arith.truncf %263 : vector<1x32xf32> to vector<1x32xbf16>
    %cst_77 = arith.constant dense<0.000000e+00> : vector<1x128xf32>
    %266 = tpu.matmul %265, %87, %cst_77 {dimension_numbers = #tpu.dot_dimension_numbers<[1], [0], [0], [1], [0, 0, 1, 1], [], []>} : vector<1x32xbf16>, vector<32x128xbf16>, vector<1x128xf32> -> vector<1x128xf32>
    %267 = arith.addf %264, %266 : vector<1x128xf32>
    %268 = vector.extract_strided_slice %267 {offsets = [0, 0], sizes = [1, 32], strides = [1, 1]} : vector<1x128xf32> to vector<1x32xf32>
    %269 = arith.negf %268 : vector<1x32xf32>
    %270 = math.exp %269 : vector<1x32xf32>
    %cst_78 = arith.constant 1.000000e+00 : f32
    %271 = vector.broadcast %cst_78 : f32 to vector<1x32xf32>
    %272 = arith.addf %271, %270 : vector<1x32xf32>
    %273 = arith.divf %271, %272 : vector<1x32xf32>
    %274 = vector.extract_strided_slice %267 {offsets = [0, 32], sizes = [1, 32], strides = [1, 1]} : vector<1x128xf32> to vector<1x32xf32>
    %275 = arith.negf %274 : vector<1x32xf32>
    %276 = math.exp %275 : vector<1x32xf32>
    %cst_79 = arith.constant 1.000000e+00 : f32
    %277 = vector.broadcast %cst_79 : f32 to vector<1x32xf32>
    %278 = arith.addf %277, %276 : vector<1x32xf32>
    %279 = arith.divf %277, %278 : vector<1x32xf32>
    %280 = vector.extract_strided_slice %267 {offsets = [0, 64], sizes = [1, 32], strides = [1, 1]} : vector<1x128xf32> to vector<1x32xf32>
    %281 = math.tanh %280 : vector<1x32xf32>
    %282 = vector.extract_strided_slice %267 {offsets = [0, 96], sizes = [1, 32], strides = [1, 1]} : vector<1x128xf32> to vector<1x32xf32>
    %283 = arith.negf %282 : vector<1x32xf32>
    %284 = math.exp %283 : vector<1x32xf32>
    %cst_80 = arith.constant 1.000000e+00 : f32
    %285 = vector.broadcast %cst_80 : f32 to vector<1x32xf32>
    %286 = arith.addf %285, %284 : vector<1x32xf32>
    %287 = arith.divf %285, %286 : vector<1x32xf32>
    %288 = arith.mulf %279, %261 : vector<1x32xf32>
    %289 = arith.mulf %273, %281 : vector<1x32xf32>
    %290 = arith.addf %288, %289 : vector<1x32xf32>
    %291 = math.tanh %290 : vector<1x32xf32>
    %292 = arith.mulf %287, %291 : vector<1x32xf32>
    %293 = vector.extract_strided_slice %86 {offsets = [7, 0], sizes = [1, 128], strides = [1, 1]} : vector<28x128xf32> to vector<1x128xf32>
    %294 = arith.truncf %292 : vector<1x32xf32> to vector<1x32xbf16>
    %cst_81 = arith.constant dense<0.000000e+00> : vector<1x128xf32>
    %295 = tpu.matmul %294, %87, %cst_81 {dimension_numbers = #tpu.dot_dimension_numbers<[1], [0], [0], [1], [0, 0, 1, 1], [], []>} : vector<1x32xbf16>, vector<32x128xbf16>, vector<1x128xf32> -> vector<1x128xf32>
    %296 = arith.addf %293, %295 : vector<1x128xf32>
    %297 = vector.extract_strided_slice %296 {offsets = [0, 0], sizes = [1, 32], strides = [1, 1]} : vector<1x128xf32> to vector<1x32xf32>
    %298 = arith.negf %297 : vector<1x32xf32>
    %299 = math.exp %298 : vector<1x32xf32>
    %cst_82 = arith.constant 1.000000e+00 : f32
    %300 = vector.broadcast %cst_82 : f32 to vector<1x32xf32>
    %301 = arith.addf %300, %299 : vector<1x32xf32>
    %302 = arith.divf %300, %301 : vector<1x32xf32>
    %303 = vector.extract_strided_slice %296 {offsets = [0, 32], sizes = [1, 32], strides = [1, 1]} : vector<1x128xf32> to vector<1x32xf32>
    %304 = arith.negf %303 : vector<1x32xf32>
    %305 = math.exp %304 : vector<1x32xf32>
    %cst_83 = arith.constant 1.000000e+00 : f32
    %306 = vector.broadcast %cst_83 : f32 to vector<1x32xf32>
    %307 = arith.addf %306, %305 : vector<1x32xf32>
    %308 = arith.divf %306, %307 : vector<1x32xf32>
    %309 = vector.extract_strided_slice %296 {offsets = [0, 64], sizes = [1, 32], strides = [1, 1]} : vector<1x128xf32> to vector<1x32xf32>
    %310 = math.tanh %309 : vector<1x32xf32>
    %311 = vector.extract_strided_slice %296 {offsets = [0, 96], sizes = [1, 32], strides = [1, 1]} : vector<1x128xf32> to vector<1x32xf32>
    %312 = arith.negf %311 : vector<1x32xf32>
    %313 = math.exp %312 : vector<1x32xf32>
    %cst_84 = arith.constant 1.000000e+00 : f32
    %314 = vector.broadcast %cst_84 : f32 to vector<1x32xf32>
    %315 = arith.addf %314, %313 : vector<1x32xf32>
    %316 = arith.divf %314, %315 : vector<1x32xf32>
    %317 = arith.mulf %308, %290 : vector<1x32xf32>
    %318 = arith.mulf %302, %310 : vector<1x32xf32>
    %319 = arith.addf %317, %318 : vector<1x32xf32>
    %320 = math.tanh %319 : vector<1x32xf32>
    %321 = arith.mulf %316, %320 : vector<1x32xf32>
    %322 = vector.extract_strided_slice %86 {offsets = [8, 0], sizes = [1, 128], strides = [1, 1]} : vector<28x128xf32> to vector<1x128xf32>
    %323 = arith.truncf %321 : vector<1x32xf32> to vector<1x32xbf16>
    %cst_85 = arith.constant dense<0.000000e+00> : vector<1x128xf32>
    %324 = tpu.matmul %323, %87, %cst_85 {dimension_numbers = #tpu.dot_dimension_numbers<[1], [0], [0], [1], [0, 0, 1, 1], [], []>} : vector<1x32xbf16>, vector<32x128xbf16>, vector<1x128xf32> -> vector<1x128xf32>
    %325 = arith.addf %322, %324 : vector<1x128xf32>
    %326 = vector.extract_strided_slice %325 {offsets = [0, 0], sizes = [1, 32], strides = [1, 1]} : vector<1x128xf32> to vector<1x32xf32>
    %327 = arith.negf %326 : vector<1x32xf32>
    %328 = math.exp %327 : vector<1x32xf32>
    %cst_86 = arith.constant 1.000000e+00 : f32
    %329 = vector.broadcast %cst_86 : f32 to vector<1x32xf32>
    %330 = arith.addf %329, %328 : vector<1x32xf32>
    %331 = arith.divf %329, %330 : vector<1x32xf32>
    %332 = vector.extract_strided_slice %325 {offsets = [0, 32], sizes = [1, 32], strides = [1, 1]} : vector<1x128xf32> to vector<1x32xf32>
    %333 = arith.negf %332 : vector<1x32xf32>
    %334 = math.exp %333 : vector<1x32xf32>
    %cst_87 = arith.constant 1.000000e+00 : f32
    %335 = vector.broadcast %cst_87 : f32 to vector<1x32xf32>
    %336 = arith.addf %335, %334 : vector<1x32xf32>
    %337 = arith.divf %335, %336 : vector<1x32xf32>
    %338 = vector.extract_strided_slice %325 {offsets = [0, 64], sizes = [1, 32], strides = [1, 1]} : vector<1x128xf32> to vector<1x32xf32>
    %339 = math.tanh %338 : vector<1x32xf32>
    %340 = vector.extract_strided_slice %325 {offsets = [0, 96], sizes = [1, 32], strides = [1, 1]} : vector<1x128xf32> to vector<1x32xf32>
    %341 = arith.negf %340 : vector<1x32xf32>
    %342 = math.exp %341 : vector<1x32xf32>
    %cst_88 = arith.constant 1.000000e+00 : f32
    %343 = vector.broadcast %cst_88 : f32 to vector<1x32xf32>
    %344 = arith.addf %343, %342 : vector<1x32xf32>
    %345 = arith.divf %343, %344 : vector<1x32xf32>
    %346 = arith.mulf %337, %319 : vector<1x32xf32>
    %347 = arith.mulf %331, %339 : vector<1x32xf32>
    %348 = arith.addf %346, %347 : vector<1x32xf32>
    %349 = math.tanh %348 : vector<1x32xf32>
    %350 = arith.mulf %345, %349 : vector<1x32xf32>
    %351 = vector.extract_strided_slice %86 {offsets = [9, 0], sizes = [1, 128], strides = [1, 1]} : vector<28x128xf32> to vector<1x128xf32>
    %352 = arith.truncf %350 : vector<1x32xf32> to vector<1x32xbf16>
    %cst_89 = arith.constant dense<0.000000e+00> : vector<1x128xf32>
    %353 = tpu.matmul %352, %87, %cst_89 {dimension_numbers = #tpu.dot_dimension_numbers<[1], [0], [0], [1], [0, 0, 1, 1], [], []>} : vector<1x32xbf16>, vector<32x128xbf16>, vector<1x128xf32> -> vector<1x128xf32>
    %354 = arith.addf %351, %353 : vector<1x128xf32>
    %355 = vector.extract_strided_slice %354 {offsets = [0, 0], sizes = [1, 32], strides = [1, 1]} : vector<1x128xf32> to vector<1x32xf32>
    %356 = arith.negf %355 : vector<1x32xf32>
    %357 = math.exp %356 : vector<1x32xf32>
    %cst_90 = arith.constant 1.000000e+00 : f32
    %358 = vector.broadcast %cst_90 : f32 to vector<1x32xf32>
    %359 = arith.addf %358, %357 : vector<1x32xf32>
    %360 = arith.divf %358, %359 : vector<1x32xf32>
    %361 = vector.extract_strided_slice %354 {offsets = [0, 32], sizes = [1, 32], strides = [1, 1]} : vector<1x128xf32> to vector<1x32xf32>
    %362 = arith.negf %361 : vector<1x32xf32>
    %363 = math.exp %362 : vector<1x32xf32>
    %cst_91 = arith.constant 1.000000e+00 : f32
    %364 = vector.broadcast %cst_91 : f32 to vector<1x32xf32>
    %365 = arith.addf %364, %363 : vector<1x32xf32>
    %366 = arith.divf %364, %365 : vector<1x32xf32>
    %367 = vector.extract_strided_slice %354 {offsets = [0, 64], sizes = [1, 32], strides = [1, 1]} : vector<1x128xf32> to vector<1x32xf32>
    %368 = math.tanh %367 : vector<1x32xf32>
    %369 = vector.extract_strided_slice %354 {offsets = [0, 96], sizes = [1, 32], strides = [1, 1]} : vector<1x128xf32> to vector<1x32xf32>
    %370 = arith.negf %369 : vector<1x32xf32>
    %371 = math.exp %370 : vector<1x32xf32>
    %cst_92 = arith.constant 1.000000e+00 : f32
    %372 = vector.broadcast %cst_92 : f32 to vector<1x32xf32>
    %373 = arith.addf %372, %371 : vector<1x32xf32>
    %374 = arith.divf %372, %373 : vector<1x32xf32>
    %375 = arith.mulf %366, %348 : vector<1x32xf32>
    %376 = arith.mulf %360, %368 : vector<1x32xf32>
    %377 = arith.addf %375, %376 : vector<1x32xf32>
    %378 = math.tanh %377 : vector<1x32xf32>
    %379 = arith.mulf %374, %378 : vector<1x32xf32>
    %380 = vector.extract_strided_slice %86 {offsets = [10, 0], sizes = [1, 128], strides = [1, 1]} : vector<28x128xf32> to vector<1x128xf32>
    %381 = arith.truncf %379 : vector<1x32xf32> to vector<1x32xbf16>
    %cst_93 = arith.constant dense<0.000000e+00> : vector<1x128xf32>
    %382 = tpu.matmul %381, %87, %cst_93 {dimension_numbers = #tpu.dot_dimension_numbers<[1], [0], [0], [1], [0, 0, 1, 1], [], []>} : vector<1x32xbf16>, vector<32x128xbf16>, vector<1x128xf32> -> vector<1x128xf32>
    %383 = arith.addf %380, %382 : vector<1x128xf32>
    %384 = vector.extract_strided_slice %383 {offsets = [0, 0], sizes = [1, 32], strides = [1, 1]} : vector<1x128xf32> to vector<1x32xf32>
    %385 = arith.negf %384 : vector<1x32xf32>
    %386 = math.exp %385 : vector<1x32xf32>
    %cst_94 = arith.constant 1.000000e+00 : f32
    %387 = vector.broadcast %cst_94 : f32 to vector<1x32xf32>
    %388 = arith.addf %387, %386 : vector<1x32xf32>
    %389 = arith.divf %387, %388 : vector<1x32xf32>
    %390 = vector.extract_strided_slice %383 {offsets = [0, 32], sizes = [1, 32], strides = [1, 1]} : vector<1x128xf32> to vector<1x32xf32>
    %391 = arith.negf %390 : vector<1x32xf32>
    %392 = math.exp %391 : vector<1x32xf32>
    %cst_95 = arith.constant 1.000000e+00 : f32
    %393 = vector.broadcast %cst_95 : f32 to vector<1x32xf32>
    %394 = arith.addf %393, %392 : vector<1x32xf32>
    %395 = arith.divf %393, %394 : vector<1x32xf32>
    %396 = vector.extract_strided_slice %383 {offsets = [0, 64], sizes = [1, 32], strides = [1, 1]} : vector<1x128xf32> to vector<1x32xf32>
    %397 = math.tanh %396 : vector<1x32xf32>
    %398 = vector.extract_strided_slice %383 {offsets = [0, 96], sizes = [1, 32], strides = [1, 1]} : vector<1x128xf32> to vector<1x32xf32>
    %399 = arith.negf %398 : vector<1x32xf32>
    %400 = math.exp %399 : vector<1x32xf32>
    %cst_96 = arith.constant 1.000000e+00 : f32
    %401 = vector.broadcast %cst_96 : f32 to vector<1x32xf32>
    %402 = arith.addf %401, %400 : vector<1x32xf32>
    %403 = arith.divf %401, %402 : vector<1x32xf32>
    %404 = arith.mulf %395, %377 : vector<1x32xf32>
    %405 = arith.mulf %389, %397 : vector<1x32xf32>
    %406 = arith.addf %404, %405 : vector<1x32xf32>
    %407 = math.tanh %406 : vector<1x32xf32>
    %408 = arith.mulf %403, %407 : vector<1x32xf32>
    %409 = vector.extract_strided_slice %86 {offsets = [11, 0], sizes = [1, 128], strides = [1, 1]} : vector<28x128xf32> to vector<1x128xf32>
    %410 = arith.truncf %408 : vector<1x32xf32> to vector<1x32xbf16>
    %cst_97 = arith.constant dense<0.000000e+00> : vector<1x128xf32>
    %411 = tpu.matmul %410, %87, %cst_97 {dimension_numbers = #tpu.dot_dimension_numbers<[1], [0], [0], [1], [0, 0, 1, 1], [], []>} : vector<1x32xbf16>, vector<32x128xbf16>, vector<1x128xf32> -> vector<1x128xf32>
    %412 = arith.addf %409, %411 : vector<1x128xf32>
    %413 = vector.extract_strided_slice %412 {offsets = [0, 0], sizes = [1, 32], strides = [1, 1]} : vector<1x128xf32> to vector<1x32xf32>
    %414 = arith.negf %413 : vector<1x32xf32>
    %415 = math.exp %414 : vector<1x32xf32>
    %cst_98 = arith.constant 1.000000e+00 : f32
    %416 = vector.broadcast %cst_98 : f32 to vector<1x32xf32>
    %417 = arith.addf %416, %415 : vector<1x32xf32>
    %418 = arith.divf %416, %417 : vector<1x32xf32>
    %419 = vector.extract_strided_slice %412 {offsets = [0, 32], sizes = [1, 32], strides = [1, 1]} : vector<1x128xf32> to vector<1x32xf32>
    %420 = arith.negf %419 : vector<1x32xf32>
    %421 = math.exp %420 : vector<1x32xf32>
    %cst_99 = arith.constant 1.000000e+00 : f32
    %422 = vector.broadcast %cst_99 : f32 to vector<1x32xf32>
    %423 = arith.addf %422, %421 : vector<1x32xf32>
    %424 = arith.divf %422, %423 : vector<1x32xf32>
    %425 = vector.extract_strided_slice %412 {offsets = [0, 64], sizes = [1, 32], strides = [1, 1]} : vector<1x128xf32> to vector<1x32xf32>
    %426 = math.tanh %425 : vector<1x32xf32>
    %427 = vector.extract_strided_slice %412 {offsets = [0, 96], sizes = [1, 32], strides = [1, 1]} : vector<1x128xf32> to vector<1x32xf32>
    %428 = arith.negf %427 : vector<1x32xf32>
    %429 = math.exp %428 : vector<1x32xf32>
    %cst_100 = arith.constant 1.000000e+00 : f32
    %430 = vector.broadcast %cst_100 : f32 to vector<1x32xf32>
    %431 = arith.addf %430, %429 : vector<1x32xf32>
    %432 = arith.divf %430, %431 : vector<1x32xf32>
    %433 = arith.mulf %424, %406 : vector<1x32xf32>
    %434 = arith.mulf %418, %426 : vector<1x32xf32>
    %435 = arith.addf %433, %434 : vector<1x32xf32>
    %436 = math.tanh %435 : vector<1x32xf32>
    %437 = arith.mulf %432, %436 : vector<1x32xf32>
    %438 = vector.extract_strided_slice %86 {offsets = [12, 0], sizes = [1, 128], strides = [1, 1]} : vector<28x128xf32> to vector<1x128xf32>
    %439 = arith.truncf %437 : vector<1x32xf32> to vector<1x32xbf16>
    %cst_101 = arith.constant dense<0.000000e+00> : vector<1x128xf32>
    %440 = tpu.matmul %439, %87, %cst_101 {dimension_numbers = #tpu.dot_dimension_numbers<[1], [0], [0], [1], [0, 0, 1, 1], [], []>} : vector<1x32xbf16>, vector<32x128xbf16>, vector<1x128xf32> -> vector<1x128xf32>
    %441 = arith.addf %438, %440 : vector<1x128xf32>
    %442 = vector.extract_strided_slice %441 {offsets = [0, 0], sizes = [1, 32], strides = [1, 1]} : vector<1x128xf32> to vector<1x32xf32>
    %443 = arith.negf %442 : vector<1x32xf32>
    %444 = math.exp %443 : vector<1x32xf32>
    %cst_102 = arith.constant 1.000000e+00 : f32
    %445 = vector.broadcast %cst_102 : f32 to vector<1x32xf32>
    %446 = arith.addf %445, %444 : vector<1x32xf32>
    %447 = arith.divf %445, %446 : vector<1x32xf32>
    %448 = vector.extract_strided_slice %441 {offsets = [0, 32], sizes = [1, 32], strides = [1, 1]} : vector<1x128xf32> to vector<1x32xf32>
    %449 = arith.negf %448 : vector<1x32xf32>
    %450 = math.exp %449 : vector<1x32xf32>
    %cst_103 = arith.constant 1.000000e+00 : f32
    %451 = vector.broadcast %cst_103 : f32 to vector<1x32xf32>
    %452 = arith.addf %451, %450 : vector<1x32xf32>
    %453 = arith.divf %451, %452 : vector<1x32xf32>
    %454 = vector.extract_strided_slice %441 {offsets = [0, 64], sizes = [1, 32], strides = [1, 1]} : vector<1x128xf32> to vector<1x32xf32>
    %455 = math.tanh %454 : vector<1x32xf32>
    %456 = vector.extract_strided_slice %441 {offsets = [0, 96], sizes = [1, 32], strides = [1, 1]} : vector<1x128xf32> to vector<1x32xf32>
    %457 = arith.negf %456 : vector<1x32xf32>
    %458 = math.exp %457 : vector<1x32xf32>
    %cst_104 = arith.constant 1.000000e+00 : f32
    %459 = vector.broadcast %cst_104 : f32 to vector<1x32xf32>
    %460 = arith.addf %459, %458 : vector<1x32xf32>
    %461 = arith.divf %459, %460 : vector<1x32xf32>
    %462 = arith.mulf %453, %435 : vector<1x32xf32>
    %463 = arith.mulf %447, %455 : vector<1x32xf32>
    %464 = arith.addf %462, %463 : vector<1x32xf32>
    %465 = math.tanh %464 : vector<1x32xf32>
    %466 = arith.mulf %461, %465 : vector<1x32xf32>
    %467 = vector.extract_strided_slice %86 {offsets = [13, 0], sizes = [1, 128], strides = [1, 1]} : vector<28x128xf32> to vector<1x128xf32>
    %468 = arith.truncf %466 : vector<1x32xf32> to vector<1x32xbf16>
    %cst_105 = arith.constant dense<0.000000e+00> : vector<1x128xf32>
    %469 = tpu.matmul %468, %87, %cst_105 {dimension_numbers = #tpu.dot_dimension_numbers<[1], [0], [0], [1], [0, 0, 1, 1], [], []>} : vector<1x32xbf16>, vector<32x128xbf16>, vector<1x128xf32> -> vector<1x128xf32>
    %470 = arith.addf %467, %469 : vector<1x128xf32>
    %471 = vector.extract_strided_slice %470 {offsets = [0, 0], sizes = [1, 32], strides = [1, 1]} : vector<1x128xf32> to vector<1x32xf32>
    %472 = arith.negf %471 : vector<1x32xf32>
    %473 = math.exp %472 : vector<1x32xf32>
    %cst_106 = arith.constant 1.000000e+00 : f32
    %474 = vector.broadcast %cst_106 : f32 to vector<1x32xf32>
    %475 = arith.addf %474, %473 : vector<1x32xf32>
    %476 = arith.divf %474, %475 : vector<1x32xf32>
    %477 = vector.extract_strided_slice %470 {offsets = [0, 32], sizes = [1, 32], strides = [1, 1]} : vector<1x128xf32> to vector<1x32xf32>
    %478 = arith.negf %477 : vector<1x32xf32>
    %479 = math.exp %478 : vector<1x32xf32>
    %cst_107 = arith.constant 1.000000e+00 : f32
    %480 = vector.broadcast %cst_107 : f32 to vector<1x32xf32>
    %481 = arith.addf %480, %479 : vector<1x32xf32>
    %482 = arith.divf %480, %481 : vector<1x32xf32>
    %483 = vector.extract_strided_slice %470 {offsets = [0, 64], sizes = [1, 32], strides = [1, 1]} : vector<1x128xf32> to vector<1x32xf32>
    %484 = math.tanh %483 : vector<1x32xf32>
    %485 = vector.extract_strided_slice %470 {offsets = [0, 96], sizes = [1, 32], strides = [1, 1]} : vector<1x128xf32> to vector<1x32xf32>
    %486 = arith.negf %485 : vector<1x32xf32>
    %487 = math.exp %486 : vector<1x32xf32>
    %cst_108 = arith.constant 1.000000e+00 : f32
    %488 = vector.broadcast %cst_108 : f32 to vector<1x32xf32>
    %489 = arith.addf %488, %487 : vector<1x32xf32>
    %490 = arith.divf %488, %489 : vector<1x32xf32>
    %491 = arith.mulf %482, %464 : vector<1x32xf32>
    %492 = arith.mulf %476, %484 : vector<1x32xf32>
    %493 = arith.addf %491, %492 : vector<1x32xf32>
    %494 = math.tanh %493 : vector<1x32xf32>
    %495 = arith.mulf %490, %494 : vector<1x32xf32>
    %496 = vector.extract_strided_slice %86 {offsets = [14, 0], sizes = [1, 128], strides = [1, 1]} : vector<28x128xf32> to vector<1x128xf32>
    %497 = arith.truncf %495 : vector<1x32xf32> to vector<1x32xbf16>
    %cst_109 = arith.constant dense<0.000000e+00> : vector<1x128xf32>
    %498 = tpu.matmul %497, %87, %cst_109 {dimension_numbers = #tpu.dot_dimension_numbers<[1], [0], [0], [1], [0, 0, 1, 1], [], []>} : vector<1x32xbf16>, vector<32x128xbf16>, vector<1x128xf32> -> vector<1x128xf32>
    %499 = arith.addf %496, %498 : vector<1x128xf32>
    %500 = vector.extract_strided_slice %499 {offsets = [0, 0], sizes = [1, 32], strides = [1, 1]} : vector<1x128xf32> to vector<1x32xf32>
    %501 = arith.negf %500 : vector<1x32xf32>
    %502 = math.exp %501 : vector<1x32xf32>
    %cst_110 = arith.constant 1.000000e+00 : f32
    %503 = vector.broadcast %cst_110 : f32 to vector<1x32xf32>
    %504 = arith.addf %503, %502 : vector<1x32xf32>
    %505 = arith.divf %503, %504 : vector<1x32xf32>
    %506 = vector.extract_strided_slice %499 {offsets = [0, 32], sizes = [1, 32], strides = [1, 1]} : vector<1x128xf32> to vector<1x32xf32>
    %507 = arith.negf %506 : vector<1x32xf32>
    %508 = math.exp %507 : vector<1x32xf32>
    %cst_111 = arith.constant 1.000000e+00 : f32
    %509 = vector.broadcast %cst_111 : f32 to vector<1x32xf32>
    %510 = arith.addf %509, %508 : vector<1x32xf32>
    %511 = arith.divf %509, %510 : vector<1x32xf32>
    %512 = vector.extract_strided_slice %499 {offsets = [0, 64], sizes = [1, 32], strides = [1, 1]} : vector<1x128xf32> to vector<1x32xf32>
    %513 = math.tanh %512 : vector<1x32xf32>
    %514 = vector.extract_strided_slice %499 {offsets = [0, 96], sizes = [1, 32], strides = [1, 1]} : vector<1x128xf32> to vector<1x32xf32>
    %515 = arith.negf %514 : vector<1x32xf32>
    %516 = math.exp %515 : vector<1x32xf32>
    %cst_112 = arith.constant 1.000000e+00 : f32
    %517 = vector.broadcast %cst_112 : f32 to vector<1x32xf32>
    %518 = arith.addf %517, %516 : vector<1x32xf32>
    %519 = arith.divf %517, %518 : vector<1x32xf32>
    %520 = arith.mulf %511, %493 : vector<1x32xf32>
    %521 = arith.mulf %505, %513 : vector<1x32xf32>
    %522 = arith.addf %520, %521 : vector<1x32xf32>
    %523 = math.tanh %522 : vector<1x32xf32>
    %524 = arith.mulf %519, %523 : vector<1x32xf32>
    %525 = vector.extract_strided_slice %86 {offsets = [15, 0], sizes = [1, 128], strides = [1, 1]} : vector<28x128xf32> to vector<1x128xf32>
    %526 = arith.truncf %524 : vector<1x32xf32> to vector<1x32xbf16>
    %cst_113 = arith.constant dense<0.000000e+00> : vector<1x128xf32>
    %527 = tpu.matmul %526, %87, %cst_113 {dimension_numbers = #tpu.dot_dimension_numbers<[1], [0], [0], [1], [0, 0, 1, 1], [], []>} : vector<1x32xbf16>, vector<32x128xbf16>, vector<1x128xf32> -> vector<1x128xf32>
    %528 = arith.addf %525, %527 : vector<1x128xf32>
    %529 = vector.extract_strided_slice %528 {offsets = [0, 0], sizes = [1, 32], strides = [1, 1]} : vector<1x128xf32> to vector<1x32xf32>
    %530 = arith.negf %529 : vector<1x32xf32>
    %531 = math.exp %530 : vector<1x32xf32>
    %cst_114 = arith.constant 1.000000e+00 : f32
    %532 = vector.broadcast %cst_114 : f32 to vector<1x32xf32>
    %533 = arith.addf %532, %531 : vector<1x32xf32>
    %534 = arith.divf %532, %533 : vector<1x32xf32>
    %535 = vector.extract_strided_slice %528 {offsets = [0, 32], sizes = [1, 32], strides = [1, 1]} : vector<1x128xf32> to vector<1x32xf32>
    %536 = arith.negf %535 : vector<1x32xf32>
    %537 = math.exp %536 : vector<1x32xf32>
    %cst_115 = arith.constant 1.000000e+00 : f32
    %538 = vector.broadcast %cst_115 : f32 to vector<1x32xf32>
    %539 = arith.addf %538, %537 : vector<1x32xf32>
    %540 = arith.divf %538, %539 : vector<1x32xf32>
    %541 = vector.extract_strided_slice %528 {offsets = [0, 64], sizes = [1, 32], strides = [1, 1]} : vector<1x128xf32> to vector<1x32xf32>
    %542 = math.tanh %541 : vector<1x32xf32>
    %543 = vector.extract_strided_slice %528 {offsets = [0, 96], sizes = [1, 32], strides = [1, 1]} : vector<1x128xf32> to vector<1x32xf32>
    %544 = arith.negf %543 : vector<1x32xf32>
    %545 = math.exp %544 : vector<1x32xf32>
    %cst_116 = arith.constant 1.000000e+00 : f32
    %546 = vector.broadcast %cst_116 : f32 to vector<1x32xf32>
    %547 = arith.addf %546, %545 : vector<1x32xf32>
    %548 = arith.divf %546, %547 : vector<1x32xf32>
    %549 = arith.mulf %540, %522 : vector<1x32xf32>
    %550 = arith.mulf %534, %542 : vector<1x32xf32>
    %551 = arith.addf %549, %550 : vector<1x32xf32>
    %552 = math.tanh %551 : vector<1x32xf32>
    %553 = arith.mulf %548, %552 : vector<1x32xf32>
    %554 = vector.extract_strided_slice %86 {offsets = [16, 0], sizes = [1, 128], strides = [1, 1]} : vector<28x128xf32> to vector<1x128xf32>
    %555 = arith.truncf %553 : vector<1x32xf32> to vector<1x32xbf16>
    %cst_117 = arith.constant dense<0.000000e+00> : vector<1x128xf32>
    %556 = tpu.matmul %555, %87, %cst_117 {dimension_numbers = #tpu.dot_dimension_numbers<[1], [0], [0], [1], [0, 0, 1, 1], [], []>} : vector<1x32xbf16>, vector<32x128xbf16>, vector<1x128xf32> -> vector<1x128xf32>
    %557 = arith.addf %554, %556 : vector<1x128xf32>
    %558 = vector.extract_strided_slice %557 {offsets = [0, 0], sizes = [1, 32], strides = [1, 1]} : vector<1x128xf32> to vector<1x32xf32>
    %559 = arith.negf %558 : vector<1x32xf32>
    %560 = math.exp %559 : vector<1x32xf32>
    %cst_118 = arith.constant 1.000000e+00 : f32
    %561 = vector.broadcast %cst_118 : f32 to vector<1x32xf32>
    %562 = arith.addf %561, %560 : vector<1x32xf32>
    %563 = arith.divf %561, %562 : vector<1x32xf32>
    %564 = vector.extract_strided_slice %557 {offsets = [0, 32], sizes = [1, 32], strides = [1, 1]} : vector<1x128xf32> to vector<1x32xf32>
    %565 = arith.negf %564 : vector<1x32xf32>
    %566 = math.exp %565 : vector<1x32xf32>
    %cst_119 = arith.constant 1.000000e+00 : f32
    %567 = vector.broadcast %cst_119 : f32 to vector<1x32xf32>
    %568 = arith.addf %567, %566 : vector<1x32xf32>
    %569 = arith.divf %567, %568 : vector<1x32xf32>
    %570 = vector.extract_strided_slice %557 {offsets = [0, 64], sizes = [1, 32], strides = [1, 1]} : vector<1x128xf32> to vector<1x32xf32>
    %571 = math.tanh %570 : vector<1x32xf32>
    %572 = vector.extract_strided_slice %557 {offsets = [0, 96], sizes = [1, 32], strides = [1, 1]} : vector<1x128xf32> to vector<1x32xf32>
    %573 = arith.negf %572 : vector<1x32xf32>
    %574 = math.exp %573 : vector<1x32xf32>
    %cst_120 = arith.constant 1.000000e+00 : f32
    %575 = vector.broadcast %cst_120 : f32 to vector<1x32xf32>
    %576 = arith.addf %575, %574 : vector<1x32xf32>
    %577 = arith.divf %575, %576 : vector<1x32xf32>
    %578 = arith.mulf %569, %551 : vector<1x32xf32>
    %579 = arith.mulf %563, %571 : vector<1x32xf32>
    %580 = arith.addf %578, %579 : vector<1x32xf32>
    %581 = math.tanh %580 : vector<1x32xf32>
    %582 = arith.mulf %577, %581 : vector<1x32xf32>
    %583 = vector.extract_strided_slice %86 {offsets = [17, 0], sizes = [1, 128], strides = [1, 1]} : vector<28x128xf32> to vector<1x128xf32>
    %584 = arith.truncf %582 : vector<1x32xf32> to vector<1x32xbf16>
    %cst_121 = arith.constant dense<0.000000e+00> : vector<1x128xf32>
    %585 = tpu.matmul %584, %87, %cst_121 {dimension_numbers = #tpu.dot_dimension_numbers<[1], [0], [0], [1], [0, 0, 1, 1], [], []>} : vector<1x32xbf16>, vector<32x128xbf16>, vector<1x128xf32> -> vector<1x128xf32>
    %586 = arith.addf %583, %585 : vector<1x128xf32>
    %587 = vector.extract_strided_slice %586 {offsets = [0, 0], sizes = [1, 32], strides = [1, 1]} : vector<1x128xf32> to vector<1x32xf32>
    %588 = arith.negf %587 : vector<1x32xf32>
    %589 = math.exp %588 : vector<1x32xf32>
    %cst_122 = arith.constant 1.000000e+00 : f32
    %590 = vector.broadcast %cst_122 : f32 to vector<1x32xf32>
    %591 = arith.addf %590, %589 : vector<1x32xf32>
    %592 = arith.divf %590, %591 : vector<1x32xf32>
    %593 = vector.extract_strided_slice %586 {offsets = [0, 32], sizes = [1, 32], strides = [1, 1]} : vector<1x128xf32> to vector<1x32xf32>
    %594 = arith.negf %593 : vector<1x32xf32>
    %595 = math.exp %594 : vector<1x32xf32>
    %cst_123 = arith.constant 1.000000e+00 : f32
    %596 = vector.broadcast %cst_123 : f32 to vector<1x32xf32>
    %597 = arith.addf %596, %595 : vector<1x32xf32>
    %598 = arith.divf %596, %597 : vector<1x32xf32>
    %599 = vector.extract_strided_slice %586 {offsets = [0, 64], sizes = [1, 32], strides = [1, 1]} : vector<1x128xf32> to vector<1x32xf32>
    %600 = math.tanh %599 : vector<1x32xf32>
    %601 = vector.extract_strided_slice %586 {offsets = [0, 96], sizes = [1, 32], strides = [1, 1]} : vector<1x128xf32> to vector<1x32xf32>
    %602 = arith.negf %601 : vector<1x32xf32>
    %603 = math.exp %602 : vector<1x32xf32>
    %cst_124 = arith.constant 1.000000e+00 : f32
    %604 = vector.broadcast %cst_124 : f32 to vector<1x32xf32>
    %605 = arith.addf %604, %603 : vector<1x32xf32>
    %606 = arith.divf %604, %605 : vector<1x32xf32>
    %607 = arith.mulf %598, %580 : vector<1x32xf32>
    %608 = arith.mulf %592, %600 : vector<1x32xf32>
    %609 = arith.addf %607, %608 : vector<1x32xf32>
    %610 = math.tanh %609 : vector<1x32xf32>
    %611 = arith.mulf %606, %610 : vector<1x32xf32>
    %612 = vector.extract_strided_slice %86 {offsets = [18, 0], sizes = [1, 128], strides = [1, 1]} : vector<28x128xf32> to vector<1x128xf32>
    %613 = arith.truncf %611 : vector<1x32xf32> to vector<1x32xbf16>
    %cst_125 = arith.constant dense<0.000000e+00> : vector<1x128xf32>
    %614 = tpu.matmul %613, %87, %cst_125 {dimension_numbers = #tpu.dot_dimension_numbers<[1], [0], [0], [1], [0, 0, 1, 1], [], []>} : vector<1x32xbf16>, vector<32x128xbf16>, vector<1x128xf32> -> vector<1x128xf32>
    %615 = arith.addf %612, %614 : vector<1x128xf32>
    %616 = vector.extract_strided_slice %615 {offsets = [0, 0], sizes = [1, 32], strides = [1, 1]} : vector<1x128xf32> to vector<1x32xf32>
    %617 = arith.negf %616 : vector<1x32xf32>
    %618 = math.exp %617 : vector<1x32xf32>
    %cst_126 = arith.constant 1.000000e+00 : f32
    %619 = vector.broadcast %cst_126 : f32 to vector<1x32xf32>
    %620 = arith.addf %619, %618 : vector<1x32xf32>
    %621 = arith.divf %619, %620 : vector<1x32xf32>
    %622 = vector.extract_strided_slice %615 {offsets = [0, 32], sizes = [1, 32], strides = [1, 1]} : vector<1x128xf32> to vector<1x32xf32>
    %623 = arith.negf %622 : vector<1x32xf32>
    %624 = math.exp %623 : vector<1x32xf32>
    %cst_127 = arith.constant 1.000000e+00 : f32
    %625 = vector.broadcast %cst_127 : f32 to vector<1x32xf32>
    %626 = arith.addf %625, %624 : vector<1x32xf32>
    %627 = arith.divf %625, %626 : vector<1x32xf32>
    %628 = vector.extract_strided_slice %615 {offsets = [0, 64], sizes = [1, 32], strides = [1, 1]} : vector<1x128xf32> to vector<1x32xf32>
    %629 = math.tanh %628 : vector<1x32xf32>
    %630 = vector.extract_strided_slice %615 {offsets = [0, 96], sizes = [1, 32], strides = [1, 1]} : vector<1x128xf32> to vector<1x32xf32>
    %631 = arith.negf %630 : vector<1x32xf32>
    %632 = math.exp %631 : vector<1x32xf32>
    %cst_128 = arith.constant 1.000000e+00 : f32
    %633 = vector.broadcast %cst_128 : f32 to vector<1x32xf32>
    %634 = arith.addf %633, %632 : vector<1x32xf32>
    %635 = arith.divf %633, %634 : vector<1x32xf32>
    %636 = arith.mulf %627, %609 : vector<1x32xf32>
    %637 = arith.mulf %621, %629 : vector<1x32xf32>
    %638 = arith.addf %636, %637 : vector<1x32xf32>
    %639 = math.tanh %638 : vector<1x32xf32>
    %640 = arith.mulf %635, %639 : vector<1x32xf32>
    %641 = vector.extract_strided_slice %86 {offsets = [19, 0], sizes = [1, 128], strides = [1, 1]} : vector<28x128xf32> to vector<1x128xf32>
    %642 = arith.truncf %640 : vector<1x32xf32> to vector<1x32xbf16>
    %cst_129 = arith.constant dense<0.000000e+00> : vector<1x128xf32>
    %643 = tpu.matmul %642, %87, %cst_129 {dimension_numbers = #tpu.dot_dimension_numbers<[1], [0], [0], [1], [0, 0, 1, 1], [], []>} : vector<1x32xbf16>, vector<32x128xbf16>, vector<1x128xf32> -> vector<1x128xf32>
    %644 = arith.addf %641, %643 : vector<1x128xf32>
    %645 = vector.extract_strided_slice %644 {offsets = [0, 0], sizes = [1, 32], strides = [1, 1]} : vector<1x128xf32> to vector<1x32xf32>
    %646 = arith.negf %645 : vector<1x32xf32>
    %647 = math.exp %646 : vector<1x32xf32>
    %cst_130 = arith.constant 1.000000e+00 : f32
    %648 = vector.broadcast %cst_130 : f32 to vector<1x32xf32>
    %649 = arith.addf %648, %647 : vector<1x32xf32>
    %650 = arith.divf %648, %649 : vector<1x32xf32>
    %651 = vector.extract_strided_slice %644 {offsets = [0, 32], sizes = [1, 32], strides = [1, 1]} : vector<1x128xf32> to vector<1x32xf32>
    %652 = arith.negf %651 : vector<1x32xf32>
    %653 = math.exp %652 : vector<1x32xf32>
    %cst_131 = arith.constant 1.000000e+00 : f32
    %654 = vector.broadcast %cst_131 : f32 to vector<1x32xf32>
    %655 = arith.addf %654, %653 : vector<1x32xf32>
    %656 = arith.divf %654, %655 : vector<1x32xf32>
    %657 = vector.extract_strided_slice %644 {offsets = [0, 64], sizes = [1, 32], strides = [1, 1]} : vector<1x128xf32> to vector<1x32xf32>
    %658 = math.tanh %657 : vector<1x32xf32>
    %659 = vector.extract_strided_slice %644 {offsets = [0, 96], sizes = [1, 32], strides = [1, 1]} : vector<1x128xf32> to vector<1x32xf32>
    %660 = arith.negf %659 : vector<1x32xf32>
    %661 = math.exp %660 : vector<1x32xf32>
    %cst_132 = arith.constant 1.000000e+00 : f32
    %662 = vector.broadcast %cst_132 : f32 to vector<1x32xf32>
    %663 = arith.addf %662, %661 : vector<1x32xf32>
    %664 = arith.divf %662, %663 : vector<1x32xf32>
    %665 = arith.mulf %656, %638 : vector<1x32xf32>
    %666 = arith.mulf %650, %658 : vector<1x32xf32>
    %667 = arith.addf %665, %666 : vector<1x32xf32>
    %668 = math.tanh %667 : vector<1x32xf32>
    %669 = arith.mulf %664, %668 : vector<1x32xf32>
    %670 = vector.extract_strided_slice %86 {offsets = [20, 0], sizes = [1, 128], strides = [1, 1]} : vector<28x128xf32> to vector<1x128xf32>
    %671 = arith.truncf %669 : vector<1x32xf32> to vector<1x32xbf16>
    %cst_133 = arith.constant dense<0.000000e+00> : vector<1x128xf32>
    %672 = tpu.matmul %671, %87, %cst_133 {dimension_numbers = #tpu.dot_dimension_numbers<[1], [0], [0], [1], [0, 0, 1, 1], [], []>} : vector<1x32xbf16>, vector<32x128xbf16>, vector<1x128xf32> -> vector<1x128xf32>
    %673 = arith.addf %670, %672 : vector<1x128xf32>
    %674 = vector.extract_strided_slice %673 {offsets = [0, 0], sizes = [1, 32], strides = [1, 1]} : vector<1x128xf32> to vector<1x32xf32>
    %675 = arith.negf %674 : vector<1x32xf32>
    %676 = math.exp %675 : vector<1x32xf32>
    %cst_134 = arith.constant 1.000000e+00 : f32
    %677 = vector.broadcast %cst_134 : f32 to vector<1x32xf32>
    %678 = arith.addf %677, %676 : vector<1x32xf32>
    %679 = arith.divf %677, %678 : vector<1x32xf32>
    %680 = vector.extract_strided_slice %673 {offsets = [0, 32], sizes = [1, 32], strides = [1, 1]} : vector<1x128xf32> to vector<1x32xf32>
    %681 = arith.negf %680 : vector<1x32xf32>
    %682 = math.exp %681 : vector<1x32xf32>
    %cst_135 = arith.constant 1.000000e+00 : f32
    %683 = vector.broadcast %cst_135 : f32 to vector<1x32xf32>
    %684 = arith.addf %683, %682 : vector<1x32xf32>
    %685 = arith.divf %683, %684 : vector<1x32xf32>
    %686 = vector.extract_strided_slice %673 {offsets = [0, 64], sizes = [1, 32], strides = [1, 1]} : vector<1x128xf32> to vector<1x32xf32>
    %687 = math.tanh %686 : vector<1x32xf32>
    %688 = vector.extract_strided_slice %673 {offsets = [0, 96], sizes = [1, 32], strides = [1, 1]} : vector<1x128xf32> to vector<1x32xf32>
    %689 = arith.negf %688 : vector<1x32xf32>
    %690 = math.exp %689 : vector<1x32xf32>
    %cst_136 = arith.constant 1.000000e+00 : f32
    %691 = vector.broadcast %cst_136 : f32 to vector<1x32xf32>
    %692 = arith.addf %691, %690 : vector<1x32xf32>
    %693 = arith.divf %691, %692 : vector<1x32xf32>
    %694 = arith.mulf %685, %667 : vector<1x32xf32>
    %695 = arith.mulf %679, %687 : vector<1x32xf32>
    %696 = arith.addf %694, %695 : vector<1x32xf32>
    %697 = math.tanh %696 : vector<1x32xf32>
    %698 = arith.mulf %693, %697 : vector<1x32xf32>
    %699 = vector.extract_strided_slice %86 {offsets = [21, 0], sizes = [1, 128], strides = [1, 1]} : vector<28x128xf32> to vector<1x128xf32>
    %700 = arith.truncf %698 : vector<1x32xf32> to vector<1x32xbf16>
    %cst_137 = arith.constant dense<0.000000e+00> : vector<1x128xf32>
    %701 = tpu.matmul %700, %87, %cst_137 {dimension_numbers = #tpu.dot_dimension_numbers<[1], [0], [0], [1], [0, 0, 1, 1], [], []>} : vector<1x32xbf16>, vector<32x128xbf16>, vector<1x128xf32> -> vector<1x128xf32>
    %702 = arith.addf %699, %701 : vector<1x128xf32>
    %703 = vector.extract_strided_slice %702 {offsets = [0, 0], sizes = [1, 32], strides = [1, 1]} : vector<1x128xf32> to vector<1x32xf32>
    %704 = arith.negf %703 : vector<1x32xf32>
    %705 = math.exp %704 : vector<1x32xf32>
    %cst_138 = arith.constant 1.000000e+00 : f32
    %706 = vector.broadcast %cst_138 : f32 to vector<1x32xf32>
    %707 = arith.addf %706, %705 : vector<1x32xf32>
    %708 = arith.divf %706, %707 : vector<1x32xf32>
    %709 = vector.extract_strided_slice %702 {offsets = [0, 32], sizes = [1, 32], strides = [1, 1]} : vector<1x128xf32> to vector<1x32xf32>
    %710 = arith.negf %709 : vector<1x32xf32>
    %711 = math.exp %710 : vector<1x32xf32>
    %cst_139 = arith.constant 1.000000e+00 : f32
    %712 = vector.broadcast %cst_139 : f32 to vector<1x32xf32>
    %713 = arith.addf %712, %711 : vector<1x32xf32>
    %714 = arith.divf %712, %713 : vector<1x32xf32>
    %715 = vector.extract_strided_slice %702 {offsets = [0, 64], sizes = [1, 32], strides = [1, 1]} : vector<1x128xf32> to vector<1x32xf32>
    %716 = math.tanh %715 : vector<1x32xf32>
    %717 = vector.extract_strided_slice %702 {offsets = [0, 96], sizes = [1, 32], strides = [1, 1]} : vector<1x128xf32> to vector<1x32xf32>
    %718 = arith.negf %717 : vector<1x32xf32>
    %719 = math.exp %718 : vector<1x32xf32>
    %cst_140 = arith.constant 1.000000e+00 : f32
    %720 = vector.broadcast %cst_140 : f32 to vector<1x32xf32>
    %721 = arith.addf %720, %719 : vector<1x32xf32>
    %722 = arith.divf %720, %721 : vector<1x32xf32>
    %723 = arith.mulf %714, %696 : vector<1x32xf32>
    %724 = arith.mulf %708, %716 : vector<1x32xf32>
    %725 = arith.addf %723, %724 : vector<1x32xf32>
    %726 = math.tanh %725 : vector<1x32xf32>
    %727 = arith.mulf %722, %726 : vector<1x32xf32>
    %728 = vector.extract_strided_slice %86 {offsets = [22, 0], sizes = [1, 128], strides = [1, 1]} : vector<28x128xf32> to vector<1x128xf32>
    %729 = arith.truncf %727 : vector<1x32xf32> to vector<1x32xbf16>
    %cst_141 = arith.constant dense<0.000000e+00> : vector<1x128xf32>
    %730 = tpu.matmul %729, %87, %cst_141 {dimension_numbers = #tpu.dot_dimension_numbers<[1], [0], [0], [1], [0, 0, 1, 1], [], []>} : vector<1x32xbf16>, vector<32x128xbf16>, vector<1x128xf32> -> vector<1x128xf32>
    %731 = arith.addf %728, %730 : vector<1x128xf32>
    %732 = vector.extract_strided_slice %731 {offsets = [0, 0], sizes = [1, 32], strides = [1, 1]} : vector<1x128xf32> to vector<1x32xf32>
    %733 = arith.negf %732 : vector<1x32xf32>
    %734 = math.exp %733 : vector<1x32xf32>
    %cst_142 = arith.constant 1.000000e+00 : f32
    %735 = vector.broadcast %cst_142 : f32 to vector<1x32xf32>
    %736 = arith.addf %735, %734 : vector<1x32xf32>
    %737 = arith.divf %735, %736 : vector<1x32xf32>
    %738 = vector.extract_strided_slice %731 {offsets = [0, 32], sizes = [1, 32], strides = [1, 1]} : vector<1x128xf32> to vector<1x32xf32>
    %739 = arith.negf %738 : vector<1x32xf32>
    %740 = math.exp %739 : vector<1x32xf32>
    %cst_143 = arith.constant 1.000000e+00 : f32
    %741 = vector.broadcast %cst_143 : f32 to vector<1x32xf32>
    %742 = arith.addf %741, %740 : vector<1x32xf32>
    %743 = arith.divf %741, %742 : vector<1x32xf32>
    %744 = vector.extract_strided_slice %731 {offsets = [0, 64], sizes = [1, 32], strides = [1, 1]} : vector<1x128xf32> to vector<1x32xf32>
    %745 = math.tanh %744 : vector<1x32xf32>
    %746 = vector.extract_strided_slice %731 {offsets = [0, 96], sizes = [1, 32], strides = [1, 1]} : vector<1x128xf32> to vector<1x32xf32>
    %747 = arith.negf %746 : vector<1x32xf32>
    %748 = math.exp %747 : vector<1x32xf32>
    %cst_144 = arith.constant 1.000000e+00 : f32
    %749 = vector.broadcast %cst_144 : f32 to vector<1x32xf32>
    %750 = arith.addf %749, %748 : vector<1x32xf32>
    %751 = arith.divf %749, %750 : vector<1x32xf32>
    %752 = arith.mulf %743, %725 : vector<1x32xf32>
    %753 = arith.mulf %737, %745 : vector<1x32xf32>
    %754 = arith.addf %752, %753 : vector<1x32xf32>
    %755 = math.tanh %754 : vector<1x32xf32>
    %756 = arith.mulf %751, %755 : vector<1x32xf32>
    %757 = vector.extract_strided_slice %86 {offsets = [23, 0], sizes = [1, 128], strides = [1, 1]} : vector<28x128xf32> to vector<1x128xf32>
    %758 = arith.truncf %756 : vector<1x32xf32> to vector<1x32xbf16>
    %cst_145 = arith.constant dense<0.000000e+00> : vector<1x128xf32>
    %759 = tpu.matmul %758, %87, %cst_145 {dimension_numbers = #tpu.dot_dimension_numbers<[1], [0], [0], [1], [0, 0, 1, 1], [], []>} : vector<1x32xbf16>, vector<32x128xbf16>, vector<1x128xf32> -> vector<1x128xf32>
    %760 = arith.addf %757, %759 : vector<1x128xf32>
    %761 = vector.extract_strided_slice %760 {offsets = [0, 0], sizes = [1, 32], strides = [1, 1]} : vector<1x128xf32> to vector<1x32xf32>
    %762 = arith.negf %761 : vector<1x32xf32>
    %763 = math.exp %762 : vector<1x32xf32>
    %cst_146 = arith.constant 1.000000e+00 : f32
    %764 = vector.broadcast %cst_146 : f32 to vector<1x32xf32>
    %765 = arith.addf %764, %763 : vector<1x32xf32>
    %766 = arith.divf %764, %765 : vector<1x32xf32>
    %767 = vector.extract_strided_slice %760 {offsets = [0, 32], sizes = [1, 32], strides = [1, 1]} : vector<1x128xf32> to vector<1x32xf32>
    %768 = arith.negf %767 : vector<1x32xf32>
    %769 = math.exp %768 : vector<1x32xf32>
    %cst_147 = arith.constant 1.000000e+00 : f32
    %770 = vector.broadcast %cst_147 : f32 to vector<1x32xf32>
    %771 = arith.addf %770, %769 : vector<1x32xf32>
    %772 = arith.divf %770, %771 : vector<1x32xf32>
    %773 = vector.extract_strided_slice %760 {offsets = [0, 64], sizes = [1, 32], strides = [1, 1]} : vector<1x128xf32> to vector<1x32xf32>
    %774 = math.tanh %773 : vector<1x32xf32>
    %775 = vector.extract_strided_slice %760 {offsets = [0, 96], sizes = [1, 32], strides = [1, 1]} : vector<1x128xf32> to vector<1x32xf32>
    %776 = arith.negf %775 : vector<1x32xf32>
    %777 = math.exp %776 : vector<1x32xf32>
    %cst_148 = arith.constant 1.000000e+00 : f32
    %778 = vector.broadcast %cst_148 : f32 to vector<1x32xf32>
    %779 = arith.addf %778, %777 : vector<1x32xf32>
    %780 = arith.divf %778, %779 : vector<1x32xf32>
    %781 = arith.mulf %772, %754 : vector<1x32xf32>
    %782 = arith.mulf %766, %774 : vector<1x32xf32>
    %783 = arith.addf %781, %782 : vector<1x32xf32>
    %784 = math.tanh %783 : vector<1x32xf32>
    %785 = arith.mulf %780, %784 : vector<1x32xf32>
    %786 = vector.extract_strided_slice %86 {offsets = [24, 0], sizes = [1, 128], strides = [1, 1]} : vector<28x128xf32> to vector<1x128xf32>
    %787 = arith.truncf %785 : vector<1x32xf32> to vector<1x32xbf16>
    %cst_149 = arith.constant dense<0.000000e+00> : vector<1x128xf32>
    %788 = tpu.matmul %787, %87, %cst_149 {dimension_numbers = #tpu.dot_dimension_numbers<[1], [0], [0], [1], [0, 0, 1, 1], [], []>} : vector<1x32xbf16>, vector<32x128xbf16>, vector<1x128xf32> -> vector<1x128xf32>
    %789 = arith.addf %786, %788 : vector<1x128xf32>
    %790 = vector.extract_strided_slice %789 {offsets = [0, 0], sizes = [1, 32], strides = [1, 1]} : vector<1x128xf32> to vector<1x32xf32>
    %791 = arith.negf %790 : vector<1x32xf32>
    %792 = math.exp %791 : vector<1x32xf32>
    %cst_150 = arith.constant 1.000000e+00 : f32
    %793 = vector.broadcast %cst_150 : f32 to vector<1x32xf32>
    %794 = arith.addf %793, %792 : vector<1x32xf32>
    %795 = arith.divf %793, %794 : vector<1x32xf32>
    %796 = vector.extract_strided_slice %789 {offsets = [0, 32], sizes = [1, 32], strides = [1, 1]} : vector<1x128xf32> to vector<1x32xf32>
    %797 = arith.negf %796 : vector<1x32xf32>
    %798 = math.exp %797 : vector<1x32xf32>
    %cst_151 = arith.constant 1.000000e+00 : f32
    %799 = vector.broadcast %cst_151 : f32 to vector<1x32xf32>
    %800 = arith.addf %799, %798 : vector<1x32xf32>
    %801 = arith.divf %799, %800 : vector<1x32xf32>
    %802 = vector.extract_strided_slice %789 {offsets = [0, 64], sizes = [1, 32], strides = [1, 1]} : vector<1x128xf32> to vector<1x32xf32>
    %803 = math.tanh %802 : vector<1x32xf32>
    %804 = vector.extract_strided_slice %789 {offsets = [0, 96], sizes = [1, 32], strides = [1, 1]} : vector<1x128xf32> to vector<1x32xf32>
    %805 = arith.negf %804 : vector<1x32xf32>
    %806 = math.exp %805 : vector<1x32xf32>
    %cst_152 = arith.constant 1.000000e+00 : f32
    %807 = vector.broadcast %cst_152 : f32 to vector<1x32xf32>
    %808 = arith.addf %807, %806 : vector<1x32xf32>
    %809 = arith.divf %807, %808 : vector<1x32xf32>
    %810 = arith.mulf %801, %783 : vector<1x32xf32>
    %811 = arith.mulf %795, %803 : vector<1x32xf32>
    %812 = arith.addf %810, %811 : vector<1x32xf32>
    %813 = math.tanh %812 : vector<1x32xf32>
    %814 = arith.mulf %809, %813 : vector<1x32xf32>
    %815 = vector.extract_strided_slice %86 {offsets = [25, 0], sizes = [1, 128], strides = [1, 1]} : vector<28x128xf32> to vector<1x128xf32>
    %816 = arith.truncf %814 : vector<1x32xf32> to vector<1x32xbf16>
    %cst_153 = arith.constant dense<0.000000e+00> : vector<1x128xf32>
    %817 = tpu.matmul %816, %87, %cst_153 {dimension_numbers = #tpu.dot_dimension_numbers<[1], [0], [0], [1], [0, 0, 1, 1], [], []>} : vector<1x32xbf16>, vector<32x128xbf16>, vector<1x128xf32> -> vector<1x128xf32>
    %818 = arith.addf %815, %817 : vector<1x128xf32>
    %819 = vector.extract_strided_slice %818 {offsets = [0, 0], sizes = [1, 32], strides = [1, 1]} : vector<1x128xf32> to vector<1x32xf32>
    %820 = arith.negf %819 : vector<1x32xf32>
    %821 = math.exp %820 : vector<1x32xf32>
    %cst_154 = arith.constant 1.000000e+00 : f32
    %822 = vector.broadcast %cst_154 : f32 to vector<1x32xf32>
    %823 = arith.addf %822, %821 : vector<1x32xf32>
    %824 = arith.divf %822, %823 : vector<1x32xf32>
    %825 = vector.extract_strided_slice %818 {offsets = [0, 32], sizes = [1, 32], strides = [1, 1]} : vector<1x128xf32> to vector<1x32xf32>
    %826 = arith.negf %825 : vector<1x32xf32>
    %827 = math.exp %826 : vector<1x32xf32>
    %cst_155 = arith.constant 1.000000e+00 : f32
    %828 = vector.broadcast %cst_155 : f32 to vector<1x32xf32>
    %829 = arith.addf %828, %827 : vector<1x32xf32>
    %830 = arith.divf %828, %829 : vector<1x32xf32>
    %831 = vector.extract_strided_slice %818 {offsets = [0, 64], sizes = [1, 32], strides = [1, 1]} : vector<1x128xf32> to vector<1x32xf32>
    %832 = math.tanh %831 : vector<1x32xf32>
    %833 = vector.extract_strided_slice %818 {offsets = [0, 96], sizes = [1, 32], strides = [1, 1]} : vector<1x128xf32> to vector<1x32xf32>
    %834 = arith.negf %833 : vector<1x32xf32>
    %835 = math.exp %834 : vector<1x32xf32>
    %cst_156 = arith.constant 1.000000e+00 : f32
    %836 = vector.broadcast %cst_156 : f32 to vector<1x32xf32>
    %837 = arith.addf %836, %835 : vector<1x32xf32>
    %838 = arith.divf %836, %837 : vector<1x32xf32>
    %839 = arith.mulf %830, %812 : vector<1x32xf32>
    %840 = arith.mulf %824, %832 : vector<1x32xf32>
    %841 = arith.addf %839, %840 : vector<1x32xf32>
    %842 = math.tanh %841 : vector<1x32xf32>
    %843 = arith.mulf %838, %842 : vector<1x32xf32>
    %844 = vector.extract_strided_slice %86 {offsets = [26, 0], sizes = [1, 128], strides = [1, 1]} : vector<28x128xf32> to vector<1x128xf32>
    %845 = arith.truncf %843 : vector<1x32xf32> to vector<1x32xbf16>
    %cst_157 = arith.constant dense<0.000000e+00> : vector<1x128xf32>
    %846 = tpu.matmul %845, %87, %cst_157 {dimension_numbers = #tpu.dot_dimension_numbers<[1], [0], [0], [1], [0, 0, 1, 1], [], []>} : vector<1x32xbf16>, vector<32x128xbf16>, vector<1x128xf32> -> vector<1x128xf32>
    %847 = arith.addf %844, %846 : vector<1x128xf32>
    %848 = vector.extract_strided_slice %847 {offsets = [0, 0], sizes = [1, 32], strides = [1, 1]} : vector<1x128xf32> to vector<1x32xf32>
    %849 = arith.negf %848 : vector<1x32xf32>
    %850 = math.exp %849 : vector<1x32xf32>
    %cst_158 = arith.constant 1.000000e+00 : f32
    %851 = vector.broadcast %cst_158 : f32 to vector<1x32xf32>
    %852 = arith.addf %851, %850 : vector<1x32xf32>
    %853 = arith.divf %851, %852 : vector<1x32xf32>
    %854 = vector.extract_strided_slice %847 {offsets = [0, 32], sizes = [1, 32], strides = [1, 1]} : vector<1x128xf32> to vector<1x32xf32>
    %855 = arith.negf %854 : vector<1x32xf32>
    %856 = math.exp %855 : vector<1x32xf32>
    %cst_159 = arith.constant 1.000000e+00 : f32
    %857 = vector.broadcast %cst_159 : f32 to vector<1x32xf32>
    %858 = arith.addf %857, %856 : vector<1x32xf32>
    %859 = arith.divf %857, %858 : vector<1x32xf32>
    %860 = vector.extract_strided_slice %847 {offsets = [0, 64], sizes = [1, 32], strides = [1, 1]} : vector<1x128xf32> to vector<1x32xf32>
    %861 = math.tanh %860 : vector<1x32xf32>
    %862 = vector.extract_strided_slice %847 {offsets = [0, 96], sizes = [1, 32], strides = [1, 1]} : vector<1x128xf32> to vector<1x32xf32>
    %863 = arith.negf %862 : vector<1x32xf32>
    %864 = math.exp %863 : vector<1x32xf32>
    %cst_160 = arith.constant 1.000000e+00 : f32
    %865 = vector.broadcast %cst_160 : f32 to vector<1x32xf32>
    %866 = arith.addf %865, %864 : vector<1x32xf32>
    %867 = arith.divf %865, %866 : vector<1x32xf32>
    %868 = arith.mulf %859, %841 : vector<1x32xf32>
    %869 = arith.mulf %853, %861 : vector<1x32xf32>
    %870 = arith.addf %868, %869 : vector<1x32xf32>
    %871 = math.tanh %870 : vector<1x32xf32>
    %872 = arith.mulf %867, %871 : vector<1x32xf32>
    %873 = vector.extract_strided_slice %86 {offsets = [27, 0], sizes = [1, 128], strides = [1, 1]} : vector<28x128xf32> to vector<1x128xf32>
    %874 = arith.truncf %872 : vector<1x32xf32> to vector<1x32xbf16>
    %cst_161 = arith.constant dense<0.000000e+00> : vector<1x128xf32>
    %875 = tpu.matmul %874, %87, %cst_161 {dimension_numbers = #tpu.dot_dimension_numbers<[1], [0], [0], [1], [0, 0, 1, 1], [], []>} : vector<1x32xbf16>, vector<32x128xbf16>, vector<1x128xf32> -> vector<1x128xf32>
    %876 = arith.addf %873, %875 : vector<1x128xf32>
    %877 = vector.extract_strided_slice %876 {offsets = [0, 0], sizes = [1, 32], strides = [1, 1]} : vector<1x128xf32> to vector<1x32xf32>
    %878 = arith.negf %877 : vector<1x32xf32>
    %879 = math.exp %878 : vector<1x32xf32>
    %cst_162 = arith.constant 1.000000e+00 : f32
    %880 = vector.broadcast %cst_162 : f32 to vector<1x32xf32>
    %881 = arith.addf %880, %879 : vector<1x32xf32>
    %882 = arith.divf %880, %881 : vector<1x32xf32>
    %883 = vector.extract_strided_slice %876 {offsets = [0, 32], sizes = [1, 32], strides = [1, 1]} : vector<1x128xf32> to vector<1x32xf32>
    %884 = arith.negf %883 : vector<1x32xf32>
    %885 = math.exp %884 : vector<1x32xf32>
    %cst_163 = arith.constant 1.000000e+00 : f32
    %886 = vector.broadcast %cst_163 : f32 to vector<1x32xf32>
    %887 = arith.addf %886, %885 : vector<1x32xf32>
    %888 = arith.divf %886, %887 : vector<1x32xf32>
    %889 = vector.extract_strided_slice %876 {offsets = [0, 64], sizes = [1, 32], strides = [1, 1]} : vector<1x128xf32> to vector<1x32xf32>
    %890 = math.tanh %889 : vector<1x32xf32>
    %891 = vector.extract_strided_slice %876 {offsets = [0, 96], sizes = [1, 32], strides = [1, 1]} : vector<1x128xf32> to vector<1x32xf32>
    %892 = arith.negf %891 : vector<1x32xf32>
    %893 = math.exp %892 : vector<1x32xf32>
    %cst_164 = arith.constant 1.000000e+00 : f32
    %894 = vector.broadcast %cst_164 : f32 to vector<1x32xf32>
    %895 = arith.addf %894, %893 : vector<1x32xf32>
    %896 = arith.divf %894, %895 : vector<1x32xf32>
    %897 = arith.mulf %888, %870 : vector<1x32xf32>
    %898 = arith.mulf %882, %890 : vector<1x32xf32>
    %899 = arith.addf %897, %898 : vector<1x32xf32>
    %900 = math.tanh %899 : vector<1x32xf32>
    %901 = arith.mulf %896, %900 : vector<1x32xf32>
    %902 = tpu.concatenate %118, %147, %176, %205, %234, %263, %292, %321, %350, %379, %408, %437, %466, %495, %524, %553 in 0 : vector<1x32xf32>, vector<1x32xf32>, vector<1x32xf32>, vector<1x32xf32>, vector<1x32xf32>, vector<1x32xf32>, vector<1x32xf32>, vector<1x32xf32>, vector<1x32xf32>, vector<1x32xf32>, vector<1x32xf32>, vector<1x32xf32>, vector<1x32xf32>, vector<1x32xf32>, vector<1x32xf32>, vector<1x32xf32> -> vector<16x32xf32>
    %903 = tpu.concatenate %582, %611, %640, %669, %698, %727, %756, %785, %814, %843, %872, %901 in 0 : vector<1x32xf32>, vector<1x32xf32>, vector<1x32xf32>, vector<1x32xf32>, vector<1x32xf32>, vector<1x32xf32>, vector<1x32xf32>, vector<1x32xf32>, vector<1x32xf32>, vector<1x32xf32>, vector<1x32xf32>, vector<1x32xf32> -> vector<12x32xf32>
    %904 = tpu.concatenate %902, %903 in 0 : vector<16x32xf32>, vector<12x32xf32> -> vector<28x32xf32>
    %c0_165 = arith.constant 0 : index
    %c0_166 = arith.constant 0 : index
    %905 = vector.load %arg10[%c0_165, %c0_166] : memref<2x32xf32, #tpu.memory_space<vmem>>, vector<2x32xf32>
    %906 = arith.truncf %904 : vector<28x32xf32> to vector<28x32xbf16>
    %c0_167 = arith.constant 0 : index
    %c0_168 = arith.constant 0 : index
    %907 = vector.load %arg9[%c0_167, %c0_168] : memref<32x32xbf16, #tpu.memory_space<vmem>>, vector<32x32xbf16>
    %cst_169 = arith.constant dense<0.000000e+00> : vector<28x32xf32>
    %908 = tpu.matmul %906, %907, %cst_169 {dimension_numbers = #tpu.dot_dimension_numbers<[1], [0], [0], [1], [0, 0, 1, 1], [], []>} : vector<28x32xbf16>, vector<32x32xbf16>, vector<28x32xf32> -> vector<28x32xf32>
    %909 = vector.extract_strided_slice %905 {offsets = [0, 0], sizes = [1, 32], strides = [1, 1]} : vector<2x32xf32> to vector<1x32xf32>
    %910 = vector.broadcast %909 : vector<1x32xf32> to vector<28x32xf32>
    %911 = arith.addf %908, %910 : vector<28x32xf32>
    %912 = math.tanh %911 : vector<28x32xf32>
    %913 = vector.extract_strided_slice %905 {offsets = [1, 0], sizes = [1, 32], strides = [1, 1]} : vector<2x32xf32> to vector<1x32xf32>
    %914 = vector.broadcast %913 : vector<1x32xf32> to vector<28x32xf32>
    %915 = arith.mulf %912, %914 : vector<28x32xf32>
    %cst_170 = arith.constant dense<0.000000e+00> : vector<28xf32>
    %916 = vector.multi_reduction <add>, %915, %cst_170 [1] : vector<28x32xf32> to vector<28xf32>
    %917 = vector.shape_cast %916 : vector<28xf32> to vector<28x1xf32>
    %cst_171 = arith.constant dense<0xFF800000> : vector<1xf32>
    %918 = vector.multi_reduction <maximumf>, %917, %cst_171 [0] : vector<28x1xf32> to vector<1xf32>
    %919 = vector.shape_cast %918 : vector<1xf32> to vector<1x1xf32>
    %920 = vector.broadcast %919 : vector<1x1xf32> to vector<28x1xf32>
    %921 = arith.subf %917, %920 : vector<28x1xf32>
    %922 = math.exp %921 : vector<28x1xf32>
    %cst_172 = arith.constant dense<0.000000e+00> : vector<1xf32>
    %923 = vector.multi_reduction <add>, %922, %cst_172 [0] : vector<28x1xf32> to vector<1xf32>
    %924 = vector.shape_cast %923 : vector<1xf32> to vector<1x1xf32>
    %925 = vector.broadcast %924 : vector<1x1xf32> to vector<28x1xf32>
    %926 = arith.divf %922, %925 : vector<28x1xf32>
    %927 = vector.broadcast %926 : vector<28x1xf32> to vector<28x32xf32>
    %928 = arith.mulf %927, %904 : vector<28x32xf32>
    %cst_173 = arith.constant dense<0.000000e+00> : vector<32xf32>
    %929 = vector.multi_reduction <add>, %928, %cst_173 [0] : vector<28x32xf32> to vector<32xf32>
    %930 = vector.shape_cast %929 : vector<32xf32> to vector<1x32xf32>
    %c0_174 = arith.constant 0 : index
    %c0_175 = arith.constant 0 : index
    %931 = vector.load %arg14[%c0_174, %c0_175] : memref<3x16xf32, #tpu.memory_space<vmem>>, vector<3x16xf32>
    %932 = arith.truncf %930 : vector<1x32xf32> to vector<1x32xbf16>
    %c0_176 = arith.constant 0 : index
    %c0_177 = arith.constant 0 : index
    %933 = vector.load %arg11[%c0_176, %c0_177] : memref<32x16xbf16, #tpu.memory_space<vmem>>, vector<32x16xbf16>
    %cst_178 = arith.constant dense<0.000000e+00> : vector<1x16xf32>
    %934 = tpu.matmul %932, %933, %cst_178 {dimension_numbers = #tpu.dot_dimension_numbers<[1], [0], [0], [1], [0, 0, 1, 1], [], []>} : vector<1x32xbf16>, vector<32x16xbf16>, vector<1x16xf32> -> vector<1x16xf32>
    %935 = vector.extract_strided_slice %931 {offsets = [0, 0], sizes = [1, 16], strides = [1, 1]} : vector<3x16xf32> to vector<1x16xf32>
    %936 = arith.addf %934, %935 : vector<1x16xf32>
    %cst_179 = arith.constant 0.000000e+00 : f32
    %937 = vector.broadcast %cst_179 : f32 to vector<1x16xf32>
    %938 = arith.maximumf %936, %937 : vector<1x16xf32>
    %939 = arith.truncf %938 : vector<1x16xf32> to vector<1x16xbf16>
    %c0_180 = arith.constant 0 : index
    %c0_181 = arith.constant 0 : index
    %940 = vector.load %arg12[%c0_180, %c0_181] : memref<16x16xbf16, #tpu.memory_space<vmem>>, vector<16x16xbf16>
    %cst_182 = arith.constant dense<0.000000e+00> : vector<1x16xf32>
    %941 = tpu.matmul %939, %940, %cst_182 {dimension_numbers = #tpu.dot_dimension_numbers<[1], [0], [0], [1], [0, 0, 1, 1], [], []>} : vector<1x16xbf16>, vector<16x16xbf16>, vector<1x16xf32> -> vector<1x16xf32>
    %942 = vector.extract_strided_slice %931 {offsets = [1, 0], sizes = [1, 16], strides = [1, 1]} : vector<3x16xf32> to vector<1x16xf32>
    %943 = arith.addf %941, %942 : vector<1x16xf32>
    %cst_183 = arith.constant 0.000000e+00 : f32
    %944 = vector.broadcast %cst_183 : f32 to vector<1x16xf32>
    %945 = arith.maximumf %943, %944 : vector<1x16xf32>
    %946 = arith.truncf %945 : vector<1x16xf32> to vector<1x16xbf16>
    %c0_184 = arith.constant 0 : index
    %c0_185 = arith.constant 0 : index
    %947 = vector.load %arg13[%c0_184, %c0_185] : memref<16x8xbf16, #tpu.memory_space<vmem>>, vector<16x8xbf16>
    %cst_186 = arith.constant dense<0.000000e+00> : vector<1x8xf32>
    %948 = tpu.matmul %946, %947, %cst_186 {dimension_numbers = #tpu.dot_dimension_numbers<[1], [0], [0], [1], [0, 0, 1, 1], [], []>} : vector<1x16xbf16>, vector<16x8xbf16>, vector<1x8xf32> -> vector<1x8xf32>
    %949 = vector.extract_strided_slice %931 {offsets = [2, 0], sizes = [1, 8], strides = [1, 1]} : vector<3x16xf32> to vector<1x8xf32>
    %950 = arith.addf %948, %949 : vector<1x8xf32>
    %cst_187 = arith.constant dense<0xFF800000> : vector<1xf32>
    %951 = vector.multi_reduction <maximumf>, %950, %cst_187 [1] : vector<1x8xf32> to vector<1xf32>
    %952 = vector.shape_cast %951 : vector<1xf32> to vector<1x1xf32>
    %953 = vector.broadcast %952 : vector<1x1xf32> to vector<1x8xf32>
    %954 = arith.subf %950, %953 : vector<1x8xf32>
    %955 = math.exp %954 : vector<1x8xf32>
    %cst_188 = arith.constant dense<0.000000e+00> : vector<1xf32>
    %956 = vector.multi_reduction <add>, %955, %cst_188 [1] : vector<1x8xf32> to vector<1xf32>
    %957 = vector.shape_cast %956 : vector<1xf32> to vector<1x1xf32>
    %958 = vector.broadcast %957 : vector<1x1xf32> to vector<1x8xf32>
    %959 = arith.divf %955, %958 : vector<1x8xf32>
    %c0_189 = arith.constant 0 : index
    %c0_190 = arith.constant 0 : index
    %c0_191 = arith.constant 0 : index
    %960 = vector.load %arg15[%c0_189, %c0_190, %c0_191] : memref<1x1x8xf32, #tpu.memory_space<vmem>>, vector<1x1x8xf32>
    %961 = vector.shape_cast %960 : vector<1x1x8xf32> to vector<1x8xf32>
    %962 = vector.shape_cast %959 : vector<1x8xf32> to vector<1x1x8xf32>
    tpu.vector_store %arg15[%c0_189, %c0_190, %c0_191], %962 {strides = array<i32>} : memref<1x1x8xf32, #tpu.memory_space<vmem>>, vector<1x1x8xf32>,
    return
  }
  func.func @transform_0(%arg0: i32) -> (i32, i32, i32) {
    %c0_i32 = arith.constant 0 : i32
    %c0_i32_0 = arith.constant 0 : i32
    %c0_i32_1 = arith.constant 0 : i32
    return %arg0, %c0_i32, %c0_i32_0 : i32, i32, i32
  }
  func.func @transform_1(%arg0: i32) -> (i32, i32) {
    %c0_i32 = arith.constant 0 : i32
    %c0_i32_0 = arith.constant 0 : i32
    %c0_i32_1 = arith.constant 0 : i32
    return %c0_i32, %c0_i32_0 : i32, i32
  }
  func.func @transform_2(%arg0: i32) -> (i32, i32) {
    %c0_i32 = arith.constant 0 : i32
    %c0_i32_0 = arith.constant 0 : i32
    %c0_i32_1 = arith.constant 0 : i32
    return %c0_i32, %c0_i32_0 : i32, i32
  }
  func.func @transform_3(%arg0: i32) -> (i32, i32) {
    %c0_i32 = arith.constant 0 : i32
    %c0_i32_0 = arith.constant 0 : i32
    %c0_i32_1 = arith.constant 0 : i32
    return %c0_i32, %c0_i32_0 : i32, i32
  }
  func.func @transform_4(%arg0: i32) -> (i32, i32) {
    %c0_i32 = arith.constant 0 : i32
    %c0_i32_0 = arith.constant 0 : i32
    %c0_i32_1 = arith.constant 0 : i32
    return %c0_i32, %c0_i32_0 : i32, i32
  }
  func.func @transform_5(%arg0: i32) -> (i32, i32) {
    %c0_i32 = arith.constant 0 : i32
    %c0_i32_0 = arith.constant 0 : i32
    %c0_i32_1 = arith.constant 0 : i32
    return %c0_i32, %c0_i32_0 : i32, i32
  }
  func.func @transform_6(%arg0: i32) -> (i32, i32) {
    %c0_i32 = arith.constant 0 : i32
    %c0_i32_0 = arith.constant 0 : i32
    %c0_i32_1 = arith.constant 0 : i32
    return %c0_i32, %c0_i32_0 : i32, i32
  }
  func.func @transform_7(%arg0: i32) -> (i32, i32) {
    %c0_i32 = arith.constant 0 : i32
    %c0_i32_0 = arith.constant 0 : i32
    %c0_i32_1 = arith.constant 0 : i32
    return %c0_i32, %c0_i32_0 : i32, i32
  }
  func.func @transform_8(%arg0: i32) -> (i32, i32) {
    %c0_i32 = arith.constant 0 : i32
    %c0_i32_0 = arith.constant 0 : i32
    %c0_i32_1 = arith.constant 0 : i32
    return %c0_i32, %c0_i32_0 : i32, i32
  }
  func.func @transform_9(%arg0: i32) -> (i32, i32) {
    %c0_i32 = arith.constant 0 : i32
    %c0_i32_0 = arith.constant 0 : i32
    %c0_i32_1 = arith.constant 0 : i32
    return %c0_i32, %c0_i32_0 : i32, i32
  }
  func.func @transform_10(%arg0: i32) -> (i32, i32) {
    %c0_i32 = arith.constant 0 : i32
    %c0_i32_0 = arith.constant 0 : i32
    %c0_i32_1 = arith.constant 0 : i32
    return %c0_i32, %c0_i32_0 : i32, i32
  }
  func.func @transform_11(%arg0: i32) -> (i32, i32) {
    %c0_i32 = arith.constant 0 : i32
    %c0_i32_0 = arith.constant 0 : i32
    %c0_i32_1 = arith.constant 0 : i32
    return %c0_i32, %c0_i32_0 : i32, i32
  }
  func.func @transform_12(%arg0: i32) -> (i32, i32) {
    %c0_i32 = arith.constant 0 : i32
    %c0_i32_0 = arith.constant 0 : i32
    %c0_i32_1 = arith.constant 0 : i32
    return %c0_i32, %c0_i32_0 : i32, i32
  }
  func.func @transform_13(%arg0: i32) -> (i32, i32) {
    %c0_i32 = arith.constant 0 : i32
    %c0_i32_0 = arith.constant 0 : i32
    %c0_i32_1 = arith.constant 0 : i32
    return %c0_i32, %c0_i32_0 : i32, i32
  }
  func.func @transform_14(%arg0: i32) -> (i32, i32, i32) {
    %c0_i32 = arith.constant 0 : i32
    %c0_i32_0 = arith.constant 0 : i32
    %c0_i32_1 = arith.constant 0 : i32
    return %arg0, %c0_i32, %c0_i32_0 : i32, i32, i32
  }
}

</mosaic_0001>

<bundles_post_ra>
// kernel: forward.1
= control target key start
LH: loop header
LB: loop body
LE: loop exit
PB: predicated region body
PF: predicated region fallthrough
CT: control target
= control target key end

     0   :  { %s5871_s0 = inlined_call_operand.vmem [shape: f32[2,40,16], index: 0, kind: input, shape index: {}]   ;;  %s5872_s1 = inlined_call_operand.vmem [shape: bf16[112,32], index: 1, kind: input, shape index: {}]   ;;  %s5873_s2 = inlined_call_operand.vmem [shape: bf16[160,32], index: 2, kind: input, shape index: {}]   ;;  %s5874_s3 = inlined_call_operand.vmem [shape: bf16[96,32], index: 3, kind: input, shape index: {}]   ;;  %s5875_s4 = inlined_call_operand.vmem [shape: f32[9,32], index: 4, kind: input, shape index: {}]   ;;  %s5876_s5 = inlined_call_operand.vmem [shape: bf16[32,128], index: 5, kind: input, shape index: {}]   ;;  %s5877_s6 = inlined_call_operand.vmem [shape: bf16[32,128], index: 6, kind: input, shape index: {}]   ;;  %s5878_s7 = inlined_call_operand.vmem [shape: f32[1,128], index: 7, kind: input, shape index: {}]   ;;  %s5879_s8 = inlined_call_operand.vmem [shape: bf16[32,32], index: 8, kind: input, shape index: {}]   ;;  %s5880_s9 = inlined_call_operand.vmem [shape: f32[2,32], index: 9, kind: input, shape index: {}]   ;;  %s5881_s10 = inlined_call_operand.vmem [shape: bf16[32,16], index: 10, kind: input, shape index: {}]   ;;  %s5882_s11 = inlined_call_operand.vmem [shape: bf16[16,16], index: 11, kind: input, shape index: {}]   ;;  %s5883_s12 = inlined_call_operand.vmem [shape: bf16[16,8], index: 12, kind: input, shape index: {}]   ;;  %s5884_s13 = inlined_call_operand.vmem [shape: f32[3,16], index: 13, kind: input, shape index: {}]   ;;  %s5885_s14 = inlined_call_operand.hbm [shape: f32[2,1,8], index: 14, kind: output, shape index: {}]  }
   0x1   :  { %5888 = sst [smem:[#allocation9_spill]] %s5871_s0 }
   0x2   :  { %5889 = sst [smem:[#allocation10_spill]] %s5872_s1 }
   0x3   :  { %5890 = sst [smem:[#allocation11_spill]] %s5873_s2 }
   0x4   :  { %19 = vsyncpa [#allocation6], 0 }
   0x5   :  { %21 = vsyncpa [#allocation6 + $0x1], 0  ;;  %s4999_s29 = smov 0   ;;  %s5001_s30 = smov 0  }
   0x6   :  { %s5003_s15 = smov 0   ;;  %s5005_s16 = smov 0  }
   0x7 LB: > { %s5020_s17 = sadd.s32 4294967295, %s4912_s16   ;;  %s3989_s18 = sadd.s32 4294967294, %s4912_s16   ;;  %s4912_s16 = sphi %s5005_s16, %s5902_s16   ;;  %s4908_s15 = sphi %s5003_s15, %s5901_s15   ;;  %s4904_s30 = sphi %s5001_s30, %s5900_s30   ;;  %s4900_s29 = sphi %s4999_s29, %s5899_s29  }
   0x8   : > { %s5024_s19 = sadd.s32 1, %s4912_s16   ;;  %s333_s20 = sadd.s32 1, %s4908_s15 }
   0x9   : > { %s330_s21 = ssub.s32 %s4912_s16, %s5024_s19  ;;  %p343_p0 = scmp.ne.s32.totalorder %s4908_s15, %s4904_s30 }
   0xa   : > { %p331_p1 = scmp.eq.s32.totalorder %s330_s21, 0  ;;  %p344_p2 = scmp.eq.s32.totalorder %s5020_s17, 1 }
   0xb   : > { %p349_p3 = scmp.ne.s32.totalorder %s4904_s30, %s4900_s29  ;;  %p350_p4 = scmp.eq.s32.totalorder %s3989_s18, 1 }
   0xc   : > { %s5035_s22 = scalar_select %p331_p1, %s4908_s15, %s333_s20  }
   0xd   : > { %p5037_p5 = por %p344_p2, %p343_p0  ;;  %p5041_p6 = por %p350_p4, %p349_p3 }
   0xe   : > { %5891 = sst [smem:[#allocation8_spill]] %s5035_s22  ;;  %p3992_p7 = scmp.ge.s32.totalorder %s4912_s16, 1 }
   0xf   : > { %p415_p8 = scmp.lt.s32.totalorder %s4912_s16, 3 }
  0x11   : > { %p416_p9 = pnand %p3992_p7, %p415_p8 }
  0x12   : > { %p460_p10 = scmp.lt.s32.totalorder (!%p416_p9), %s5020_s17, 1  ;;  %vm473_vm0 = vcmask (!%p416_p9), 130048   ;;  %s5894_s0 = sld [smem:[#allocation9_spill]] (!%p416_p9)  ;;  %v4915_v4 = vmov (!%p416_p9), 0.0   ;;  %vm478_vm1 = vcmask (!%p416_p9), 123904   ;;  %vm4921_vm2 = vmmov (!%p416_p9), 0  }
  0x13   : > { %419 = sbr.rel (%p416_p9) target bundleno = 22541 (0x580d), region = 76  ;;  %s4914_s20 = smov (!%p416_p9), 16   ;;  %4218 = vmatprep.subr.bf16.mxu0 (!%p416_p9), %v4915_v4  ;;  %4232 = vmatprep.mubr.msk.bf16.mxu0 (!%p416_p9), %vm4921_vm2, %v4915_v4  ;;  %vm502_vm3 = vcmask (!%p416_p9), 261248   ;;  %vm500_vm4 = vcmask (!%p416_p9), 261249   ;;  %vm523_vm5 = vcmask (!%p416_p9), 392450   ;;  %vm525_vm6 = vcmask (!%p416_p9), 392448  }
  0x14   : > { %s5895_s1 = sld [smem:[#allocation10_spill]] (!%p416_p9)  ;;  %s4916_s28 = smov (!%p416_p9), 32   ;;  %vm548_vm7 = vcmask (!%p416_p9), 523648   ;;  %vm546_vm8 = vcmask (!%p416_p9), 523651   ;;  %vm569_vm9 = vcmask (!%p416_p9), 654852   ;;  %vm571_vm10 = vcmask (!%p416_p9), 654848  }
  0x15   : > { %s4918_s27 = smov (!%p416_p9), 64   ;;  %s5896_s21 = smov (!%p416_p9), 48   ;;  %vm594_vm11 = vcmask (!%p416_p9), 786048   ;;  %vm592_vm12 = vcmask (!%p416_p9), 786053   ;;  %vm615_vm13 = vcmask (!%p416_p9), 917254   ;;  %vm617_vm14 = vcmask (!%p416_p9), 917248  }
  0x16   : > { %vm506_vm15 = vcmask (!%p416_p9), 256128   ;;  %v644_v51 = vlaneseq (!%p416_p9)  ;;  %v5159_v54 = vld [vmem:[%s5875_s4] sm:$0xff] (!%p416_p9)  ;;  %s5897_s2 = sld [smem:[#allocation11_spill]] (!%p416_p9) }
  0x18   : > { %v5153_v52 = vshrl.u32 (!%p416_p9), %v644_v51, 7 }
  0x1a   : > { %s461_s25 = scalar_select %p460_p10, %s5020_s17, 1  ;;  %v4569_v5 = vld [vmem:[%s5895_s1] sm:$0xff]   ;;  %v4570_v6 = vld [vmem:[%s5895_s1 + $0x8] sm:$0xff]   ;;  %v4571_v7 = vld [vmem:[%s5895_s1 + $0x10] sm:$0xff]   ;;  %v646_v53 = vsub.s32 0, %v5153_v52  ;;  %v763_v56 = vsub.s32 1, %v5153_v52 }
  0x1b   : > { %4219 = vmatpush3.bf16.msra.mxu0 %v4569_v5  ;;  %v4572_v8 = vld [vmem:[%s5895_s1 + $0x18] sm:$0xff]   ;;  %v4573_v9 = vld [vmem:[%s5895_s1 + $0x20] sm:$0xff]   ;;  %v4574_v11 = vld [vmem:[%s5895_s1 + $0x28] sm:$0xff]   ;;  %v772_v57 = vsub.s32 2, %v5153_v52 }
  0x1c   : > { %s4520_s26 = smul.u32 40, %s461_s25  ;;  %4220 = vmatprep.subr.bf16.mxu0 %v4915_v4  ;;  %v4575_v12 = vld [vmem:[%s5895_s1 + $0x30] sm:$0xff]   ;;  %v5164_v55 = vrot.slane %v5159_v54, %v646_v53  ;;  %v5172_v60 = vrot.slane %v5159_v54, %v763_v56  ;;  %v4576_v62 = vld [vmem:[%s5897_s2] sm:$0xff]  }
  0x1e   : > { %s5052_s18 = scalar_lea.vmem %s5894_s0, %s4520_s26  ;;  %s5886_s26 = smov 48  }
  0x1f   : > { %v468_v0 = vld [vmem:[%s5052_s18 + $0x10] sm:$0xff]  ;;  %v466_v1 = vld [vmem:[%s5052_s18] sm:$0xff]  ;;  %v467_v2 = vld [vmem:[%s5052_s18 + $0x8] sm:$0xff]  ;;  %4221 = vmatpush3.bf16.msra.mxu0 %v4570_v6 }
  0x20   : > { %489 = vrot.lane.b32.xlu1 %v468_v0, %s4914_s20  ;;  %485 = vrot.lane.b32.xlu0 %v466_v1, %s4914_s20  ;;  %v5060_v3 = vld [vmem:[%s5052_s18 + $0x18] sm:$0xff]  ;;  %475 = vst.msk [vmem:[#allocation2 + $0x8] sm:$0xff] %vm473_vm0, %v467_v2  ;;  %476 = vst.msk [vmem:[#allocation2 + $0x10] sm:$0xff] %vm473_vm0, %v468_v0  ;;  %v470_v10 = vld [vmem:[%s5052_s18 + $0x20] sm:$0xff]  ;;  %s4920_s18 = smov 96  }
  0x21   : > { %474 = vst.msk [vmem:[#allocation2] sm:$0xff] %vm473_vm0, %v466_v1  ;;  %477 = vst.msk [vmem:[#allocation2 + $0x18] sm:$0xff] %vm473_vm0, %v5060_v3  ;;  %4222 = vmatprep.subr.bf16.mxu0 %v4915_v4 }
  0x22   : > { %479 = vst.msk [vmem:[#allocation2 + $0x20] sm:$0x3] %vm478_vm1, %v470_v10  ;;  %vm529_vm1 = vcmask 388352  }
  0x23   : > { %4223 = vmatpush3.bf16.msra.mxu0 %v4571_v7 }
  0x24   : > { %508 = vrot.lane.b32.xlu1 %v466_v1, %s4916_s28  ;;  %487 = vrot.lane.b32.xlu0 %v467_v2, %s4914_s20 }
  0x25   : > { %4224 = vmatprep.subr.bf16.mxu0 %v4915_v4 }
  0x27   : > { %4225 = vmatpush3.bf16.msra.mxu0 %v4572_v8  ;;  %v4577_v8 = vld [vmem:[%s5897_s2 + $0x8] sm:$0xff]  }
  0x28   : > { %512 = vrot.lane.b32.xlu1 %v468_v0, %s4916_s28  ;;  %510 = vrot.lane.b32.xlu0 %v467_v2, %s4916_s28 }
  0x29   : > { %4226 = vmatprep.subr.bf16.mxu0 %v4915_v4 }
  0x2b   : > { %4227 = vmatpush3.bf16.msra.mxu0 %v4573_v9 }
  0x2c   : > { %533 = vrot.lane.b32.xlu1 %v467_v2, %s5886_s26  ;;  %531 = vrot.lane.b32.xlu0 %v466_v1, %s5886_s26 }
  0x2d   : > { %4228 = vmatprep.subr.bf16.mxu0 %v4915_v4 }
  0x2f   : > { %4229 = vmatpush3.bf16.msra.mxu0 %v4574_v11 }
  0x30   : > { %554 = vrot.lane.b32.xlu1 %v466_v1, %s4918_s27  ;;  %535 = vrot.lane.b32.xlu0 %v468_v0, %s5886_s26  ;;  %s4919_s26 = smov 80  }
  0x31   : > { %4230 = vmatprep.subr.bf16.mxu0 %v4915_v4 }
  0x33   : > { %4231 = vmatpush3.bf16.msra.mxu0 %v4575_v12  ;;  %v4578_v12 = vld [vmem:[%s5897_s2 + $0x10] sm:$0xff]  }
  0x34   : > { %558 = vrot.lane.b32.xlu1 %v468_v0, %s4918_s27  ;;  %556 = vrot.lane.b32.xlu0 %v467_v2, %s4918_s27 }
  0x38   : > { %579 = vrot.lane.b32.xlu1 %v467_v2, %s4919_s26  ;;  %577 = vrot.lane.b32.xlu0 %v466_v1, %s4919_s26 }
  0x3c   : > { %600 = vrot.lane.b32.xlu1 %v466_v1, %s4920_s18  ;;  %581 = vrot.lane.b32.xlu0 %v468_v0, %s4919_s26 }
  0x40   : > { %604 = vrot.lane.b32.xlu1 %v468_v0, %s4920_s18  ;;  %602 = vrot.lane.b32.xlu0 %v467_v2, %s4920_s18  ;;  %v4922_v0 = vmov 0   ;;  %v5179_v2 = vrot.slane %v5159_v54, %v772_v57 }
  0x41   : > { %990 = vmatprep.subr.bf16.mxu1 %v4922_v0 }
  0x42   : > { %991 = vmatpush1.bf16.msra.mxu1 %v4576_v62 }
  0x43   : > { %992 = vmatprep.subr.bf16.mxu1 %v4922_v0 }
  0x44   : > { %493 = vrot.lane.b32.xlu1 %v470_v10, %s4914_s20  ;;  %491 = vrot.lane.b32.xlu0 %v5060_v3, %s4914_s20 }
  0x46   : > { %993 = vmatpush1.bf16.msra.mxu1 %v4577_v8 }
  0x47   : > { %994 = vmatprep.subr.bf16.mxu1 %v4922_v0 }
  0x48   : > { %516 = vrot.lane.b32.xlu1 %v470_v10, %s4916_s28  ;;  %514 = vrot.lane.b32.xlu0 %v5060_v3, %s4916_s28 }
  0x4a   : > { %995 = vmatpush1.bf16.msra.mxu1 %v4578_v12 }
  0x4b   : > { %996 = vmatprep.subr.bf16.mxu1 %v4922_v0 }
  0x4c   : > { %539 = vrot.lane.b32.xlu1 %v470_v10, %s5896_s21  ;;  %537 = vrot.lane.b32.xlu0 %v5060_v3, %s5896_s21 }
  0x50   : > { %562 = vrot.lane.b32.xlu1 %v470_v10, %s4918_s27  ;;  %560 = vrot.lane.b32.xlu0 %v5060_v3, %s4918_s27 }
  0x54   : > { %585 = vrot.lane.b32.xlu1 %v470_v10, %s4919_s26  ;;  %583 = vrot.lane.b32.xlu0 %v5060_v3, %s4919_s26 }
  0x58   : > { %608 = vrot.lane.b32.xlu1 %v470_v10, %s4920_s18  ;;  %606 = vrot.lane.b32.xlu0 %v5060_v3, %s4920_s18 }
  0x92   : > { %v490_v13 = vpop.permute.xlu1 %489  ;;  %v486_v14 = vpop.permute.xlu0 %485 }
  0x93   : > { %504 = vst.msk [vmem:[#allocation2 + $0xf] sm:$0xff] %vm502_vm3, %v490_v13 }
  0x94   : > { %501 = vst.msk [vmem:[#allocation2 - $0x1] sm:$0xfe] %vm500_vm4, %v486_v14  ;;  %vm690_vm4 = vcmask 916480  }
  0x96   : > { %v509_v15 = vpop.permute.xlu1 %508  ;;  %v488_v16 = vpop.permute.xlu0 %487 }
  0x97   : > { %524 = vst.msk [vmem:[#allocation2 - $0x2] sm:$0xfc] %vm523_vm5, %v509_v15  ;;  %vm552_vm5 = vcmask 520576  }
  0x98   : > { %503 = vst.msk [vmem:[#allocation2 + $0x7] sm:$0xff] %vm502_vm3, %v488_v16 }
  0x9a   : > { %v513_v17 = vpop.permute.xlu1 %512  ;;  %v511_v18 = vpop.permute.xlu0 %510 }
  0x9b   : > { %527 = vst.msk [vmem:[#allocation2 + $0xe] sm:$0xff] %vm525_vm6, %v513_v17  ;;  %526 = vst.msk [vmem:[#allocation2 + $0x6] sm:$0xff] %vm525_vm6, %v511_v18 }
  0x9e   : > { %v534_v19 = vpop.permute.xlu1 %533  ;;  %v532_v20 = vpop.permute.xlu0 %531 }
  0x9f   : > { %549 = vst.msk [vmem:[#allocation2 + $0x5] sm:$0xff] %vm548_vm7, %v534_v19 }
  0xa0   : > { %547 = vst.msk [vmem:[#allocation2 - $0x3] sm:$0xf8] %vm546_vm8, %v532_v20  ;;  %vm598_vm8 = vcmask 785024  }
  0xa2   : > { %v555_v21 = vpop.permute.xlu1 %554  ;;  %v536_v22 = vpop.permute.xlu0 %535 }
  0xa3   : > { %570 = vst.msk [vmem:[#allocation2 - $0x4] sm:$0xf0] %vm569_vm9, %v555_v21  ;;  %vm789_vm9 = vcmask 1046528   ;;  %v4579_v21 = vld [vmem:[%s5897_s2 + $0x18] sm:$0xff]  }
  0xa4   : > { %550 = vst.msk [vmem:[#allocation2 + $0xd] sm:$0xff] %vm548_vm7, %v536_v22  ;;  %997 = vmatpush1.bf16.msra.mxu1 %v4579_v21 }
  0xa5   : > { %998 = vmatprep.subr.bf16.mxu1 %v4922_v0 }
  0xa6   : > { %v559_v23 = vpop.permute.xlu1 %558  ;;  %v557_v24 = vpop.permute.xlu0 %556 }
  0xa7   : > { %573 = vst.msk [vmem:[#allocation2 + $0xc] sm:$0xff] %vm571_vm10, %v559_v23  ;;  %572 = vst.msk [vmem:[#allocation2 + $0x4] sm:$0xff] %vm571_vm10, %v557_v24 }
  0xaa   : > { %v580_v25 = vpop.permute.xlu1 %579  ;;  %v578_v26 = vpop.permute.xlu0 %577 }
  0xab   : > { %595 = vst.msk [vmem:[#allocation2 + $0x3] sm:$0xff] %vm594_vm11, %v580_v25 }
  0xac   : > { %593 = vst.msk [vmem:[#allocation2 - $0x5] sm:$0xe0] %vm592_vm12, %v578_v26  ;;  %v4580_v26 = vld [vmem:[%s5897_s2 + $0x20] sm:$0xff]   ;;  %vm783_vm12 = vcmask 259072  }
  0xad   : > { %999 = vmatpush1.bf16.msra.mxu1 %v4580_v26 }
  0xae   : > { %v601_v27 = vpop.permute.xlu1 %600  ;;  %v582_v28 = vpop.permute.xlu0 %581  ;;  %1000 = vmatprep.subr.bf16.mxu1 %v4922_v0 }
  0xaf   : > { %616 = vst.msk [vmem:[#allocation2 - $0x6] sm:$0xc0] %vm615_vm13, %v601_v27  ;;  %v4581_v27 = vld [vmem:[%s5897_s2 + $0x28] sm:$0xff]   ;;  %vm809_vm13 = vcmask 523520  }
  0xb0   : > { %596 = vst.msk [vmem:[#allocation2 + $0xb] sm:$0xff] %vm594_vm11, %v582_v28 }
  0xb1   : > { %1001 = vmatpush1.bf16.msra.mxu1 %v4581_v27 }
  0xb2   : > { %v605_v29 = vpop.permute.xlu1 %604  ;;  %v603_v30 = vpop.permute.xlu0 %602  ;;  %1002 = vmatprep.subr.bf16.mxu1 %v4922_v0 }
  0xb3   : > { %619 = vst.msk [vmem:[#allocation2 + $0xa] sm:$0xff] %vm617_vm14, %v605_v29  ;;  %618 = vst.msk [vmem:[#allocation2 + $0x2] sm:$0xff] %vm617_vm14, %v603_v30 }
  0xb6   : > { %v494_v31 = vpop.permute.xlu1 %493  ;;  %v492_v32 = vpop.permute.xlu0 %491 }
  0xb7   : > { %507 = vst.msk [vmem:[#allocation2 + $0x1f] sm:$0x7] %vm506_vm15, %v494_v31  ;;  %v4582_v31 = vld [vmem:[%s5897_s2 + $0x30] sm:$0xff]   ;;  %vm864_vm15 = vcmask 1048320  }
  0xb8   : > { %505 = vst.msk [vmem:[#allocation2 + $0x17] sm:$0xff] %vm502_vm3, %v492_v32  ;;  %vm575_vm3 = vcmask 652800   ;;  %1003 = vmatpush1.bf16.msra.mxu1 %v4582_v31 }
  0xb9   : > { %1004 = vmatprep.subr.bf16.mxu1 %v4922_v0 }
  0xba   : > { %v517_v33 = vpop.permute.xlu1 %516  ;;  %v515_v34 = vpop.permute.xlu0 %514  ;;  %v622_v35 = vld [vmem:[#allocation2] sm:$0xff]  ;;  %v623_v36 = vld [vmem:[#allocation2 + $0x8] sm:$0xff] }
  0xbb   : > { %530 = vst.msk [vmem:[#allocation2 + $0x1e] sm:$0xf] %vm529_vm1, %v517_v33  ;;  %v627_v37 = vpack.c.bf16 %v623_v36, %v622_v35  ;;  %vm813_vm1 = vcmask 521472  }
  0xbc   : > { %528 = vst.msk [vmem:[#allocation2 + $0x16] sm:$0xff] %vm525_vm6, %v515_v34  ;;  %vm779_vm6 = vcmask 261120  }
  0xbd   : > { %4233 = vmatmul.mubr.msk.bf16.vlgmr.msra.gmra.mrb[0].mxu0 %vm690_vm4, %v627_v37 }
  0xbe   : > { %v540_v38 = vpop.permute.xlu1 %539  ;;  %v538_v39 = vpop.permute.xlu0 %537  ;;  %4236 = vmatprep.mubr.msk.bf16.mxu0 %vm4921_vm2, %v4915_v4 }
  0xbf   : > { %553 = vst.msk [vmem:[#allocation2 + $0x1d] sm:$0x1f] %vm552_vm5, %v540_v38  ;;  %v4583_v38 = vld [vmem:[%s5897_s2 + $0x38] sm:$0xff]   ;;  %vm868_vm5 = vcmask 1046272  }
  0xc0   : > { %551 = vst.msk [vmem:[#allocation2 + $0x15] sm:$0xff] %vm548_vm7, %v538_v39  ;;  %vm870_vm7 = vcmask 1043456   ;;  %1005 = vmatpush1.bf16.msra.mxu1 %v4583_v38  ;;  %v922_v38 = vsub.s32 3, %v5153_v52 }
  0xc1   : > { %1006 = vmatprep.subr.bf16.mxu1 %v4922_v0 }
  0xc2   : > { %v563_v40 = vpop.permute.xlu1 %562  ;;  %v561_v41 = vpop.permute.xlu0 %560 }
  0xc3   : > { %576 = vst.msk [vmem:[#allocation2 + $0x1c] sm:$0x3f] %vm575_vm3, %v563_v40  ;;  %vm1062_vm3 = vcmask 257024  }
  0xc4   : > { %574 = vst.msk [vmem:[#allocation2 + $0x14] sm:$0xff] %vm571_vm10, %v561_v41  ;;  %vm815_vm10 = vcmask 1045504  }
  0xc6   : > { %v586_v42 = vpop.permute.xlu1 %585  ;;  %v584_v43 = vpop.permute.xlu0 %583 }
  0xc7   : > { %599 = vst.msk [vmem:[#allocation2 + $0x1b] sm:$0x7f] %vm598_vm8, %v586_v42  ;;  %vm1080_vm8 = vcmask 523521  }
  0xc8   : > { %597 = vst.msk [vmem:[#allocation2 + $0x13] sm:$0xff] %vm594_vm11, %v584_v43  ;;  %vm842_vm11 = vcmask 1044480  }
  0xca   : > { %v609_v44 = vpop.permute.xlu1 %608  ;;  %v607_v45 = vpop.permute.xlu0 %606 }
  0xcb   : > { %621 = vst.msk [vmem:[#allocation2 + $0x1a] sm:$0xff] %vm617_vm14, %v609_v44  ;;  %620 = vst.msk [vmem:[#allocation2 + $0x12] sm:$0xff] %vm617_vm14, %v607_v45  ;;  %vm835_vm14 = vcmask 785920  }
  0xd2   : > { %v624_v46 = vld [vmem:[#allocation2 + $0x10] sm:$0xff]  ;;  %v625_v47 = vld [vmem:[#allocation2 + $0x18] sm:$0xff]  ;;  %v626_v49 = vld [vmem:[#allocation2 + $0x20] sm:$0x3] }
  0xd3   : > { %v628_v48 = vpack.c.bf16 %v625_v47, %v624_v46  ;;  %v629_v50 = vpack.c.bf16 %v626_v49, %v626_v49  ;;  %v4584_v47 = vld [vmem:[%s5897_s2 + $0x40] sm:$0xff]  }
  0xd4   : > { %1007 = vmatpush1.bf16.msra.mxu1 %v4584_v47 }
  0xd5   : > { %4237 = vmatmul.mubr.msk.bf16.gmra.mrb[4].mxu0 %vm690_vm4, %v628_v48  ;;  %1008 = vmatprep.subr.bf16.mxu1 %v4922_v0 }
  0xd6   : > { %4240 = vmatprep.mubr.msk.bf16.mxu0 %vm4921_vm2, %v4915_v4 }
  0xdd   : > { %4241 = vmatmul.mubr.msk.bf16.gmra.mrb[8].mxu0 %vm690_vm4, %v629_v50  ;;  %vm839_vm4 = vcmask 783872  }
 0x190   : > { %v734_v58 = vpop.f32.mrb[0].mxu0 }
 0x191   : > { %v735_v59 = vadd.f32 %v734_v58, %v5164_v55  ;;  %v4234_v61 = vpop.f32.mrb[1].mxu0 }
 0x192   : > { %v737_v63 = vpop.f32.mrb[2].mxu0 }
 0x193   : > { %v756_v1 = vmax.f32 %v735_v59, 0.0  ;;  %v738_v3 = vadd.f32 %v737_v63, %v5164_v55  ;;  %v4235_v5 = vpop.f32.mrb[3].mxu0 }
 0x195   : > { %v765_v6 = vmul.f32 %v5172_v60, %v756_v1  ;;  %v757_v7 = vmax.f32 %v738_v3, 0.0 }
 0x197   : > { %v774_v9 = vadd.f32 %v5179_v2, %v765_v6  ;;  %v766_v10 = vmul.f32 %v5172_v60, %v757_v7 }
 0x199   : > { %v5191_v11 = vadd.f32 %v5179_v2, %v766_v10  ;;  %780 = vst.msk [vmem:[#allocation3] sm:$0xff] %vm779_vm6, %v774_v9  ;;  %v871_v13 = vrot.slane %v774_v9, 4  ;;  %v790_v14 = vrot.slane %v774_v9, 1  ;;  %v816_v15 = vrot.slane %v774_v9, 2 }
 0x19a   : > { %v843_v16 = vrot.slane %v774_v9, 3 }
 0x19b   : > { %v872_v17 = vrot.slane %v5191_v11, 4  ;;  %781 = vst.msk [vmem:[#allocation3 + $0x10] sm:$0xff] %vm779_vm6, %v5191_v11  ;;  %v791_v18 = vrot.slane %v5191_v11, 1  ;;  %v817_v19 = vrot.slane %v5191_v11, 2  ;;  %v844_v20 = vrot.slane %v5191_v11, 3 }
 0x19d   : > { %v873_v22 = vsel %vm870_vm7, %v871_v13, %v872_v17  ;;  %v792_v23 = vsel %vm789_vm9, %v790_v14, %v791_v18  ;;  %v818_v24 = vsel %vm815_vm10, %v816_v15, %v817_v19  ;;  %v845_v25 = vsel %vm842_vm11, %v843_v16, %v844_v20 }
 0x19e   : > { %884 = vst.msk [vmem:[#allocation3 + $0x8] sm:$0xff] %vm779_vm6, %v873_v22  ;;  %797 = vrot.lane.b32.xlu0 %v792_v23, %s4916_s28 }
 0x1a2   : > { %823 = vrot.lane.b32.xlu0 %v818_v24, %s4918_s27 }
 0x1a5   : > { %v889_v13 = vld [vmem:[#allocation3 + $0x8] sm:$0xff] }
 0x1a6   : > { %852 = vrot.lane.b32.xlu0 %v845_v25, %s4920_s18 }
 0x1a8   : > { %v742_v28 = vpop.f32.mrb[4].mxu0 }
 0x1a9   : > { %v743_v29 = vadd.f32 %v742_v28, %v5164_v55  ;;  %v4238_v30 = vpop.f32.mrb[5].mxu0 }
 0x1aa   : > { %v745_v32 = vpop.f32.mrb[6].mxu0 }
 0x1ab   : > { %v758_v33 = vmax.f32 %v743_v29, 0.0  ;;  %v746_v34 = vadd.f32 %v745_v32, %v5164_v55  ;;  %v4239_v35 = vpop.f32.mrb[7].mxu0 }
 0x1ad   : > { %v767_v36 = vmul.f32 %v5172_v60, %v758_v33  ;;  %v759_v37 = vmax.f32 %v746_v34, 0.0 }
 0x1af   : > { %v776_v39 = vadd.f32 %v5179_v2, %v767_v36  ;;  %v768_v40 = vmul.f32 %v5172_v60, %v759_v37 }
 0x1b0   : > { %v750_v41 = vpop.f32.mrb[8].mxu0 }
 0x1b1   : > { %v874_v42 = vrot.slane %v776_v39, 4  ;;  %782 = vst.msk [vmem:[#allocation3 + $0x20] sm:$0xff] %vm779_vm6, %v776_v39  ;;  %v777_v43 = vadd.f32 %v5179_v2, %v768_v40  ;;  %v751_v44 = vadd.f32 %v750_v41, %v5164_v55  ;;  %v4242_v45 = vpop.f32.mrb[9].mxu0  ;;  %v793_v46 = vrot.slane %v776_v39, 1  ;;  %v4585_v55 = vld [vmem:[%s5897_s2 + $0x48] sm:$0xff]   ;;  %v4586_v41 = vld [vmem:[%s5874_s3] sm:$0xff]  }
 0x1b2   : > { %v753_v48 = vpop.f32.mrb[10].mxu0  ;;  %v819_v49 = vrot.slane %v776_v39, 2  ;;  %v846_v50 = vrot.slane %v776_v39, 3  ;;  %1009 = vmatpush1.bf16.msra.mxu1 %v4585_v55  ;;  %v923_v39 = vrot.slane %v5159_v54, %v922_v38  ;;  %v1045_v40 = vsub.s32 4, %v5153_v52  ;;  %4244 = vmatprep.subr.bf16.mxu0 %v4586_v41 }
 0x1b3   : > { %v875_v51 = vsel %vm870_vm7, %v872_v17, %v874_v42  ;;  %v760_v57 = vmax.f32 %v751_v44, 0.0  ;;  %v4243_v58 = vpop.f32.mrb[11].mxu0  ;;  %v794_v59 = vsel %vm789_vm9, %v791_v18, %v793_v46  ;;  %v795_v61 = vrot.slane %v777_v43, 1  ;;  %784 = vst.msk [vmem:[#allocation3 + $0x30] sm:$0x3f] %vm783_vm12, %v777_v43  ;;  %4245 = vmatpush3.bf16.msra.mxu0 %v4586_v41  ;;  %v4587_v48 = vld [vmem:[%s5874_s3 + $0x8] sm:$0xff]  }
 0x1b4   : > { %885 = vst.msk [vmem:[#allocation3 + $0x18] sm:$0xff] %vm779_vm6, %v875_v51  ;;  %799 = vrot.lane.b32.xlu1 %v794_v59, %s4916_s28  ;;  %v820_v62 = vsel %vm815_vm10, %v817_v19, %v819_v49  ;;  %v821_v63 = vrot.slane %v777_v43, 2  ;;  %v847_v1 = vsel %vm842_vm11, %v844_v20, %v846_v50  ;;  %v848_v3 = vrot.slane %v777_v43, 3  ;;  %4246 = vmatprep.subr.bf16.mxu0 %v4587_v48 }
 0x1b5   : > { %v769_v5 = vmul.f32 %v5172_v60, %v760_v57  ;;  %v796_v6 = vsel %vm789_vm9, %v793_v46, %v795_v61  ;;  %v876_v7 = vrot.slane %v777_v43, 4  ;;  %v1046_v45 = vrot.slane %v5159_v54, %v1045_v40 }
 0x1b6   : > { %801 = vrot.lane.b32.xlu0 %v796_v6, %s4916_s28  ;;  %v822_v8 = vsel %vm815_vm10, %v819_v49, %v821_v63  ;;  %v849_v9 = vsel %vm842_vm11, %v846_v50, %v848_v3  ;;  %v4588_v49 = vld [vmem:[%s5874_s3 + $0x10] sm:$0xff]  }
 0x1b7   : > { %v778_v10 = vadd.f32 %v5179_v2, %v769_v5  ;;  %v877_v11 = vsel %vm870_vm7, %v874_v42, %v876_v7  ;;  %v1053_v42 = vsub.s32 5, %v5153_v52  ;;  %4247 = vmatpush3.bf16.msra.mxu0 %v4587_v48 }
 0x1b8   : > { %825 = vrot.lane.b32.xlu1 %v820_v62, %s4918_s27  ;;  %886 = vst.msk [vmem:[#allocation3 + $0x28] sm:$0xff] %vm779_vm6, %v877_v11  ;;  %4248 = vmatprep.subr.bf16.mxu0 %v4588_v49 }
 0x1b9   : > { %v878_v12 = vrot.slane %v778_v10, 4  ;;  %v850_v60 = vrot.slane %v778_v10, 3  ;;  %v1054_v58 = vrot.slane %v5159_v54, %v1053_v42 }
 0x1ba   : > { %827 = vrot.lane.b32.xlu0 %v822_v8, %s4918_s27  ;;  %v4590_v8 = vld [vmem:[%s5874_s3 + $0x20] sm:$0xff]  }
 0x1bb   : > { %v891_v14 = vld [vmem:[#allocation3 + $0x18] sm:$0xff]  ;;  %v851_v15 = vsel %vm842_vm11, %v848_v3, %v850_v60  ;;  %v879_v16 = vsel %vm870_vm7, %v876_v7, %v878_v12  ;;  %4249 = vmatpush3.bf16.msra.mxu0 %v4588_v49  ;;  %v4024_v49 = vld [vmem:[%s5875_s4 + $0x8] ss:$0 sm:$0xff] }
 0x1bc   : > { %854 = vrot.lane.b32.xlu1 %v847_v1, %s4920_s18  ;;  %v897_v2 = vpack.c.bf16 %v891_v14, %v889_v13  ;;  %887 = vst.msk [vmem:[#allocation3 + $0x38] sm:$0x3f] %vm783_vm12, %v879_v16  ;;  %v4589_v1 = vld [vmem:[%s5874_s3 + $0x18] sm:$0xff]   ;;  %vm1098_vm12 = vcmask 785922  }
 0x1bd   : > { %4250 = vmatprep.subr.bf16.mxu0 %v4589_v1 }
 0x1be   : > { %4014 = vmatprep.mubr.msk.bf16.mxu1 %vm779_vm6, %v897_v2  ;;  %856 = vrot.lane.b32.xlu0 %v849_v9, %s4920_s18  ;;  %v4591_v9 = vld [vmem:[%s5874_s3 + $0x28] sm:$0xff]   ;;  %v4592_v2 = vld [vmem:[%s5876_s5] sm:$0xff]  }
 0x1bf   : > { %v893_v32 = vld [vmem:[#allocation3 + $0x28] sm:$0xff]  ;;  %4251 = vmatpush3.bf16.msra.mxu0 %v4589_v1  ;;  %4260 = vmatprep.subr.bf16.mxu1 %v4592_v2 }
 0x1c0   : > { %803 = vrot.lane.b32.xlu1 %v795_v61, %s4916_s28  ;;  %4252 = vmatprep.subr.bf16.mxu0 %v4590_v8 }
 0x1c3   : > { %v895_v27 = vld [vmem:[#allocation3 + $0x38] sm:$0x3f]  ;;  %4253 = vmatpush3.bf16.msra.mxu0 %v4590_v8 }
 0x1c4   : > { %829 = vrot.lane.b32.xlu1 %v821_v63, %s4918_s27  ;;  %v899_v33 = vpack.c.bf16 %v895_v27, %v893_v32  ;;  %4254 = vmatprep.subr.bf16.mxu0 %v4591_v9  ;;  %v4593_v32 = vld [vmem:[%s5876_s5 + $0x8] sm:$0xff]  }
 0x1c7   : > { %4255 = vmatpush3.bf16.msra.mxu0 %v4591_v9 }
 0x1c8   : > { %858 = vrot.lane.b32.xlu1 %v851_v15, %s4920_s18  ;;  %4268 = vmatprep.subr.bf16.mxu0 %v4915_v4  ;;  %s4098_s18 = sshll.u32 %s5020_s17, 4  ;;  %s4923_s17 = smov [#allocation5]  }
 0x1c9   : > { %s4854_s1 = sshll.u32 %s4923_s17, 4  ;;  %s4855_s1 = int_to_ptr.vmem [resolvable:$false] %s4854_s1 }
 0x1ca   : > { %s4856_s2 = scalar_lea.vmem %s4855_s1, 32 }
 0x210   : > { %v798_v17 = vpop.permute.xlu0 %797 }
 0x211   : > { %810 = vst.msk [vmem:[#allocation3] sm:$0xff] %vm809_vm13, %v798_v17 }
 0x214   : > { %v824_v18 = vpop.permute.xlu0 %823 }
 0x215   : > { %836 = vst.msk [vmem:[#allocation3] sm:$0xff] %vm835_vm14, %v824_v18 }
 0x218   : > { %v853_v19 = vpop.permute.xlu0 %852 }
 0x219   : > { %865 = vst.msk [vmem:[#allocation3] sm:$0xff] %vm864_vm15, %v853_v19 }
 0x220   : > { %v888_v29 = vld [vmem:[#allocation3] sm:$0xff] }
 0x226   : > { %v800_v20 = vpop.permute.xlu1 %799 }
 0x227   : > { %811 = vst.msk [vmem:[#allocation3 + $0x10] sm:$0xff] %vm809_vm13, %v800_v20 }
 0x228   : > { %v802_v21 = vpop.permute.xlu0 %801 }
 0x229   : > { %812 = vst.msk [vmem:[#allocation3 + $0x20] sm:$0xff] %vm809_vm13, %v802_v21 }
 0x22a   : > { %v826_v22 = vpop.permute.xlu1 %825 }
 0x22b   : > { %837 = vst.msk [vmem:[#allocation3 + $0x10] sm:$0xff] %vm835_vm14, %v826_v22 }
 0x22c   : > { %v828_v23 = vpop.permute.xlu0 %827 }
 0x22d   : > { %838 = vst.msk [vmem:[#allocation3 + $0x20] sm:$0xff] %vm835_vm14, %v828_v23 }
 0x22e   : > { %v855_v24 = vpop.permute.xlu1 %854 }
 0x22f   : > { %866 = vst.msk [vmem:[#allocation3 + $0x10] sm:$0xff] %vm864_vm15, %v855_v24 }
 0x230   : > { %v857_v25 = vpop.permute.xlu0 %856 }
 0x231   : > { %867 = vst.msk [vmem:[#allocation3 + $0x20] sm:$0xff] %vm864_vm15, %v857_v25 }
 0x232   : > { %v804_v26 = vpop.permute.xlu1 %803 }
 0x233   : > { %814 = vst.msk [vmem:[#allocation3 + $0x30] sm:$0x3f] %vm813_vm1, %v804_v26  ;;  %vm1084_vm1 = vcmask 520448  }
 0x236   : > { %v830_v28 = vpop.permute.xlu1 %829  ;;  %v890_v30 = vld [vmem:[#allocation3 + $0x10] sm:$0xff] }
 0x237   : > { %840 = vst.msk [vmem:[#allocation3 + $0x30] sm:$0x3f] %vm839_vm4, %v830_v28  ;;  %v896_v31 = vpack.c.bf16 %v890_v30, %v888_v29 }
 0x238   : > { %v892_v35 = vld [vmem:[#allocation3 + $0x20] sm:$0xff] }
 0x239   : > { %1023 = vmatmul.mubr.bf16.vlgmr.msra.gmra.mrb[0].mxu1 %v896_v31  ;;  %v5334_v31 = vld [vmem:[%s5877_s6] sm:$0xff]  }
 0x23a   : > { %4015 = vmatprep.mubr.msk.bf16.mxu1 %vm779_vm6, %v899_v33  ;;  %v859_v34 = vpop.permute.xlu1 %858  ;;  %4261 = vmatpush3.bf16.msra.mxu1 %v4592_v2  ;;  %v5344_v33 = vld [vmem:[%s5877_s6 + $0x8] sm:$0xff]  }
 0x23b   : > { %869 = vst.msk [vmem:[#allocation3 + $0x30] sm:$0x3f] %vm868_vm5, %v859_v34  ;;  %vm1161_vm5 = vcmask 785408   ;;  %4262 = vmatprep.subr.bf16.mxu1 %v4593_v32  ;;  %v1123_v34 = vsub.s32 6, %v5153_v52 }
 0x23e   : > { %4263 = vmatpush3.bf16.msra.mxu1 %v4593_v32 }
 0x23f   : > { %4276 = vmatprep.subr.bf16.mxu1 %v4915_v4 }
 0x242   : > { %v894_v36 = vld [vmem:[#allocation3 + $0x30] sm:$0x3f] }
 0x243   : > { %v898_v37 = vpack.c.bf16 %v894_v36, %v892_v35  ;;  %v1124_v35 = vrot.slane %v5159_v54, %v1123_v34  ;;  %v1223_v36 = vsub.s32 7, %v5153_v52 }
 0x245   : > { %1031 = vmatmul.mubr.bf16.gmra.mrb[4].mxu1 %v898_v37 }
 0x30c   : > { %v1024_v43 = vpop.f32.mrb[0].mxu1 }
 0x30d   : > { %v1025_v44 = vadd.f32 %v1024_v43, %v923_v39  ;;  %v1026_v46 = vpop.f32.mrb[1].mxu1 }
 0x30e   : > { %v1027_v47 = vpop.f32.mrb[2].mxu1 }
 0x30f   : > { %v1039_v50 = vmax.f32 %v1025_v44, 0.0  ;;  %v1028_v51 = vadd.f32 %v1027_v47, %v923_v39  ;;  %v1029_v57 = vpop.f32.mrb[3].mxu1 }
 0x311   : > { %v1047_v59 = vmul.f32 %v1046_v45, %v1039_v50  ;;  %v1040_v61 = vmax.f32 %v1028_v51, 0.0 }
 0x313   : > { %v1048_v55 = vmul.f32 %v1046_v45, %v1040_v61  ;;  %v1055_v62 = vadd.f32 %v1054_v58, %v1047_v59 }
 0x315   : > { %1068 = vrot.lane.b32.xlu0 %v1055_v62, %s4916_s28  ;;  %1059 = vst.msk [vmem:[#allocation4] sm:$0xff] %vm779_vm6, %v1055_v62  ;;  %v1056_v63 = vadd.f32 %v1054_v58, %v1048_v55 }
 0x317   : > { %1070 = vrot.lane.b32.xlu1 %v1056_v63, %s4916_s28  ;;  %1060 = vst.msk [vmem:[#allocation4 + $0x8] sm:$0xff] %vm779_vm6, %v1056_v63 }
 0x318   : > { %v1032_v3 = vpop.f32.mrb[4].mxu1 }
 0x319   : > { %v1033_v5 = vadd.f32 %v1032_v3, %v923_v39  ;;  %1086 = vrot.lane.b32.xlu0 %v1055_v62, %s4918_s27  ;;  %v1034_v6 = vpop.f32.mrb[5].mxu1 }
 0x31a   : > { %v1035_v7 = vpop.f32.mrb[6].mxu1 }
 0x31b   : > { %v1041_v10 = vmax.f32 %v1033_v5, 0.0  ;;  %v1036_v11 = vadd.f32 %v1035_v7, %v923_v39  ;;  %1088 = vrot.lane.b32.xlu1 %v1056_v63, %s4918_s27  ;;  %v1037_v12 = vpop.f32.mrb[7].mxu1  ;;  %v4025_v7 = vld [vmem:[%s5878_s7] ss:$0 sm:$0xff] }
 0x31d   : > { %v1049_v60 = vmul.f32 %v1046_v45, %v1041_v10  ;;  %v1042_v13 = vmax.f32 %v1036_v11, 0.0 }
 0x31f   : > { %v1050_v14 = vmul.f32 %v1046_v45, %v1042_v13  ;;  %v1057_v15 = vadd.f32 %v1054_v58, %v1049_v60 }
 0x321   : > { %1072 = vrot.lane.b32.xlu0 %v1057_v15, %s4916_s28  ;;  %1061 = vst.msk [vmem:[#allocation4 + $0x10] sm:$0xff] %vm779_vm6, %v1057_v15  ;;  %v1058_v16 = vadd.f32 %v1054_v58, %v1050_v14 }
 0x323   : > { %1074 = vrot.lane.b32.xlu1 %v1058_v16, %s4916_s28  ;;  %1063 = vst.msk [vmem:[#allocation4 + $0x18] sm:$0xf] %vm1062_vm3, %v1058_v16 }
 0x325   : > { %1090 = vrot.lane.b32.xlu0 %v1057_v15, %s4918_s27 }
 0x327   : > { %1092 = vrot.lane.b32.xlu1 %v1058_v16, %s4918_s27 }
 0x387   : > { %v1069_v17 = vpop.permute.xlu0 %1068 }
 0x388   : > { %1081 = vst.msk [vmem:[#allocation4 - $0x1] sm:$0xfe] %vm1080_vm8, %v1069_v17 }
 0x389   : > { %v1071_v18 = vpop.permute.xlu1 %1070 }
 0x38a   : > { %1082 = vst.msk [vmem:[#allocation4 + $0x7] sm:$0xff] %vm809_vm13, %v1071_v18 }
 0x38b   : > { %v1087_v19 = vpop.permute.xlu0 %1086 }
 0x38c   : > { %1099 = vst.msk [vmem:[#allocation4 - $0x2] sm:$0xfc] %vm1098_vm12, %v1087_v19 }
 0x38d   : > { %v1089_v20 = vpop.permute.xlu1 %1088 }
 0x38e   : > { %1100 = vst.msk [vmem:[#allocation4 + $0x6] sm:$0xff] %vm835_vm14, %v1089_v20 }
 0x393   : > { %v1073_v21 = vpop.permute.xlu0 %1072 }
 0x394   : > { %1083 = vst.msk [vmem:[#allocation4 + $0xf] sm:$0xff] %vm809_vm13, %v1073_v21  ;;  %vm3543_vm13 = vcmask 1040384  }
 0x395   : > { %v1075_v22 = vpop.permute.xlu1 %1074  ;;  %v1103_v25 = vld [vmem:[#allocation4] sm:$0xff] }
 0x396   : > { %1085 = vst.msk [vmem:[#allocation4 + $0x17] sm:$0x1f] %vm1084_vm1, %v1075_v22 }
 0x397   : > { %v1091_v23 = vpop.permute.xlu0 %1090 }
 0x398   : > { %1101 = vst.msk [vmem:[#allocation4 + $0xe] sm:$0xff] %vm835_vm14, %v1091_v23  ;;  %vm3545_vm14 = vcmask 1041408  }
 0x399   : > { %v1093_v24 = vpop.permute.xlu1 %1092 }
 0x39a   : > { %1102 = vst.msk [vmem:[#allocation4 + $0x16] sm:$0x3f] %vm839_vm4, %v1093_v24  ;;  %vm3547_vm4 = vcmask 1042432  }
 0x39f   : > { %v1104_v26 = vld [vmem:[#allocation4 + $0x8] sm:$0xff] }
 0x3a0   : > { %v1107_v27 = vpack.c.bf16 %v1104_v26, %v1103_v25 }
 0x3a1   : > { %v1105_v28 = vld [vmem:[#allocation4 + $0x10] sm:$0xff]  ;;  %v1106_v29 = vld [vmem:[#allocation4 + $0x18] sm:$0xf] }
 0x3a2   : > { %4256 = vmatprep.mubr.msk.bf16.mxu0 %vm1161_vm5, %v1107_v27  ;;  %v1108_v30 = vpack.c.bf16 %v1106_v29, %v1105_v28 }
 0x3a4   : > { %4257 = vmatmul.mubr.msk.bf16.vlgmr.msra.gmra.mrb[12].mxu0 %vm1161_vm5, %v1108_v30 }
 0x3a5   : > { %4272 = vmatprep.mubr.msk.bf16.mxu0 %vm4921_vm2, %v4915_v4  ;;  %4269 = vmatpush3.bf16.msra.mxu0 %v5334_v31 }
 0x3a6   : > { %4270 = vmatprep.subr.bf16.mxu0 %v4915_v4 }
 0x3a9   : > { %4271 = vmatpush3.bf16.msra.mxu0 %v5344_v33 }
 0x3aa   : > { %4284 = vmatprep.subr.bf16.mxu0 %v4915_v4 }
 0x3ac   : > { %4273 = vmatmul.mubr.bf16.vlgmr.msra.gmra.mrb[16].mxu0 %v4922_v0  ;;  %v1224_v0 = vrot.slane %v5159_v54, %v1223_v36 }
 0x3ad   : > { %4285 = vmatpush3.bf16.msra.mxu0 %v5334_v31  ;;  %4288 = vmatprep.mubr.msk.bf16.mxu0 %vm4921_vm2, %v4915_v4 }
 0x3ae   : > { %4286 = vmatprep.subr.bf16.mxu0 %v4915_v4 }
 0x3b1   : > { %4287 = vmatpush3.bf16.msra.mxu0 %v5344_v33 }
 0x3b2   : > { %4300 = vmatprep.subr.bf16.mxu0 %v4915_v4 }
 0x477   : > { %v4258_v37 = vpop.f32.mrb[12].mxu0 }
 0x478   : > { %v1211_v38 = vadd.f32 %v4258_v37, %v1124_v35  ;;  %v1202_v39 = vpop.f32.mrb[13].mxu0 }
 0x479   : > { %v1203_v40 = vadd.f32 %v1202_v39, %v1124_v35  ;;  %v4259_v41 = vpop.f32.mrb[14].mxu0 }
 0x47a   : > { %v1219_v42 = vmax.f32 %v1211_v38, 0.0  ;;  %v1214_v43 = vadd.f32 %v4259_v41, %v1124_v35  ;;  %v1205_v44 = vpop.f32.mrb[15].mxu0 }
 0x47b   : > { %v1217_v45 = vmax.f32 %v1203_v40, 0.0  ;;  %v1206_v46 = vadd.f32 %v1205_v44, %v1124_v35 }
 0x47c   : > { %v1227_v47 = vmul.f32 %v1224_v0, %v1219_v42  ;;  %v1220_v48 = vmax.f32 %v1214_v43, 0.0 }
 0x47d   : > { %v1225_v50 = vmul.f32 %v1224_v0, %v1217_v45  ;;  %v1218_v51 = vmax.f32 %v1206_v46, 0.0 }
 0x47e   : > { %v1228_v57 = vmul.f32 %v1224_v0, %v1220_v48  ;;  %v1235_v59 = vadd.f32 %v4024_v49, %v1227_v47 }
 0x47f   : > { %v1226_v58 = vmul.f32 %v1224_v0, %v1218_v51  ;;  %v1233_v61 = vadd.f32 %v4024_v49, %v1225_v50  ;;  %v1370_v1 = vpop.f32.mrb[16].mxu0 }
 0x480   : > { %v1236_v54 = vadd.f32 %v4024_v49, %v1228_v57  ;;  %v4274_v3 = vpop.f32.mrb[17].mxu0 }
 0x481   : > { %v1234_v55 = vadd.f32 %v4024_v49, %v1226_v58  ;;  %v1373_v5 = vpop.f32.mrb[18].mxu0 }
 0x482   : > { %v1238_v62 = vpack.c.bf16 %v1236_v54, %v1235_v59  ;;  %v4275_v6 = vpop.f32.mrb[19].mxu0 }
 0x483   : > { %v1237_v63 = vpack.c.bf16 %v1234_v55, %v1233_v61 }
 0x485   : > { %4264 = vmatprep.mubr.msk.bf16.mxu1 %vm779_vm6, %v1237_v63 }
 0x486   : > { %4265 = vmatmul.mubr.msk.bf16.vlgmr.msra.gmra.mrb[8].mxu1 %vm779_vm6, %v1238_v62 }
 0x487   : > { %4277 = vmatpush3.bf16.msra.mxu1 %v5334_v31  ;;  %4280 = vmatprep.mubr.msk.bf16.mxu1 %vm4921_vm2, %v4915_v4 }
 0x488   : > { %4278 = vmatprep.subr.bf16.mxu1 %v4915_v4 }
 0x48b   : > { %4279 = vmatpush3.bf16.msra.mxu1 %v5344_v33 }
 0x48c   : > { %4292 = vmatprep.subr.bf16.mxu1 %v4915_v4 }
 0x559   : > { %v4266_v8 = vpop.f32.mrb[8].mxu1 }
 0x55a   : > { %v5374_v9 = vadd.f32 %v4266_v8, %v4025_v7  ;;  %v1302_v10 = vpop.f32.mrb[9].mxu1 }
 0x55b   : > { %v5376_v11 = vadd.f32 %v4025_v7, %v1302_v10  ;;  %v4267_v12 = vpop.f32.mrb[10].mxu1 }
 0x55c   : > { %v5378_v60 = vadd.f32 %v4267_v12, %v4025_v7  ;;  %v1305_v13 = vpop.f32.mrb[11].mxu1 }
 0x55d   : > { %v5380_v14 = vadd.f32 %v4025_v7, %v1305_v13  ;;  %v1376_v15 = vadd.f32 %v1370_v1, %v5376_v11 }
 0x55f   : > { %4602 = vtanh.f32 %v1376_v15  ;;  %v4032_v2 = vmul.f32 -1.442695, %v1376_v15 }
 0x561   : > { %4604 = vpow2.f32 %v4032_v2 }
 0x569   : > { %v4603_v16 = vpop.eup %4602 }
 0x56a   : > { %1386 = vrot.lane.b32.xlu0 %v4603_v16, %s4918_s27 }
 0x56b   : > { %v4605_v17 = vpop.eup %4604 }
 0x56c   : > { %v1380_v18 = vadd.f32 1.0, %v4605_v17 }
 0x56e   : > { %4606 = vrcp.f32 %v1380_v18 }
 0x578   : > { %v4607_v19 = vpop.eup %4606 }
 0x579   : > { %v1384_v22 = vmul.f32 0.0, %v4607_v19 }
 0x5dc   : > { %v1387_v20 = vpop.permute.xlu0 %1386 }
 0x5dd   : > { %v1389_v21 = vmul.f32 %v4607_v19, %v1387_v20 }
 0x5df   : > { %1391 = vrot.lane.b32.xlu1 %v1389_v21, %s4916_s28 }
 0x651   : > { %v1392_v23 = vpop.permute.xlu1 %1391 }
 0x652   : > { %v1394_v24 = vadd.f32 %v1392_v23, %v1384_v22 }
 0x654   : > { %4608 = vtanh.f32 %v1394_v24  ;;  %v1460_v44 = vrot.slane %v1394_v24, 7 }
 0x65e   : > { %v4609_v25 = vpop.eup %4608 }
 0x65f   : > { %1397 = vrot.lane.b32.xlu0 %v4609_v25, %s4918_s27 }
 0x6d1   : > { %v1398_v26 = vpop.permute.xlu0 %1397 }
 0x6d2   : > { %v5386_v27 = vmul.f32 %v4607_v19, %v1398_v26 }
 0x6d4   : > { %v1401_v28 = vpack.c.bf16 %v5386_v27, %v5386_v27 }
 0x6d6   : > { %1403 = vrot.lane.b32.xlu1 %v1401_v28, %s4916_s28 }
 0x748   : > { %v1404_v29 = vpop.permute.xlu1 %1403 }
 0x749   : > { %4281 = vmatmul.mubr.msk.bf16.vlgmr.msra.gmra.mrb[12].mxu1 %vm779_vm6, %v1404_v29 }
 0x74a   : > { %4293 = vmatpush3.bf16.msra.mxu1 %v5334_v31  ;;  %4296 = vmatprep.mubr.msk.bf16.mxu1 %vm4921_vm2, %v4915_v4 }
 0x74b   : > { %4294 = vmatprep.subr.bf16.mxu1 %v4915_v4 }
 0x74e   : > { %4295 = vmatpush3.bf16.msra.mxu1 %v5344_v33 }
 0x74f   : > { %4308 = vmatprep.subr.bf16.mxu1 %v4915_v4 }
 0x81c   : > { %v1442_v30 = vpop.f32.mrb[12].mxu1 }
 0x81d   : > { %v1449_v32 = vrot.slane %v1442_v30, 7  ;;  %v4282_v34 = vpop.f32.mrb[13].mxu1 }
 0x81e   : > { %v1445_v35 = vpop.f32.mrb[14].mxu1 }
 0x81f   : > { %v1451_v36 = vadd.f32 %v1449_v32, %v5376_v11  ;;  %v4283_v37 = vpop.f32.mrb[15].mxu1 }
 0x821   : > { %4610 = vtanh.f32 %v1451_v36  ;;  %v4034_v0 = vmul.f32 -1.442695, %v1451_v36 }
 0x823   : > { %4612 = vpow2.f32 %v4034_v0 }
 0x82b   : > { %v4611_v38 = vpop.eup %4610 }
 0x82c   : > { %1464 = vrot.lane.b32.xlu0 %v4611_v38, %s4918_s27 }
 0x82d   : > { %v4613_v39 = vpop.eup %4612 }
 0x82e   : > { %v1455_v40 = vadd.f32 1.0, %v4613_v39 }
 0x830   : > { %4614 = vrcp.f32 %v1455_v40 }
 0x83a   : > { %v4615_v41 = vpop.eup %4614 }
 0x83b   : > { %v1462_v45 = vmul.f32 %v4615_v41, %v1460_v44 }
 0x89e   : > { %v1465_v42 = vpop.permute.xlu0 %1464 }
 0x89f   : > { %v1467_v43 = vmul.f32 %v4615_v41, %v1465_v42 }
 0x8a1   : > { %1469 = vrot.lane.b32.xlu1 %v1467_v43, %s4916_s28 }
 0x913   : > { %v1470_v46 = vpop.permute.xlu1 %1469 }
 0x914   : > { %v1472_v47 = vadd.f32 %v1470_v46, %v1462_v45 }
 0x916   : > { %4616 = vtanh.f32 %v1472_v47  ;;  %v1540_v12 = vrot.slane %v1472_v47, 7 }
 0x920   : > { %v4617_v48 = vpop.eup %4616 }
 0x921   : > { %1475 = vrot.lane.b32.xlu0 %v4617_v48, %s4918_s27 }
 0x993   : > { %v1476_v49 = vpop.permute.xlu0 %1475 }
 0x994   : > { %v1478_v50 = vmul.f32 %v4615_v41, %v1476_v49 }
 0x996   : > { %v1479_v51 = vpack.c.bf16 %v1478_v50, %v1478_v50  ;;  %v3544_v19 = vsel %vm3543_vm13, %v5386_v27, %v1478_v50 }
 0x998   : > { %v1481_v57 = vshrl.u32 %v1479_v51, 16 }
 0x99a   : > { %1483 = vrot.lane.b32.xlu1 %v1481_v57, %s4916_s28 }
 0xa0c   : > { %v1484_v58 = vpop.permute.xlu1 %1483 }
 0xa0d   : > { %4289 = vmatmul.mubr.msk.bf16.vlgmr.msra.gmra.mrb[20].mxu0 %vm779_vm6, %v1484_v58 }
 0xa0e   : > { %4301 = vmatpush3.bf16.msra.mxu0 %v5334_v31  ;;  %4304 = vmatprep.mubr.msk.bf16.mxu0 %vm4921_vm2, %v4915_v4 }
 0xa0f   : > { %4302 = vmatprep.subr.bf16.mxu0 %v4915_v4 }
 0xa12   : > { %4303 = vmatpush3.bf16.msra.mxu0 %v5344_v33 }
 0xa13   : > { %4316 = vmatprep.subr.bf16.mxu0 %v4915_v4 }
 0xae0   : > { %v1522_v59 = vpop.f32.mrb[20].mxu0 }
 0xae1   : > { %v1529_v54 = vrot.slane %v1522_v59, 6  ;;  %v4290_v61 = vpop.f32.mrb[21].mxu0 }
 0xae2   : > { %v1525_v55 = vpop.f32.mrb[22].mxu0 }
 0xae3   : > { %v1531_v62 = vadd.f32 %v1529_v54, %v5376_v11  ;;  %v4291_v63 = vpop.f32.mrb[23].mxu0 }
 0xae5   : > { %4618 = vtanh.f32 %v1531_v62  ;;  %v4036_v3 = vmul.f32 -1.442695, %v1531_v62 }
 0xae7   : > { %4620 = vpow2.f32 %v4036_v3 }
 0xaef   : > { %v4619_v1 = vpop.eup %4618 }
 0xaf0   : > { %1544 = vrot.lane.b32.xlu0 %v4619_v1, %s4918_s27 }
 0xaf1   : > { %v4621_v5 = vpop.eup %4620 }
 0xaf2   : > { %v1535_v6 = vadd.f32 1.0, %v4621_v5 }
 0xaf4   : > { %4622 = vrcp.f32 %v1535_v6 }
 0xafe   : > { %v4623_v7 = vpop.eup %4622 }
 0xaff   : > { %v1542_v13 = vmul.f32 %v4623_v7, %v1540_v12 }
 0xb62   : > { %v1545_v8 = vpop.permute.xlu0 %1544 }
 0xb63   : > { %v1547_v10 = vmul.f32 %v4623_v7, %v1545_v8 }
 0xb65   : > { %1549 = vrot.lane.b32.xlu1 %v1547_v10, %s4916_s28 }
 0xbd7   : > { %v1550_v15 = vpop.permute.xlu1 %1549 }
 0xbd8   : > { %v1552_v16 = vadd.f32 %v1550_v15, %v1542_v13 }
 0xbda   : > { %4624 = vtanh.f32 %v1552_v16  ;;  %v1619_v0 = vrot.slane %v1552_v16, 7 }
 0xbe4   : > { %v4625_v2 = vpop.eup %4624 }
 0xbe5   : > { %1555 = vrot.lane.b32.xlu0 %v4625_v2, %s4918_s27 }
 0xc57   : > { %v1556_v17 = vpop.permute.xlu0 %1555 }
 0xc58   : > { %v1558_v18 = vmul.f32 %v4623_v7, %v1556_v17 }
 0xc5a   : > { %v1559_v20 = vpack.c.bf16 %v1558_v18, %v1558_v18  ;;  %v3546_v21 = vsel %vm3545_vm14, %v3544_v19, %v1558_v18 }
 0xc5c   : > { %v1561_v22 = vrot.slane %v1559_v20, 1 }
 0xc5e   : > { %1562 = vrot.lane.b32.xlu1 %v1561_v22, %s4916_s28 }
 0xcd0   : > { %v1563_v23 = vpop.permute.xlu1 %1562 }
 0xcd1   : > { %4297 = vmatmul.mubr.msk.bf16.vlgmr.msra.gmra.mrb[16].mxu1 %vm779_vm6, %v1563_v23 }
 0xcd2   : > { %4309 = vmatpush3.bf16.msra.mxu1 %v5334_v31  ;;  %4312 = vmatprep.mubr.msk.bf16.mxu1 %vm4921_vm2, %v4915_v4 }
 0xcd3   : > { %4310 = vmatprep.subr.bf16.mxu1 %v4915_v4 }
 0xcd6   : > { %4311 = vmatpush3.bf16.msra.mxu1 %v5344_v33 }
 0xcd7   : > { %4324 = vmatprep.subr.bf16.mxu1 %v4915_v4 }
 0xda4   : > { %v1601_v24 = vpop.f32.mrb[16].mxu1 }
 0xda5   : > { %v1608_v25 = vrot.slane %v1601_v24, 5  ;;  %v4298_v26 = vpop.f32.mrb[17].mxu1 }
 0xda6   : > { %v1604_v27 = vpop.f32.mrb[18].mxu1 }
 0xda7   : > { %v1610_v28 = vadd.f32 %v1608_v25, %v5376_v11  ;;  %v4299_v29 = vpop.f32.mrb[19].mxu1 }
 0xda9   : > { %4626 = vtanh.f32 %v1610_v28  ;;  %v4038_v32 = vmul.f32 -1.442695, %v1610_v28 }
 0xdab   : > { %4628 = vpow2.f32 %v4038_v32 }
 0xdb3   : > { %v4627_v30 = vpop.eup %4626 }
 0xdb4   : > { %1623 = vrot.lane.b32.xlu0 %v4627_v30, %s4918_s27 }
 0xdb5   : > { %v4629_v34 = vpop.eup %4628 }
 0xdb6   : > { %v1614_v35 = vadd.f32 1.0, %v4629_v34 }
 0xdb8   : > { %4630 = vrcp.f32 %v1614_v35 }
 0xdc2   : > { %v4631_v36 = vpop.eup %4630 }
 0xdc3   : > { %v1621_v39 = vmul.f32 %v4631_v36, %v1619_v0 }
 0xe26   : > { %v1624_v37 = vpop.permute.xlu0 %1623 }
 0xe27   : > { %v1626_v38 = vmul.f32 %v4631_v36, %v1624_v37 }
 0xe29   : > { %1628 = vrot.lane.b32.xlu1 %v1626_v38, %s4916_s28 }
 0xe9b   : > { %v1629_v40 = vpop.permute.xlu1 %1628 }
 0xe9c   : > { %v1631_v41 = vadd.f32 %v1629_v40, %v1621_v39 }
 0xe9e   : > { %4632 = vtanh.f32 %v1631_v41  ;;  %v1700_v6 = vrot.slane %v1631_v41, 7 }
 0xea8   : > { %v4633_v42 = vpop.eup %4632 }
 0xea9   : > { %1634 = vrot.lane.b32.xlu0 %v4633_v42, %s4918_s27 }
 0xf1b   : > { %v1635_v43 = vpop.permute.xlu0 %1634 }
 0xf1c   : > { %v1637_v44 = vmul.f32 %v4631_v36, %v1635_v43 }
 0xf1e   : > { %v1638_v45 = vpack.c.bf16 %v1637_v44, %v1637_v44  ;;  %v3548_v46 = vsel %vm3547_vm4, %v3546_v21, %v1637_v44 }
 0xf20   : > { %v1640_v47 = vshrl.u32 %v1638_v45, 16 }
 0xf22   : > { %v1642_v48 = vrot.slane %v1640_v47, 1 }
 0xf24   : > { %1643 = vrot.lane.b32.xlu1 %v1642_v48, %s4916_s28 }
 0xf96   : > { %v1644_v49 = vpop.permute.xlu1 %1643 }
 0xf97   : > { %4305 = vmatmul.mubr.msk.bf16.vlgmr.msra.gmra.mrb[24].mxu0 %vm779_vm6, %v1644_v49 }
 0xf98   : > { %4317 = vmatpush3.bf16.msra.mxu0 %v5334_v31  ;;  %4320 = vmatprep.mubr.msk.bf16.mxu0 %vm4921_vm2, %v4915_v4 }
 0xf99   : > { %4318 = vmatprep.subr.bf16.mxu0 %v4915_v4 }
 0xf9c   : > { %4319 = vmatpush3.bf16.msra.mxu0 %v5344_v33 }
 0xf9d   : > { %4332 = vmatprep.subr.bf16.mxu0 %v4915_v4 }
0x106a   : > { %v1682_v50 = vpop.f32.mrb[24].mxu0 }
0x106b   : > { %v1689_v51 = vrot.slane %v1682_v50, 4  ;;  %v4306_v57 = vpop.f32.mrb[25].mxu0 }
0x106c   : > { %v1685_v58 = vpop.f32.mrb[26].mxu0 }
0x106d   : > { %v1691_v59 = vadd.f32 %v1689_v51, %v5376_v11  ;;  %v4307_v54 = vpop.f32.mrb[27].mxu0 }
0x106f   : > { %4634 = vtanh.f32 %v1691_v59  ;;  %v4040_v55 = vmul.f32 -1.442695, %v1691_v59 }
0x1071   : > { %4636 = vpow2.f32 %v4040_v55 }
0x1079   : > { %v4635_v61 = vpop.eup %4634 }
0x107a   : > { %1704 = vrot.lane.b32.xlu0 %v4635_v61, %s4918_s27 }
0x107b   : > { %v4637_v62 = vpop.eup %4636 }
0x107c   : > { %v1695_v63 = vadd.f32 1.0, %v4637_v62 }
0x107e   : > { %4638 = vrcp.f32 %v1695_v63 }
0x1088   : > { %v4639_v1 = vpop.eup %4638 }
0x1089   : > { %v1702_v7 = vmul.f32 %v4639_v1, %v1700_v6 }
0x10ec   : > { %v1705_v3 = vpop.permute.xlu0 %1704 }
0x10ed   : > { %v1707_v5 = vmul.f32 %v4639_v1, %v1705_v3 }
0x10ef   : > { %1709 = vrot.lane.b32.xlu1 %v1707_v5, %s4916_s28 }
0x1161   : > { %v1710_v8 = vpop.permute.xlu1 %1709 }
0x1162   : > { %v1712_v10 = vadd.f32 %v1710_v8, %v1702_v7 }
0x1164   : > { %4640 = vtanh.f32 %v1712_v10  ;;  %v1779_v34 = vrot.slane %v1712_v10, 7 }
0x116e   : > { %v4641_v12 = vpop.eup %4640 }
0x116f   : > { %1715 = vrot.lane.b32.xlu0 %v4641_v12, %s4918_s27 }
0x11e1   : > { %v1716_v13 = vpop.permute.xlu0 %1715 }
0x11e2   : > { %v1718_v15 = vmul.f32 %v4639_v1, %v1716_v13 }
0x11e4   : > { %v1719_v16 = vpack.c.bf16 %v1718_v15, %v1718_v15  ;;  %v3549_v2 = vsel %vm870_vm7, %v3548_v46, %v1718_v15 }
0x11e6   : > { %v1721_v17 = vrot.slane %v1719_v16, 2 }
0x11e8   : > { %1722 = vrot.lane.b32.xlu1 %v1721_v17, %s4916_s28 }
0x125a   : > { %v1723_v18 = vpop.permute.xlu1 %1722 }
0x125b   : > { %4313 = vmatmul.mubr.msk.bf16.vlgmr.msra.gmra.mrb[20].mxu1 %vm779_vm6, %v1723_v18 }
0x125c   : > { %4325 = vmatpush3.bf16.msra.mxu1 %v5334_v31  ;;  %4328 = vmatprep.mubr.msk.bf16.mxu1 %vm4921_vm2, %v4915_v4 }
0x125d   : > { %4326 = vmatprep.subr.bf16.mxu1 %v4915_v4 }
0x1260   : > { %4327 = vmatpush3.bf16.msra.mxu1 %v5344_v33 }
0x1261   : > { %4340 = vmatprep.subr.bf16.mxu1 %v4915_v4 }
0x132e   : > { %v1761_v19 = vpop.f32.mrb[20].mxu1 }
0x132f   : > { %v1768_v20 = vrot.slane %v1761_v19, 3  ;;  %v4314_v21 = vpop.f32.mrb[21].mxu1 }
0x1330   : > { %v1764_v22 = vpop.f32.mrb[22].mxu1 }
0x1331   : > { %v1770_v23 = vadd.f32 %v1768_v20, %v5376_v11  ;;  %v4315_v24 = vpop.f32.mrb[23].mxu1 }
0x1333   : > { %4642 = vtanh.f32 %v1770_v23  ;;  %v4042_v26 = vmul.f32 -1.442695, %v1770_v23 }
0x1335   : > { %4644 = vpow2.f32 %v4042_v26 }
0x133d   : > { %v4643_v25 = vpop.eup %4642 }
0x133e   : > { %1783 = vrot.lane.b32.xlu0 %v4643_v25, %s4918_s27 }
0x133f   : > { %v4645_v27 = vpop.eup %4644 }
0x1340   : > { %v1774_v28 = vadd.f32 1.0, %v4645_v27 }
0x1342   : > { %4646 = vrcp.f32 %v1774_v28 }
0x134c   : > { %v4647_v29 = vpop.eup %4646 }
0x134d   : > { %v1781_v35 = vmul.f32 %v4647_v29, %v1779_v34 }
0x13b0   : > { %v1784_v30 = vpop.permute.xlu0 %1783 }
0x13b1   : > { %v1786_v32 = vmul.f32 %v4647_v29, %v1784_v30 }
0x13b3   : > { %1788 = vrot.lane.b32.xlu1 %v1786_v32, %s4916_s28 }
0x1425   : > { %v1789_v36 = vpop.permute.xlu1 %1788 }
0x1426   : > { %v1791_v37 = vadd.f32 %v1789_v36, %v1781_v35 }
0x1428   : > { %4648 = vtanh.f32 %v1791_v37  ;;  %v1860_v62 = vrot.slane %v1791_v37, 7 }
0x1432   : > { %v4649_v38 = vpop.eup %4648 }
0x1433   : > { %1794 = vrot.lane.b32.xlu0 %v4649_v38, %s4918_s27 }
0x14a5   : > { %v1795_v0 = vpop.permute.xlu0 %1794 }
0x14a6   : > { %v1797_v39 = vmul.f32 %v4647_v29, %v1795_v0 }
0x14a8   : > { %v1798_v40 = vpack.c.bf16 %v1797_v39, %v1797_v39  ;;  %v3550_v41 = vsel %vm842_vm11, %v3549_v2, %v1797_v39 }
0x14aa   : > { %v1800_v42 = vshrl.u32 %v1798_v40, 16 }
0x14ac   : > { %v1802_v43 = vrot.slane %v1800_v42, 2 }
0x14ae   : > { %1803 = vrot.lane.b32.xlu1 %v1802_v43, %s4916_s28 }
0x1520   : > { %v1804_v44 = vpop.permute.xlu1 %1803 }
0x1521   : > { %4321 = vmatmul.mubr.msk.bf16.vlgmr.msra.gmra.mrb[28].mxu0 %vm779_vm6, %v1804_v44 }
0x1522   : > { %4333 = vmatpush3.bf16.msra.mxu0 %v5334_v31  ;;  %4336 = vmatprep.mubr.msk.bf16.mxu0 %vm4921_vm2, %v4915_v4 }
0x1523   : > { %4334 = vmatprep.subr.bf16.mxu0 %v4915_v4 }
0x1526   : > { %4335 = vmatpush3.bf16.msra.mxu0 %v5344_v33 }
0x1527   : > { %4348 = vmatprep.subr.bf16.mxu0 %v4915_v4 }
0x15f4   : > { %v1842_v45 = vpop.f32.mrb[28].mxu0 }
0x15f5   : > { %v1849_v46 = vrot.slane %v1842_v45, 2  ;;  %v4322_v47 = vpop.f32.mrb[29].mxu0 }
0x15f6   : > { %v1845_v48 = vpop.f32.mrb[30].mxu0 }
0x15f7   : > { %v1851_v49 = vadd.f32 %v1849_v46, %v5376_v11  ;;  %v4323_v50 = vpop.f32.mrb[31].mxu0 }
0x15f9   : > { %4650 = vtanh.f32 %v1851_v49  ;;  %v4044_v57 = vmul.f32 -1.442695, %v1851_v49 }
0x15fb   : > { %4652 = vpow2.f32 %v4044_v57 }
0x1603   : > { %v4651_v51 = vpop.eup %4650 }
0x1604   : > { %1864 = vrot.lane.b32.xlu0 %v4651_v51, %s4918_s27 }
0x1605   : > { %v4653_v58 = vpop.eup %4652 }
0x1606   : > { %v1855_v59 = vadd.f32 1.0, %v4653_v58 }
0x1608   : > { %4654 = vrcp.f32 %v1855_v59 }
0x1612   : > { %v4655_v54 = vpop.eup %4654 }
0x1613   : > { %v1862_v63 = vmul.f32 %v4655_v54, %v1860_v62 }
0x1676   : > { %v1865_v61 = vpop.permute.xlu0 %1864 }
0x1677   : > { %v1867_v55 = vmul.f32 %v4655_v54, %v1865_v61 }
0x1679   : > { %1869 = vrot.lane.b32.xlu1 %v1867_v55, %s4916_s28 }
0x16eb   : > { %v1870_v1 = vpop.permute.xlu1 %1869 }
0x16ec   : > { %v1872_v3 = vadd.f32 %v1870_v1, %v1862_v63 }
0x16ee   : > { %4656 = vtanh.f32 %v1872_v3  ;;  %v1939_v27 = vrot.slane %v1872_v3, 7 }
0x16f8   : > { %v4657_v5 = vpop.eup %4656 }
0x16f9   : > { %1875 = vrot.lane.b32.xlu0 %v4657_v5, %s4918_s27 }
0x176b   : > { %v1876_v6 = vpop.permute.xlu0 %1875 }
0x176c   : > { %v1878_v7 = vmul.f32 %v4655_v54, %v1876_v6 }
0x176e   : > { %v1879_v8 = vpack.c.bf16 %v1878_v7, %v1878_v7  ;;  %v3551_v10 = vsel %vm815_vm10, %v3550_v41, %v1878_v7 }
0x1770   : > { %v1881_v12 = vrot.slane %v1879_v8, 3 }
0x1772   : > { %1882 = vrot.lane.b32.xlu1 %v1881_v12, %s4916_s28 }
0x17e4   : > { %v1883_v13 = vpop.permute.xlu1 %1882 }
0x17e5   : > { %4329 = vmatmul.mubr.msk.bf16.vlgmr.msra.gmra.mrb[24].mxu1 %vm779_vm6, %v1883_v13 }
0x17e6   : > { %4341 = vmatpush3.bf16.msra.mxu1 %v5334_v31  ;;  %4344 = vmatprep.mubr.msk.bf16.mxu1 %vm4921_vm2, %v4915_v4 }
0x17e7   : > { %4342 = vmatprep.subr.bf16.mxu1 %v4915_v4 }
0x17ea   : > { %4343 = vmatpush3.bf16.msra.mxu1 %v5344_v33 }
0x17eb   : > { %4356 = vmatprep.subr.bf16.mxu1 %v4915_v4 }
0x18b8   : > { %v1921_v15 = vpop.f32.mrb[24].mxu1 }
0x18b9   : > { %v1928_v16 = vrot.slane %v1921_v15, 1  ;;  %v4330_v2 = vpop.f32.mrb[25].mxu1 }
0x18ba   : > { %v1924_v17 = vpop.f32.mrb[26].mxu1 }
0x18bb   : > { %v1930_v18 = vadd.f32 %v1928_v16, %v5376_v11  ;;  %v4331_v19 = vpop.f32.mrb[27].mxu1 }
0x18bd   : > { %4658 = vtanh.f32 %v1930_v18  ;;  %v4046_v21 = vmul.f32 -1.442695, %v1930_v18 }
0x18bf   : > { %4660 = vpow2.f32 %v4046_v21 }
0x18c7   : > { %v4659_v20 = vpop.eup %4658 }
0x18c8   : > { %1943 = vrot.lane.b32.xlu0 %v4659_v20, %s4918_s27 }
0x18c9   : > { %v4661_v22 = vpop.eup %4660 }
0x18ca   : > { %v1934_v23 = vadd.f32 1.0, %v4661_v22 }
0x18cc   : > { %4662 = vrcp.f32 %v1934_v23 }
0x18d6   : > { %v4663_v24 = vpop.eup %4662 }
0x18d7   : > { %v1941_v28 = vmul.f32 %v4663_v24, %v1939_v27 }
0x193a   : > { %v1944_v25 = vpop.permute.xlu0 %1943 }
0x193b   : > { %v1946_v26 = vmul.f32 %v4663_v24, %v1944_v25 }
0x193d   : > { %1948 = vrot.lane.b32.xlu1 %v1946_v26, %s4916_s28 }
0x19af   : > { %v1949_v29 = vpop.permute.xlu1 %1948 }
0x19b0   : > { %v1951_v30 = vadd.f32 %v1949_v29, %v1941_v28 }
0x19b2   : > { %4664 = vtanh.f32 %v1951_v30  ;;  %v2017_v51 = vrot.slane %v1951_v30, 7 }
0x19bc   : > { %v4665_v11 = vpop.eup %4664 }
0x19bd   : > { %1954 = vrot.lane.b32.xlu0 %v4665_v11, %s4918_s27 }
0x1a2f   : > { %v1955_v32 = vpop.permute.xlu0 %1954 }
0x1a30   : > { %v1957_v34 = vmul.f32 %v4663_v24, %v1955_v32 }
0x1a32   : > { %v1958_v35 = vpack.c.bf16 %v1957_v34, %v1957_v34  ;;  %v5482_v36 = vsel %vm789_vm9, %v3551_v10, %v1957_v34 }
0x1a34   : > { %v1960_v37 = vshrl.u32 %v1958_v35, 16 }
0x1a36   : > { %v1962_v38 = vrot.slane %v1960_v37, 3 }
0x1a38   : > { %1963 = vrot.lane.b32.xlu1 %v1962_v38, %s4916_s28 }
0x1aaa   : > { %v1964_v0 = vpop.permute.xlu1 %1963 }
0x1aab   : > { %4337 = vmatmul.mubr.msk.bf16.vlgmr.msra.gmra.mrb[32].mxu0 %vm779_vm6, %v1964_v0 }
0x1aac   : > { %4349 = vmatpush3.bf16.msra.mxu0 %v5334_v31  ;;  %4352 = vmatprep.mubr.msk.bf16.mxu0 %vm4921_vm2, %v4915_v4 }
0x1aad   : > { %4350 = vmatprep.subr.bf16.mxu0 %v4915_v4 }
0x1ab0   : > { %4351 = vmatpush3.bf16.msra.mxu0 %v5344_v33 }
0x1ab1   : > { %4364 = vmatprep.subr.bf16.mxu0 %v4915_v4 }
0x1b7e   : > { %v2002_v39 = vpop.f32.mrb[32].mxu0 }
0x1b7f   : > { %v2008_v40 = vadd.f32 %v2002_v39, %v5380_v14  ;;  %v4338_v41 = vpop.f32.mrb[33].mxu0 }
0x1b80   : > { %v2005_v42 = vpop.f32.mrb[34].mxu0 }
0x1b81   : > { %4666 = vtanh.f32 %v2008_v40  ;;  %v4339_v43 = vpop.f32.mrb[35].mxu0  ;;  %v4048_v45 = vmul.f32 -1.442695, %v2008_v40 }
0x1b83   : > { %4668 = vpow2.f32 %v4048_v45 }
0x1b8b   : > { %v4667_v44 = vpop.eup %4666 }
0x1b8c   : > { %2021 = vrot.lane.b32.xlu0 %v4667_v44, %s4918_s27 }
0x1b8d   : > { %v4669_v46 = vpop.eup %4668 }
0x1b8e   : > { %v2012_v47 = vadd.f32 1.0, %v4669_v46 }
0x1b90   : > { %4670 = vrcp.f32 %v2012_v47 }
0x1b9a   : > { %v4671_v48 = vpop.eup %4670 }
0x1b9b   : > { %v2019_v57 = vmul.f32 %v4671_v48, %v2017_v51 }
0x1bfe   : > { %v2022_v49 = vpop.permute.xlu0 %2021 }
0x1bff   : > { %v2024_v50 = vmul.f32 %v4671_v48, %v2022_v49 }
0x1c01   : > { %2026 = vrot.lane.b32.xlu1 %v2024_v50, %s4916_s28 }
0x1c73   : > { %v2027_v58 = vpop.permute.xlu1 %2026 }
0x1c74   : > { %v2029_v59 = vadd.f32 %v2027_v58, %v2019_v57 }
0x1c76   : > { %4672 = vtanh.f32 %v2029_v59  ;;  %v2095_v18 = vrot.slane %v2029_v59, 7 }
0x1c80   : > { %v4673_v54 = vpop.eup %4672 }
0x1c81   : > { %2032 = vrot.lane.b32.xlu0 %v4673_v54, %s4918_s27 }
0x1cf3   : > { %v2033_v61 = vpop.permute.xlu0 %2032 }
0x1cf4   : > { %v5496_v55 = vmul.f32 %v4671_v48, %v2033_v61 }
0x1cf6   : > { %v2036_v62 = vpack.c.bf16 %v5496_v55, %v5496_v55 }
0x1cf8   : > { %2038 = vrot.lane.b32.xlu1 %v2036_v62, %s4916_s28 }
0x1d6a   : > { %v2039_v63 = vpop.permute.xlu1 %2038 }
0x1d6b   : > { %4345 = vmatmul.mubr.msk.bf16.vlgmr.msra.gmra.mrb[28].mxu1 %vm779_vm6, %v2039_v63 }
0x1d6c   : > { %4357 = vmatpush3.bf16.msra.mxu1 %v5334_v31  ;;  %4360 = vmatprep.mubr.msk.bf16.mxu1 %vm4921_vm2, %v4915_v4 }
0x1d6d   : > { %4358 = vmatprep.subr.bf16.mxu1 %v4915_v4 }
0x1d70   : > { %4359 = vmatpush3.bf16.msra.mxu1 %v5344_v33 }
0x1d71   : > { %4372 = vmatprep.subr.bf16.mxu1 %v4915_v4 }
0x1e3e   : > { %v2077_v1 = vpop.f32.mrb[28].mxu1 }
0x1e3f   : > { %v2084_v3 = vrot.slane %v2077_v1, 7  ;;  %v4346_v5 = vpop.f32.mrb[29].mxu1 }
0x1e40   : > { %v2080_v6 = vpop.f32.mrb[30].mxu1 }
0x1e41   : > { %v2086_v7 = vadd.f32 %v2084_v3, %v5380_v14  ;;  %v4347_v8 = vpop.f32.mrb[31].mxu1 }
0x1e43   : > { %4674 = vtanh.f32 %v2086_v7  ;;  %v4050_v12 = vmul.f32 -1.442695, %v2086_v7 }
0x1e45   : > { %4676 = vpow2.f32 %v4050_v12 }
0x1e4d   : > { %v4675_v10 = vpop.eup %4674 }
0x1e4e   : > { %2099 = vrot.lane.b32.xlu0 %v4675_v10, %s4918_s27 }
0x1e4f   : > { %v4677_v13 = vpop.eup %4676 }
0x1e50   : > { %v2090_v15 = vadd.f32 1.0, %v4677_v13 }
0x1e52   : > { %4678 = vrcp.f32 %v2090_v15 }
0x1e5c   : > { %v4679_v16 = vpop.eup %4678 }
0x1e5d   : > { %v2097_v19 = vmul.f32 %v4679_v16, %v2095_v18 }
0x1ec0   : > { %v2100_v2 = vpop.permute.xlu0 %2099 }
0x1ec1   : > { %v2102_v17 = vmul.f32 %v4679_v16, %v2100_v2 }
0x1ec3   : > { %2104 = vrot.lane.b32.xlu1 %v2102_v17, %s4916_s28 }
0x1f35   : > { %v2105_v20 = vpop.permute.xlu1 %2104 }
0x1f36   : > { %v2107_v21 = vadd.f32 %v2105_v20, %v2097_v19 }
0x1f38   : > { %4680 = vtanh.f32 %v2107_v21  ;;  %v2175_v42 = vrot.slane %v2107_v21, 7 }
0x1f42   : > { %v4681_v22 = vpop.eup %4680 }
0x1f43   : > { %2110 = vrot.lane.b32.xlu0 %v4681_v22, %s4918_s27 }
0x1fb5   : > { %v2111_v23 = vpop.permute.xlu0 %2110 }
0x1fb6   : > { %v2113_v24 = vmul.f32 %v4679_v16, %v2111_v23 }
0x1fb8   : > { %v2114_v25 = vpack.c.bf16 %v2113_v24, %v2113_v24  ;;  %v3553_v49 = vsel %vm3543_vm13, %v5496_v55, %v2113_v24 }
0x1fba   : > { %v2116_v26 = vshrl.u32 %v2114_v25, 16 }
0x1fbc   : > { %2118 = vrot.lane.b32.xlu1 %v2116_v26, %s4916_s28 }
0x202e   : > { %v2119_v27 = vpop.permute.xlu1 %2118 }
0x202f   : > { %4353 = vmatmul.mubr.msk.bf16.vlgmr.msra.gmra.mrb[36].mxu0 %vm779_vm6, %v2119_v27 }
0x2030   : > { %4365 = vmatpush3.bf16.msra.mxu0 %v5334_v31  ;;  %4368 = vmatprep.mubr.msk.bf16.mxu0 %vm4921_vm2, %v4915_v4 }
0x2031   : > { %4366 = vmatprep.subr.bf16.mxu0 %v4915_v4 }
0x2034   : > { %4367 = vmatpush3.bf16.msra.mxu0 %v5344_v33 }
0x2035   : > { %4380 = vmatprep.subr.bf16.mxu0 %v4915_v4 }
0x2102   : > { %v2157_v28 = vpop.f32.mrb[36].mxu0 }
0x2103   : > { %v2164_v29 = vrot.slane %v2157_v28, 6  ;;  %v4354_v30 = vpop.f32.mrb[37].mxu0 }
0x2104   : > { %v2160_v11 = vpop.f32.mrb[38].mxu0 }
0x2105   : > { %v2166_v32 = vadd.f32 %v2164_v29, %v5380_v14  ;;  %v4355_v34 = vpop.f32.mrb[39].mxu0 }
0x2107   : > { %4682 = vtanh.f32 %v2166_v32  ;;  %v4052_v37 = vmul.f32 -1.442695, %v2166_v32 }
0x2109   : > { %4684 = vpow2.f32 %v4052_v37 }
0x2111   : > { %v4683_v35 = vpop.eup %4682 }
0x2112   : > { %2179 = vrot.lane.b32.xlu0 %v4683_v35, %s4918_s27 }
0x2113   : > { %v4685_v38 = vpop.eup %4684 }
0x2114   : > { %v2170_v0 = vadd.f32 1.0, %v4685_v38 }
0x2116   : > { %4686 = vrcp.f32 %v2170_v0 }
0x2120   : > { %v4687_v39 = vpop.eup %4686 }
0x2121   : > { %v2177_v43 = vmul.f32 %v4687_v39, %v2175_v42 }
0x2184   : > { %v2180_v40 = vpop.permute.xlu0 %2179 }
0x2185   : > { %v2182_v41 = vmul.f32 %v4687_v39, %v2180_v40 }
0x2187   : > { %2184 = vrot.lane.b32.xlu1 %v2182_v41, %s4916_s28 }
0x21f9   : > { %v2185_v44 = vpop.permute.xlu1 %2184 }
0x21fa   : > { %v2187_v45 = vadd.f32 %v2185_v44, %v2177_v43 }
0x21fc   : > { %4688 = vtanh.f32 %v2187_v45  ;;  %v2254_v12 = vrot.slane %v2187_v45, 7 }
0x2206   : > { %v4689_v46 = vpop.eup %4688 }
0x2207   : > { %2190 = vrot.lane.b32.xlu0 %v4689_v46, %s4918_s27 }
0x2279   : > { %v2191_v47 = vpop.permute.xlu0 %2190 }
0x227a   : > { %v2193_v48 = vmul.f32 %v4687_v39, %v2191_v47  ;;  %v5558_v47 = vld [vmem:[%s5877_s6] sm:$0xff]  }
0x227c   : > { %v2194_v50 = vpack.c.bf16 %v2193_v48, %v2193_v48  ;;  %v3554_v51 = vsel %vm3545_vm14, %v3553_v49, %v2193_v48  ;;  %v5567_v48 = vld [vmem:[%s5877_s6 + $0x8] sm:$0xff]  }
0x227e   : > { %v2196_v57 = vrot.slane %v2194_v50, 1 }
0x2280   : > { %2197 = vrot.lane.b32.xlu1 %v2196_v57, %s4916_s28 }
0x22f2   : > { %v2198_v58 = vpop.permute.xlu1 %2197 }
0x22f3   : > { %4361 = vmatmul.mubr.msk.bf16.vlgmr.msra.gmra.mrb[32].mxu1 %vm779_vm6, %v2198_v58 }
0x22f4   : > { %4373 = vmatpush3.bf16.msra.mxu1 %v5334_v31  ;;  %4376 = vmatprep.mubr.msk.bf16.mxu1 %vm4921_vm2, %v4915_v4 }
0x22f5   : > { %4374 = vmatprep.subr.bf16.mxu1 %v4915_v4 }
0x22f8   : > { %4375 = vmatpush3.bf16.msra.mxu1 %v5344_v33 }
0x22f9   : > { %4388 = vmatprep.subr.bf16.mxu1 %v4915_v4 }
0x23c6   : > { %v2236_v59 = vpop.f32.mrb[32].mxu1 }
0x23c7   : > { %v2243_v54 = vrot.slane %v2236_v59, 5  ;;  %v4362_v61 = vpop.f32.mrb[33].mxu1 }
0x23c8   : > { %v2239_v55 = vpop.f32.mrb[34].mxu1 }
0x23c9   : > { %v2245_v62 = vadd.f32 %v2243_v54, %v5380_v14  ;;  %v4363_v63 = vpop.f32.mrb[35].mxu1 }
0x23cb   : > { %4690 = vtanh.f32 %v2245_v62  ;;  %v4054_v3 = vmul.f32 -1.442695, %v2245_v62 }
0x23cd   : > { %4692 = vpow2.f32 %v4054_v3 }
0x23d5   : > { %v4691_v1 = vpop.eup %4690 }
0x23d6   : > { %2258 = vrot.lane.b32.xlu0 %v4691_v1, %s4918_s27 }
0x23d7   : > { %v4693_v5 = vpop.eup %4692 }
0x23d8   : > { %v2249_v6 = vadd.f32 1.0, %v4693_v5 }
0x23da   : > { %4694 = vrcp.f32 %v2249_v6 }
0x23e4   : > { %v4695_v7 = vpop.eup %4694 }
0x23e5   : > { %v2256_v13 = vmul.f32 %v4695_v7, %v2254_v12 }
0x2448   : > { %v2259_v8 = vpop.permute.xlu0 %2258 }
0x2449   : > { %v2261_v10 = vmul.f32 %v4695_v7, %v2259_v8 }
0x244b   : > { %2263 = vrot.lane.b32.xlu1 %v2261_v10, %s4916_s28 }
0x24bd   : > { %v2264_v15 = vpop.permute.xlu1 %2263 }
0x24be   : > { %v2266_v16 = vadd.f32 %v2264_v15, %v2256_v13 }
0x24c0   : > { %4696 = vtanh.f32 %v2266_v16  ;;  %v2335_v37 = vrot.slane %v2266_v16, 7 }
0x24ca   : > { %v4697_v2 = vpop.eup %4696 }
0x24cb   : > { %2269 = vrot.lane.b32.xlu0 %v4697_v2, %s4918_s27 }
0x253d   : > { %v2270_v17 = vpop.permute.xlu0 %2269 }
0x253e   : > { %v2272_v18 = vmul.f32 %v4695_v7, %v2270_v17 }
0x2540   : > { %v2273_v19 = vpack.c.bf16 %v2272_v18, %v2272_v18  ;;  %v3555_v20 = vsel %vm3547_vm4, %v3554_v51, %v2272_v18 }
0x2542   : > { %v2275_v21 = vshrl.u32 %v2273_v19, 16 }
0x2544   : > { %v2277_v22 = vrot.slane %v2275_v21, 1 }
0x2546   : > { %2278 = vrot.lane.b32.xlu1 %v2277_v22, %s4916_s28 }
0x25b8   : > { %v2279_v23 = vpop.permute.xlu1 %2278 }
0x25b9   : > { %4369 = vmatmul.mubr.msk.bf16.vlgmr.msra.gmra.mrb[40].mxu0 %vm779_vm6, %v2279_v23 }
0x25ba   : > { %4381 = vmatpush3.bf16.msra.mxu0 %v5334_v31  ;;  %4384 = vmatprep.mubr.msk.bf16.mxu0 %vm4921_vm2, %v4915_v4 }
0x25bb   : > { %4382 = vmatprep.subr.bf16.mxu0 %v4915_v4 }
0x25be   : > { %4383 = vmatpush3.bf16.msra.mxu0 %v5344_v33 }
0x25bf   : > { %4396 = vmatprep.subr.bf16.mxu0 %v4915_v4 }
0x268c   : > { %v2317_v24 = vpop.f32.mrb[40].mxu0 }
0x268d   : > { %v2324_v25 = vrot.slane %v2317_v24, 4  ;;  %v4370_v26 = vpop.f32.mrb[41].mxu0 }
0x268e   : > { %v2320_v27 = vpop.f32.mrb[42].mxu0 }
0x268f   : > { %v2326_v28 = vadd.f32 %v2324_v25, %v5380_v14  ;;  %v4371_v29 = vpop.f32.mrb[43].mxu0 }
0x2691   : > { %4698 = vtanh.f32 %v2326_v28  ;;  %v4056_v31 = vmul.f32 -1.442695, %v2326_v28 }
0x2693   : > { %4700 = vpow2.f32 %v4056_v31 }
0x269b   : > { %v4699_v30 = vpop.eup %4698 }
0x269c   : > { %2339 = vrot.lane.b32.xlu0 %v4699_v30, %s4918_s27 }
0x269d   : > { %v4701_v11 = vpop.eup %4700 }
0x269e   : > { %v2330_v32 = vadd.f32 1.0, %v4701_v11 }
0x26a0   : > { %4702 = vrcp.f32 %v2330_v32 }
0x26aa   : > { %v4703_v34 = vpop.eup %4702 }
0x26ab   : > { %v2337_v38 = vmul.f32 %v4703_v34, %v2335_v37 }
0x270e   : > { %v2340_v33 = vpop.permute.xlu0 %2339 }
0x270f   : > { %v2342_v35 = vmul.f32 %v4703_v34, %v2340_v33 }
0x2711   : > { %2344 = vrot.lane.b32.xlu1 %v2342_v35, %s4916_s28 }
0x2783   : > { %v2345_v0 = vpop.permute.xlu1 %2344 }
0x2784   : > { %v2347_v39 = vadd.f32 %v2345_v0, %v2337_v38 }
0x2786   : > { %4704 = vtanh.f32 %v2347_v39  ;;  %v2414_v5 = vrot.slane %v2347_v39, 7 }
0x2790   : > { %v4705_v40 = vpop.eup %4704 }
0x2791   : > { %2350 = vrot.lane.b32.xlu0 %v4705_v40, %s4918_s27 }
0x2803   : > { %v2351_v41 = vpop.permute.xlu0 %2350 }
0x2804   : > { %v2353_v42 = vmul.f32 %v4703_v34, %v2351_v41 }
0x2806   : > { %v2354_v43 = vpack.c.bf16 %v2353_v42, %v2353_v42  ;;  %v3556_v44 = vsel %vm870_vm7, %v3555_v20, %v2353_v42 }
0x2808   : > { %v2356_v45 = vrot.slane %v2354_v43, 2 }
0x280a   : > { %2357 = vrot.lane.b32.xlu1 %v2356_v45, %s4916_s28 }
0x287c   : > { %v2358_v46 = vpop.permute.xlu1 %2357 }
0x287d   : > { %4377 = vmatmul.mubr.msk.bf16.vlgmr.msra.gmra.mrb[36].mxu1 %vm779_vm6, %v2358_v46 }
0x287e   : > { %4389 = vmatpush3.bf16.msra.mxu1 %v5558_v47  ;;  %4392 = vmatprep.mubr.msk.bf16.mxu1 %vm4921_vm2, %v4915_v4 }
0x287f   : > { %4390 = vmatprep.subr.bf16.mxu1 %v4915_v4 }
0x2882   : > { %4391 = vmatpush3.bf16.msra.mxu1 %v5567_v48 }
0x2883   : > { %4404 = vmatprep.subr.bf16.mxu1 %v4915_v4 }
0x2950   : > { %v2396_v49 = vpop.f32.mrb[36].mxu1 }
0x2951   : > { %v2403_v50 = vrot.slane %v2396_v49, 3  ;;  %v4378_v51 = vpop.f32.mrb[37].mxu1 }
0x2952   : > { %v2399_v57 = vpop.f32.mrb[38].mxu1 }
0x2953   : > { %v2405_v58 = vadd.f32 %v2403_v50, %v5380_v14  ;;  %v4379_v59 = vpop.f32.mrb[39].mxu1 }
0x2955   : > { %4706 = vtanh.f32 %v2405_v58  ;;  %v4058_v61 = vmul.f32 -1.442695, %v2405_v58 }
0x2957   : > { %4708 = vpow2.f32 %v4058_v61 }
0x295f   : > { %v4707_v54 = vpop.eup %4706 }
0x2960   : > { %2418 = vrot.lane.b32.xlu0 %v4707_v54, %s4918_s27 }
0x2961   : > { %v4709_v55 = vpop.eup %4708 }
0x2962   : > { %v2409_v62 = vadd.f32 1.0, %v4709_v55 }
0x2964   : > { %4710 = vrcp.f32 %v2409_v62 }
0x296e   : > { %v4711_v63 = vpop.eup %4710 }
0x296f   : > { %v2416_v6 = vmul.f32 %v4711_v63, %v2414_v5 }
0x29d2   : > { %v2419_v1 = vpop.permute.xlu0 %2418 }
0x29d3   : > { %v2421_v3 = vmul.f32 %v4711_v63, %v2419_v1 }
0x29d5   : > { %2423 = vrot.lane.b32.xlu1 %v2421_v3, %s4916_s28 }
0x2a47   : > { %v2424_v7 = vpop.permute.xlu1 %2423 }
0x2a48   : > { %v2426_v8 = vadd.f32 %v2424_v7, %v2416_v6 }
0x2a4a   : > { %4712 = vtanh.f32 %v2426_v8  ;;  %v2495_v11 = vrot.slane %v2426_v8, 7 }
0x2a54   : > { %v4713_v10 = vpop.eup %4712 }
0x2a55   : > { %2429 = vrot.lane.b32.xlu0 %v4713_v10, %s4918_s27 }
0x2ac7   : > { %v2430_v12 = vpop.permute.xlu0 %2429 }
0x2ac8   : > { %v2432_v13 = vmul.f32 %v4711_v63, %v2430_v12 }
0x2aca   : > { %v2433_v15 = vpack.c.bf16 %v2432_v13, %v2432_v13  ;;  %v3557_v16 = vsel %vm842_vm11, %v3556_v44, %v2432_v13 }
0x2acc   : > { %v2435_v2 = vshrl.u32 %v2433_v15, 16 }
0x2ace   : > { %v2437_v17 = vrot.slane %v2435_v2, 2 }
0x2ad0   : > { %2438 = vrot.lane.b32.xlu1 %v2437_v17, %s4916_s28 }
0x2b42   : > { %v2439_v18 = vpop.permute.xlu1 %2438 }
0x2b43   : > { %4385 = vmatmul.mubr.msk.bf16.vlgmr.msra.gmra.mrb[44].mxu0 %vm779_vm6, %v2439_v18 }
0x2b44   : > { %4397 = vmatpush3.bf16.msra.mxu0 %v5558_v47  ;;  %4400 = vmatprep.mubr.msk.bf16.mxu0 %vm4921_vm2, %v4915_v4 }
0x2b45   : > { %4398 = vmatprep.subr.bf16.mxu0 %v4915_v4 }
0x2b48   : > { %4399 = vmatpush3.bf16.msra.mxu0 %v5567_v48 }
0x2b49   : > { %4412 = vmatprep.subr.bf16.mxu0 %v4915_v4 }
0x2c16   : > { %v2477_v19 = vpop.f32.mrb[44].mxu0 }
0x2c17   : > { %v2484_v20 = vrot.slane %v2477_v19, 2  ;;  %v4386_v21 = vpop.f32.mrb[45].mxu0 }
0x2c18   : > { %v2480_v22 = vpop.f32.mrb[46].mxu0 }
0x2c19   : > { %v2486_v23 = vadd.f32 %v2484_v20, %v5380_v14  ;;  %v4387_v24 = vpop.f32.mrb[47].mxu0 }
0x2c1b   : > { %4714 = vtanh.f32 %v2486_v23  ;;  %v4060_v26 = vmul.f32 -1.442695, %v2486_v23 }
0x2c1d   : > { %4716 = vpow2.f32 %v4060_v26 }
0x2c25   : > { %v4715_v25 = vpop.eup %4714 }
0x2c26   : > { %2499 = vrot.lane.b32.xlu0 %v4715_v25, %s4918_s27 }
0x2c27   : > { %v4717_v27 = vpop.eup %4716 }
0x2c28   : > { %v2490_v28 = vadd.f32 1.0, %v4717_v27 }
0x2c2a   : > { %4718 = vrcp.f32 %v2490_v28 }
0x2c34   : > { %v4719_v29 = vpop.eup %4718 }
0x2c35   : > { %v2497_v32 = vmul.f32 %v4719_v29, %v2495_v11 }
0x2c98   : > { %v2500_v30 = vpop.permute.xlu0 %2499 }
0x2c99   : > { %v2502_v31 = vmul.f32 %v4719_v29, %v2500_v30 }
0x2c9b   : > { %2504 = vrot.lane.b32.xlu1 %v2502_v31, %s4916_s28 }
0x2d0d   : > { %v2505_v34 = vpop.permute.xlu1 %2504 }
0x2d0e   : > { %v2507_v33 = vadd.f32 %v2505_v34, %v2497_v32 }
0x2d10   : > { %4720 = vtanh.f32 %v2507_v33  ;;  %v2574_v55 = vrot.slane %v2507_v33, 7 }
0x2d1a   : > { %v4721_v35 = vpop.eup %4720 }
0x2d1b   : > { %2510 = vrot.lane.b32.xlu0 %v4721_v35, %s4918_s27 }
0x2d8d   : > { %v2511_v37 = vpop.permute.xlu0 %2510 }
0x2d8e   : > { %v2513_v38 = vmul.f32 %v4719_v29, %v2511_v37 }
0x2d90   : > { %v2514_v0 = vpack.c.bf16 %v2513_v38, %v2513_v38  ;;  %v3558_v39 = vsel %vm815_vm10, %v3557_v16, %v2513_v38 }
0x2d92   : > { %v2516_v40 = vrot.slane %v2514_v0, 3 }
0x2d94   : > { %2517 = vrot.lane.b32.xlu1 %v2516_v40, %s4916_s28 }
0x2e06   : > { %v2518_v41 = vpop.permute.xlu1 %2517 }
0x2e07   : > { %4393 = vmatmul.mubr.msk.bf16.vlgmr.msra.gmra.mrb[40].mxu1 %vm779_vm6, %v2518_v41 }
0x2e08   : > { %4405 = vmatpush3.bf16.msra.mxu1 %v5558_v47  ;;  %4408 = vmatprep.mubr.msk.bf16.mxu1 %vm4921_vm2, %v4915_v4 }
0x2e09   : > { %4406 = vmatprep.subr.bf16.mxu1 %v4915_v4 }
0x2e0c   : > { %4407 = vmatpush3.bf16.msra.mxu1 %v5567_v48 }
0x2e0d   : > { %4420 = vmatprep.subr.bf16.mxu1 %v4915_v4 }
0x2eda   : > { %v2556_v42 = vpop.f32.mrb[40].mxu1 }
0x2edb   : > { %v2563_v43 = vrot.slane %v2556_v42, 1  ;;  %v4394_v44 = vpop.f32.mrb[41].mxu1 }
0x2edc   : > { %v2559_v45 = vpop.f32.mrb[42].mxu1 }
0x2edd   : > { %v2565_v46 = vadd.f32 %v2563_v43, %v5380_v14  ;;  %v4395_v49 = vpop.f32.mrb[43].mxu1 }
0x2edf   : > { %4722 = vtanh.f32 %v2565_v46  ;;  %v4062_v51 = vmul.f32 -1.442695, %v2565_v46 }
0x2ee1   : > { %4724 = vpow2.f32 %v4062_v51 }
0x2ee9   : > { %v4723_v50 = vpop.eup %4722 }
0x2eea   : > { %2578 = vrot.lane.b32.xlu0 %v4723_v50, %s4918_s27 }
0x2eeb   : > { %v4725_v57 = vpop.eup %4724 }
0x2eec   : > { %v2569_v58 = vadd.f32 1.0, %v4725_v57 }
0x2eee   : > { %4726 = vrcp.f32 %v2569_v58 }
0x2ef8   : > { %v4727_v59 = vpop.eup %4726 }
0x2ef9   : > { %v2576_v62 = vmul.f32 %v4727_v59, %v2574_v55 }
0x2f5c   : > { %v2579_v54 = vpop.permute.xlu0 %2578 }
0x2f5d   : > { %v2581_v61 = vmul.f32 %v4727_v59, %v2579_v54 }
0x2f5f   : > { %2583 = vrot.lane.b32.xlu1 %v2581_v61, %s4916_s28 }
0x2fd1   : > { %v2584_v63 = vpop.permute.xlu1 %2583 }
0x2fd2   : > { %v2586_v1 = vadd.f32 %v2584_v63, %v2576_v62 }
0x2fd4   : > { %4728 = vtanh.f32 %v2586_v1  ;;  %v2652_v25 = vrot.slane %v2586_v1, 7 }
0x2fde   : > { %v4729_v14 = vpop.eup %4728 }
0x2fdf   : > { %2589 = vrot.lane.b32.xlu0 %v4729_v14, %s4918_s27 }
0x3051   : > { %v2590_v3 = vpop.permute.xlu0 %2589 }
0x3052   : > { %v2592_v5 = vmul.f32 %v4727_v59, %v2590_v3 }
0x3054   : > { %v2593_v6 = vpack.c.bf16 %v2592_v5, %v2592_v5  ;;  %v5602_v7 = vsel %vm789_vm9, %v3558_v39, %v2592_v5 }
0x3056   : > { %v2595_v8 = vshrl.u32 %v2593_v6, 16 }
0x3058   : > { %v2597_v10 = vrot.slane %v2595_v8, 3 }
0x305a   : > { %2598 = vrot.lane.b32.xlu1 %v2597_v10, %s4916_s28 }
0x30cc   : > { %v2599_v12 = vpop.permute.xlu1 %2598 }
0x30cd   : > { %4401 = vmatmul.mubr.msk.bf16.vlgmr.msra.gmra.mrb[48].mxu0 %vm779_vm6, %v2599_v12 }
0x30ce   : > { %4413 = vmatpush3.bf16.msra.mxu0 %v5558_v47  ;;  %4416 = vmatprep.mubr.msk.bf16.mxu0 %vm4921_vm2, %v4915_v4 }
0x30cf   : > { %4414 = vmatprep.subr.bf16.mxu0 %v4915_v4 }
0x30d2   : > { %4415 = vmatpush3.bf16.msra.mxu0 %v5567_v48 }
0x30d3   : > { %4428 = vmatprep.subr.bf16.mxu0 %v4915_v4 }
0x31a0   : > { %v2637_v13 = vpop.f32.mrb[48].mxu0 }
0x31a1   : > { %v2643_v15 = vadd.f32 %v2637_v13, %v5374_v9  ;;  %v4402_v16 = vpop.f32.mrb[49].mxu0 }
0x31a2   : > { %v2640_v2 = vpop.f32.mrb[50].mxu0 }
0x31a3   : > { %4730 = vtanh.f32 %v2643_v15  ;;  %v4403_v17 = vpop.f32.mrb[51].mxu0  ;;  %v4064_v19 = vmul.f32 -1.442695, %v2643_v15 }
0x31a5   : > { %4732 = vpow2.f32 %v4064_v19 }
0x31ad   : > { %v4731_v18 = vpop.eup %4730 }
0x31ae   : > { %2656 = vrot.lane.b32.xlu0 %v4731_v18, %s4918_s27 }
0x31af   : > { %v4733_v20 = vpop.eup %4732 }
0x31b0   : > { %v2647_v21 = vadd.f32 1.0, %v4733_v20 }
0x31b2   : > { %4734 = vrcp.f32 %v2647_v21 }
0x31bc   : > { %v4735_v22 = vpop.eup %4734 }
0x31bd   : > { %v2654_v26 = vmul.f32 %v4735_v22, %v2652_v25 }
0x3220   : > { %v2657_v23 = vpop.permute.xlu0 %2656 }
0x3221   : > { %v2659_v24 = vmul.f32 %v4735_v22, %v2657_v23 }
0x3223   : > { %2661 = vrot.lane.b32.xlu1 %v2659_v24, %s4916_s28 }
0x3295   : > { %v2662_v27 = vpop.permute.xlu1 %2661 }
0x3296   : > { %v2664_v28 = vadd.f32 %v2662_v27, %v2654_v26 }
0x3298   : > { %4736 = vtanh.f32 %v2664_v28  ;;  %v2730_v46 = vrot.slane %v2664_v28, 7 }
0x32a2   : > { %v4737_v29 = vpop.eup %4736 }
0x32a3   : > { %2667 = vrot.lane.b32.xlu0 %v4737_v29, %s4918_s27 }
0x3315   : > { %v2668_v30 = vpop.permute.xlu0 %2667 }
0x3316   : > { %v5616_v31 = vmul.f32 %v4735_v22, %v2668_v30 }
0x3318   : > { %v2671_v11 = vpack.c.bf16 %v5616_v31, %v5616_v31 }
0x331a   : > { %2673 = vrot.lane.b32.xlu1 %v2671_v11, %s4916_s28 }
0x338c   : > { %v2674_v32 = vpop.permute.xlu1 %2673 }
0x338d   : > { %4409 = vmatmul.mubr.msk.bf16.vlgmr.msra.gmra.mrb[44].mxu1 %vm779_vm6, %v2674_v32 }
0x338e   : > { %4421 = vmatpush3.bf16.msra.mxu1 %v5558_v47  ;;  %4424 = vmatprep.mubr.msk.bf16.mxu1 %vm4921_vm2, %v4915_v4 }
0x338f   : > { %4422 = vmatprep.subr.bf16.mxu1 %v4915_v4 }
0x3392   : > { %4423 = vmatpush3.bf16.msra.mxu1 %v5567_v48 }
0x3393   : > { %4436 = vmatprep.subr.bf16.mxu1 %v4915_v4 }
0x3460   : > { %v2712_v34 = vpop.f32.mrb[44].mxu1 }
0x3461   : > { %v2719_v33 = vrot.slane %v2712_v34, 7  ;;  %v4410_v35 = vpop.f32.mrb[45].mxu1 }
0x3462   : > { %v2715_v37 = vpop.f32.mrb[46].mxu1 }
0x3463   : > { %v2721_v38 = vadd.f32 %v2719_v33, %v5374_v9  ;;  %v4411_v0 = vpop.f32.mrb[47].mxu1 }
0x3465   : > { %4738 = vtanh.f32 %v2721_v38  ;;  %v4066_v40 = vmul.f32 -1.442695, %v2721_v38 }
0x3467   : > { %4740 = vpow2.f32 %v4066_v40 }
0x346f   : > { %v4739_v39 = vpop.eup %4738 }
0x3470   : > { %2734 = vrot.lane.b32.xlu0 %v4739_v39, %s4918_s27 }
0x3471   : > { %v4741_v41 = vpop.eup %4740 }
0x3472   : > { %v2725_v42 = vadd.f32 1.0, %v4741_v41 }
0x3474   : > { %4742 = vrcp.f32 %v2725_v42 }
0x347e   : > { %v4743_v43 = vpop.eup %4742 }
0x347f   : > { %v2732_v49 = vmul.f32 %v4743_v43, %v2730_v46 }
0x34e2   : > { %v2735_v44 = vpop.permute.xlu0 %2734 }
0x34e3   : > { %v2737_v45 = vmul.f32 %v4743_v43, %v2735_v44 }
0x34e5   : > { %2739 = vrot.lane.b32.xlu1 %v2737_v45, %s4916_s28 }
0x3557   : > { %v2740_v50 = vpop.permute.xlu1 %2739 }
0x3558   : > { %v2742_v51 = vadd.f32 %v2740_v50, %v2732_v49 }
0x355a   : > { %4744 = vtanh.f32 %v2742_v51  ;;  %v2810_v2 = vrot.slane %v2742_v51, 7 }
0x3564   : > { %v4745_v57 = vpop.eup %4744 }
0x3565   : > { %2745 = vrot.lane.b32.xlu0 %v4745_v57, %s4918_s27 }
0x35d7   : > { %v2746_v58 = vpop.permute.xlu0 %2745 }
0x35d8   : > { %v2748_v59 = vmul.f32 %v4743_v43, %v2746_v58 }
0x35da   : > { %v2749_v54 = vpack.c.bf16 %v2748_v59, %v2748_v59  ;;  %v3560_v23 = vsel %vm3543_vm13, %v5616_v31, %v2748_v59 }
0x35dc   : > { %v2751_v61 = vshrl.u32 %v2749_v54, 16 }
0x35de   : > { %2753 = vrot.lane.b32.xlu1 %v2751_v61, %s4916_s28 }
0x3650   : > { %v2754_v55 = vpop.permute.xlu1 %2753 }
0x3651   : > { %4417 = vmatmul.mubr.msk.bf16.vlgmr.msra.gmra.mrb[52].mxu0 %vm779_vm6, %v2754_v55 }
0x3652   : > { %4429 = vmatpush3.bf16.msra.mxu0 %v5558_v47  ;;  %4432 = vmatprep.mubr.msk.bf16.mxu0 %vm4921_vm2, %v4915_v4 }
0x3653   : > { %4430 = vmatprep.subr.bf16.mxu0 %v4915_v4 }
0x3656   : > { %4431 = vmatpush3.bf16.msra.mxu0 %v5567_v48 }
0x3657   : > { %4444 = vmatprep.subr.bf16.mxu0 %v4915_v4 }
0x3724   : > { %v2792_v62 = vpop.f32.mrb[52].mxu0 }
0x3725   : > { %v2799_v63 = vrot.slane %v2792_v62, 6  ;;  %v4418_v1 = vpop.f32.mrb[53].mxu0 }
0x3726   : > { %v2795_v14 = vpop.f32.mrb[54].mxu0 }
0x3727   : > { %v2801_v3 = vadd.f32 %v2799_v63, %v5374_v9  ;;  %v4419_v5 = vpop.f32.mrb[55].mxu0 }
0x3729   : > { %4746 = vtanh.f32 %v2801_v3  ;;  %v4068_v8 = vmul.f32 -1.442695, %v2801_v3 }
0x372b   : > { %4748 = vpow2.f32 %v4068_v8 }
0x3733   : > { %v4747_v6 = vpop.eup %4746 }
0x3734   : > { %2814 = vrot.lane.b32.xlu0 %v4747_v6, %s4918_s27 }
0x3735   : > { %v4749_v10 = vpop.eup %4748 }
0x3736   : > { %v2805_v12 = vadd.f32 1.0, %v4749_v10 }
0x3738   : > { %4750 = vrcp.f32 %v2805_v12 }
0x3742   : > { %v4751_v13 = vpop.eup %4750 }
0x3743   : > { %v2812_v17 = vmul.f32 %v4751_v13, %v2810_v2 }
0x37a6   : > { %v2815_v15 = vpop.permute.xlu0 %2814 }
0x37a7   : > { %v2817_v16 = vmul.f32 %v4751_v13, %v2815_v15 }
0x37a9   : > { %2819 = vrot.lane.b32.xlu1 %v2817_v16, %s4916_s28 }
0x381b   : > { %v2820_v18 = vpop.permute.xlu1 %2819 }
0x381c   : > { %v2822_v19 = vadd.f32 %v2820_v18, %v2812_v17 }
0x381e   : > { %4752 = vtanh.f32 %v2822_v19  ;;  %v2889_v40 = vrot.slane %v2822_v19, 7 }
0x3828   : > { %v4753_v20 = vpop.eup %4752 }
0x3829   : > { %2825 = vrot.lane.b32.xlu0 %v4753_v20, %s4918_s27 }
0x389b   : > { %v2826_v21 = vpop.permute.xlu0 %2825 }
0x389c   : > { %v2828_v22 = vmul.f32 %v4751_v13, %v2826_v21 }
0x389e   : > { %v2829_v24 = vpack.c.bf16 %v2828_v22, %v2828_v22  ;;  %v3561_v25 = vsel %vm3545_vm14, %v3560_v23, %v2828_v22 }
0x38a0   : > { %v2831_v26 = vrot.slane %v2829_v24, 1 }
0x38a2   : > { %2832 = vrot.lane.b32.xlu1 %v2831_v26, %s4916_s28 }
0x3914   : > { %v2833_v27 = vpop.permute.xlu1 %2832 }
0x3915   : > { %4425 = vmatmul.mubr.msk.bf16.vlgmr.msra.gmra.mrb[48].mxu1 %vm779_vm6, %v2833_v27 }
0x3916   : > { %4437 = vmatpush3.bf16.msra.mxu1 %v5558_v47  ;;  %4440 = vmatprep.mubr.msk.bf16.mxu1 %vm4921_vm2, %v4915_v4 }
0x3917   : > { %4438 = vmatprep.subr.bf16.mxu1 %v4915_v4 }
0x391a   : > { %4439 = vmatpush3.bf16.msra.mxu1 %v5567_v48 }
0x391b   : > { %4452 = vmatprep.subr.bf16.mxu1 %v4915_v4 }
0x39e8   : > { %v2871_v28 = vpop.f32.mrb[48].mxu1 }
0x39e9   : > { %v2878_v29 = vrot.slane %v2871_v28, 5  ;;  %v4426_v30 = vpop.f32.mrb[49].mxu1 }
0x39ea   : > { %v2874_v31 = vpop.f32.mrb[50].mxu1 }
0x39eb   : > { %v2880_v11 = vadd.f32 %v2878_v29, %v5374_v9  ;;  %v4427_v32 = vpop.f32.mrb[51].mxu1 }
0x39ed   : > { %4754 = vtanh.f32 %v2880_v11  ;;  %v4070_v33 = vmul.f32 -1.442695, %v2880_v11 }
0x39ef   : > { %4756 = vpow2.f32 %v4070_v33 }
0x39f7   : > { %v4755_v34 = vpop.eup %4754 }
0x39f8   : > { %2893 = vrot.lane.b32.xlu0 %v4755_v34, %s4918_s27 }
0x39f9   : > { %v4757_v35 = vpop.eup %4756 }
0x39fa   : > { %v2884_v37 = vadd.f32 1.0, %v4757_v35 }
0x39fc   : > { %4758 = vrcp.f32 %v2884_v37 }
0x3a06   : > { %v4759_v38 = vpop.eup %4758 }
0x3a07   : > { %v2891_v41 = vmul.f32 %v4759_v38, %v2889_v40 }
0x3a6a   : > { %v2894_v0 = vpop.permute.xlu0 %2893 }
0x3a6b   : > { %v2896_v39 = vmul.f32 %v4759_v38, %v2894_v0 }
0x3a6d   : > { %2898 = vrot.lane.b32.xlu1 %v2896_v39, %s4916_s28 }
0x3adf   : > { %v2899_v42 = vpop.permute.xlu1 %2898 }
0x3ae0   : > { %v2901_v43 = vadd.f32 %v2899_v42, %v2891_v41 }
0x3ae2   : > { %4760 = vtanh.f32 %v2901_v43  ;;  %v2970_v12 = vrot.slane %v2901_v43, 7 }
0x3aec   : > { %v4761_v44 = vpop.eup %4760 }
0x3aed   : > { %2904 = vrot.lane.b32.xlu0 %v4761_v44, %s4918_s27 }
0x3b5f   : > { %v2905_v45 = vpop.permute.xlu0 %2904 }
0x3b60   : > { %v2907_v46 = vmul.f32 %v4759_v38, %v2905_v45 }
0x3b62   : > { %v2908_v49 = vpack.c.bf16 %v2907_v46, %v2907_v46  ;;  %v3562_v50 = vsel %vm3547_vm4, %v3561_v25, %v2907_v46 }
0x3b64   : > { %v2910_v51 = vshrl.u32 %v2908_v49, 16 }
0x3b66   : > { %v2912_v57 = vrot.slane %v2910_v51, 1 }
0x3b68   : > { %2913 = vrot.lane.b32.xlu1 %v2912_v57, %s4916_s28 }
0x3bda   : > { %v2914_v58 = vpop.permute.xlu1 %2913 }
0x3bdb   : > { %4433 = vmatmul.mubr.msk.bf16.vlgmr.msra.gmra.mrb[56].mxu0 %vm779_vm6, %v2914_v58 }
0x3bdc   : > { %4445 = vmatpush3.bf16.msra.mxu0 %v5558_v47  ;;  %4448 = vmatprep.mubr.msk.bf16.mxu0 %vm4921_vm2, %v4915_v4 }
0x3bdd   : > { %4446 = vmatprep.subr.bf16.mxu0 %v4915_v4 }
0x3be0   : > { %4447 = vmatpush3.bf16.msra.mxu0 %v5567_v48 }
0x3be1   : > { %4460 = vmatprep.subr.bf16.mxu0 %v4915_v4 }
0x3cae   : > { %v2952_v59 = vpop.f32.mrb[56].mxu0 }
0x3caf   : > { %v2959_v54 = vrot.slane %v2952_v59, 4  ;;  %v4434_v61 = vpop.f32.mrb[57].mxu0 }
0x3cb0   : > { %v2955_v55 = vpop.f32.mrb[58].mxu0 }
0x3cb1   : > { %v2961_v62 = vadd.f32 %v2959_v54, %v5374_v9  ;;  %v4435_v63 = vpop.f32.mrb[59].mxu0 }
0x3cb3   : > { %4762 = vtanh.f32 %v2961_v62  ;;  %v4072_v14 = vmul.f32 -1.442695, %v2961_v62 }
0x3cb5   : > { %4764 = vpow2.f32 %v4072_v14 }
0x3cbd   : > { %v4763_v1 = vpop.eup %4762 }
0x3cbe   : > { %2974 = vrot.lane.b32.xlu0 %v4763_v1, %s4918_s27 }
0x3cbf   : > { %v4765_v3 = vpop.eup %4764 }
0x3cc0   : > { %v2965_v5 = vadd.f32 1.0, %v4765_v3 }
0x3cc2   : > { %4766 = vrcp.f32 %v2965_v5 }
0x3ccc   : > { %v4767_v6 = vpop.eup %4766 }
0x3ccd   : > { %v2972_v13 = vmul.f32 %v4767_v6, %v2970_v12 }
0x3d30   : > { %v2975_v8 = vpop.permute.xlu0 %2974 }
0x3d31   : > { %v2977_v10 = vmul.f32 %v4767_v6, %v2975_v8 }
0x3d33   : > { %2979 = vrot.lane.b32.xlu1 %v2977_v10, %s4916_s28 }
0x3da5   : > { %v2980_v15 = vpop.permute.xlu1 %2979 }
0x3da6   : > { %v2982_v16 = vadd.f32 %v2980_v15, %v2972_v13 }
0x3da8   : > { %4768 = vtanh.f32 %v2982_v16  ;;  %v3049_v35 = vrot.slane %v2982_v16, 7 }
0x3db2   : > { %v4769_v2 = vpop.eup %4768 }
0x3db3   : > { %2985 = vrot.lane.b32.xlu0 %v4769_v2, %s4918_s27 }
0x3e25   : > { %v2986_v17 = vpop.permute.xlu0 %2985 }
0x3e26   : > { %v2988_v18 = vmul.f32 %v4767_v6, %v2986_v17 }
0x3e28   : > { %v2989_v19 = vpack.c.bf16 %v2988_v18, %v2988_v18  ;;  %v3563_v20 = vsel %vm870_vm7, %v3562_v50, %v2988_v18 }
0x3e2a   : > { %v2991_v21 = vrot.slane %v2989_v19, 2 }
0x3e2c   : > { %2992 = vrot.lane.b32.xlu1 %v2991_v21, %s4916_s28 }
0x3e9e   : > { %v2993_v22 = vpop.permute.xlu1 %2992 }
0x3e9f   : > { %4441 = vmatmul.mubr.msk.bf16.vlgmr.msra.gmra.mrb[52].mxu1 %vm779_vm6, %v2993_v22 }
0x3ea0   : > { %4453 = vmatpush3.bf16.msra.mxu1 %v5558_v47  ;;  %4456 = vmatprep.mubr.msk.bf16.mxu1 %vm4921_vm2, %v4915_v4 }
0x3ea1   : > { %4454 = vmatprep.subr.bf16.mxu1 %v4915_v4 }
0x3ea4   : > { %4455 = vmatpush3.bf16.msra.mxu1 %v5567_v48 }
0x3ea5   : > { %4468 = vmatprep.subr.bf16.mxu1 %v4915_v4 }
0x3f72   : > { %v3031_v23 = vpop.f32.mrb[52].mxu1 }
0x3f73   : > { %v3038_v24 = vrot.slane %v3031_v23, 3  ;;  %v4442_v25 = vpop.f32.mrb[53].mxu1 }
0x3f74   : > { %v3034_v26 = vpop.f32.mrb[54].mxu1 }
0x3f75   : > { %v3040_v27 = vadd.f32 %v3038_v24, %v5374_v9  ;;  %v4443_v28 = vpop.f32.mrb[55].mxu1 }
0x3f77   : > { %4770 = vtanh.f32 %v3040_v27  ;;  %v4074_v30 = vmul.f32 -1.442695, %v3040_v27 }
0x3f79   : > { %4772 = vpow2.f32 %v4074_v30 }
0x3f81   : > { %v4771_v29 = vpop.eup %4770 }
0x3f82   : > { %3053 = vrot.lane.b32.xlu0 %v4771_v29, %s4918_s27 }
0x3f83   : > { %v4773_v31 = vpop.eup %4772 }
0x3f84   : > { %v3044_v11 = vadd.f32 1.0, %v4773_v31 }
0x3f86   : > { %4774 = vrcp.f32 %v3044_v11 }
0x3f90   : > { %v4775_v32 = vpop.eup %4774 }
0x3f91   : > { %v3051_v37 = vmul.f32 %v4775_v32, %v3049_v35 }
0x3ff4   : > { %v3054_v34 = vpop.permute.xlu0 %3053 }
0x3ff5   : > { %v3056_v33 = vmul.f32 %v4775_v32, %v3054_v34 }
0x3ff7   : > { %3058 = vrot.lane.b32.xlu1 %v3056_v33, %s4916_s28 }
0x4069   : > { %v3059_v38 = vpop.permute.xlu1 %3058 }
0x406a   : > { %v3061_v0 = vadd.f32 %v3059_v38, %v3051_v37 }
0x406c   : > { %4776 = vtanh.f32 %v3061_v0  ;;  %v3130_v3 = vrot.slane %v3061_v0, 7 }
0x4076   : > { %v4777_v39 = vpop.eup %4776 }
0x4077   : > { %3064 = vrot.lane.b32.xlu0 %v4777_v39, %s4918_s27 }
0x40e9   : > { %v3065_v40 = vpop.permute.xlu0 %3064 }
0x40ea   : > { %v3067_v41 = vmul.f32 %v4775_v32, %v3065_v40 }
0x40ec   : > { %v3068_v42 = vpack.c.bf16 %v3067_v41, %v3067_v41  ;;  %v3564_v43 = vsel %vm842_vm11, %v3563_v20, %v3067_v41 }
0x40ee   : > { %v3070_v44 = vshrl.u32 %v3068_v42, 16 }
0x40f0   : > { %v3072_v45 = vrot.slane %v3070_v44, 2 }
0x40f2   : > { %3073 = vrot.lane.b32.xlu1 %v3072_v45, %s4916_s28 }
0x4164   : > { %v3074_v46 = vpop.permute.xlu1 %3073 }
0x4165   : > { %4449 = vmatmul.mubr.msk.bf16.vlgmr.msra.gmra.mrb[60].mxu0 %vm779_vm6, %v3074_v46 }
0x4166   : > { %4461 = vmatpush3.bf16.msra.mxu0 %v5558_v47  ;;  %4464 = vmatprep.mubr.msk.bf16.mxu0 %vm4921_vm2, %v4915_v4 }
0x4167   : > { %4462 = vmatprep.subr.bf16.mxu0 %v4915_v4 }
0x416a   : > { %4463 = vmatpush3.bf16.msra.mxu0 %v5567_v48 }
0x416b   : > { %4476 = vmatprep.subr.bf16.mxu0 %v4915_v4 }
0x4238   : > { %v3112_v49 = vpop.f32.mrb[60].mxu0 }
0x4239   : > { %v3119_v50 = vrot.slane %v3112_v49, 2  ;;  %v4450_v51 = vpop.f32.mrb[61].mxu0 }
0x423a   : > { %v3115_v57 = vpop.f32.mrb[62].mxu0 }
0x423b   : > { %v3121_v58 = vadd.f32 %v3119_v50, %v5374_v9  ;;  %v4451_v59 = vpop.f32.mrb[63].mxu0 }
0x423d   : > { %4778 = vtanh.f32 %v3121_v58  ;;  %v4076_v61 = vmul.f32 -1.442695, %v3121_v58 }
0x423f   : > { %4780 = vpow2.f32 %v4076_v61 }
0x4247   : > { %v4779_v54 = vpop.eup %4778 }
0x4248   : > { %3134 = vrot.lane.b32.xlu0 %v4779_v54, %s4918_s27 }
0x4249   : > { %v4781_v55 = vpop.eup %4780 }
0x424a   : > { %v3125_v62 = vadd.f32 1.0, %v4781_v55 }
0x424c   : > { %4782 = vrcp.f32 %v3125_v62 }
0x4256   : > { %v4783_v63 = vpop.eup %4782 }
0x4257   : > { %v3132_v5 = vmul.f32 %v4783_v63, %v3130_v3 }
0x42ba   : > { %v3135_v1 = vpop.permute.xlu0 %3134 }
0x42bb   : > { %v3137_v14 = vmul.f32 %v4783_v63, %v3135_v1 }
0x42bd   : > { %3139 = vrot.lane.b32.xlu1 %v3137_v14, %s4916_s28 }
0x432f   : > { %v3140_v6 = vpop.permute.xlu1 %3139 }
0x4330   : > { %v3142_v8 = vadd.f32 %v3140_v6, %v3132_v5 }
0x4332   : > { %4784 = vtanh.f32 %v3142_v8  ;;  %v3209_v31 = vrot.slane %v3142_v8, 7 }
0x433c   : > { %v4785_v10 = vpop.eup %4784 }
0x433d   : > { %3145 = vrot.lane.b32.xlu0 %v4785_v10, %s4918_s27 }
0x43af   : > { %v3146_v12 = vpop.permute.xlu0 %3145 }
0x43b0   : > { %v3148_v13 = vmul.f32 %v4783_v63, %v3146_v12 }
0x43b2   : > { %v3149_v15 = vpack.c.bf16 %v3148_v13, %v3148_v13  ;;  %v3565_v16 = vsel %vm815_vm10, %v3564_v43, %v3148_v13 }
0x43b4   : > { %v3151_v2 = vrot.slane %v3149_v15, 3 }
0x43b6   : > { %3152 = vrot.lane.b32.xlu1 %v3151_v2, %s4916_s28 }
0x4428   : > { %v3153_v17 = vpop.permute.xlu1 %3152 }
0x4429   : > { %4457 = vmatmul.mubr.msk.bf16.vlgmr.msra.gmra.mrb[56].mxu1 %vm779_vm6, %v3153_v17 }
0x442a   : > { %4469 = vmatpush3.bf16.msra.mxu1 %v5558_v47  ;;  %4472 = vmatprep.mubr.msk.bf16.mxu1 %vm4921_vm2, %v4915_v4 }
0x442b   : > { %4470 = vmatprep.subr.bf16.mxu1 %v4915_v4 }
0x442e   : > { %4471 = vmatpush3.bf16.msra.mxu1 %v5567_v48 }
0x442f   : > { %4484 = vmatprep.subr.bf16.mxu1 %v4915_v4 }
0x44fc   : > { %v3191_v18 = vpop.f32.mrb[56].mxu1 }
0x44fd   : > { %v3198_v19 = vrot.slane %v3191_v18, 1  ;;  %v4458_v20 = vpop.f32.mrb[57].mxu1 }
0x44fe   : > { %v3194_v21 = vpop.f32.mrb[58].mxu1 }
0x44ff   : > { %v3200_v22 = vadd.f32 %v3198_v19, %v5374_v9  ;;  %v4459_v23 = vpop.f32.mrb[59].mxu1 }
0x4501   : > { %4786 = vtanh.f32 %v3200_v22  ;;  %v4078_v25 = vmul.f32 -1.442695, %v3200_v22 }
0x4503   : > { %4788 = vpow2.f32 %v4078_v25 }
0x450b   : > { %v4787_v24 = vpop.eup %4786 }
0x450c   : > { %3213 = vrot.lane.b32.xlu0 %v4787_v24, %s4918_s27 }
0x450d   : > { %v4789_v26 = vpop.eup %4788 }
0x450e   : > { %v3204_v27 = vadd.f32 1.0, %v4789_v26 }
0x4510   : > { %4790 = vrcp.f32 %v3204_v27 }
0x451a   : > { %v4791_v28 = vpop.eup %4790 }
0x451b   : > { %v3211_v11 = vmul.f32 %v4791_v28, %v3209_v31 }
0x457e   : > { %v3214_v29 = vpop.permute.xlu0 %3213 }
0x457f   : > { %v3216_v30 = vmul.f32 %v4791_v28, %v3214_v29 }
0x4581   : > { %3218 = vrot.lane.b32.xlu1 %v3216_v30, %s4916_s28 }
0x45f3   : > { %v3219_v32 = vpop.permute.xlu1 %3218 }
0x45f4   : > { %v3221_v34 = vadd.f32 %v3219_v32, %v3211_v11 }
0x45f6   : > { %4792 = vtanh.f32 %v3221_v34  ;;  %v3287_v54 = vrot.slane %v3221_v34, 7 }
0x4600   : > { %v4793_v9 = vpop.eup %4792 }
0x4601   : > { %3224 = vrot.lane.b32.xlu0 %v4793_v9, %s4918_s27 }
0x4673   : > { %v3225_v33 = vpop.permute.xlu0 %3224 }
0x4674   : > { %v3227_v35 = vmul.f32 %v4791_v28, %v3225_v33 }
0x4676   : > { %v3228_v37 = vpack.c.bf16 %v3227_v35, %v3227_v35  ;;  %v5712_v38 = vsel %vm789_vm9, %v3565_v16, %v3227_v35 }
0x4678   : > { %v3230_v0 = vshrl.u32 %v3228_v37, 16 }
0x467a   : > { %v3232_v39 = vrot.slane %v3230_v0, 3 }
0x467c   : > { %3233 = vrot.lane.b32.xlu1 %v3232_v39, %s4916_s28 }
0x46ee   : > { %v3234_v40 = vpop.permute.xlu1 %3233 }
0x46ef   : > { %4465 = vmatmul.mubr.msk.bf16.vlgmr.msra.gmra.mrb[64].mxu0 %vm779_vm6, %v3234_v40 }
0x46f0   : > { %4477 = vmatpush3.bf16.msra.mxu0 %v5558_v47  ;;  %4480 = vmatprep.mubr.msk.bf16.mxu0 %vm4921_vm2, %v4915_v4 }
0x46f1   : > { %4478 = vmatprep.subr.bf16.mxu0 %v4915_v4 }
0x46f4   : > { %4479 = vmatpush3.bf16.msra.mxu0 %v5567_v48 }
0x47c2   : > { %v3272_v41 = vpop.f32.mrb[64].mxu0 }
0x47c3   : > { %v3278_v42 = vadd.f32 %v3272_v41, %v5378_v60  ;;  %v4466_v43 = vpop.f32.mrb[65].mxu0 }
0x47c4   : > { %v3275_v44 = vpop.f32.mrb[66].mxu0 }
0x47c5   : > { %4794 = vtanh.f32 %v3278_v42  ;;  %v4467_v45 = vpop.f32.mrb[67].mxu0  ;;  %v4080_v49 = vmul.f32 -1.442695, %v3278_v42 }
0x47c7   : > { %4796 = vpow2.f32 %v4080_v49 }
0x47cf   : > { %v4795_v46 = vpop.eup %4794 }
0x47d0   : > { %3291 = vrot.lane.b32.xlu0 %v4795_v46, %s4918_s27 }
0x47d1   : > { %v4797_v50 = vpop.eup %4796 }
0x47d2   : > { %v3282_v51 = vadd.f32 1.0, %v4797_v50 }
0x47d4   : > { %4798 = vrcp.f32 %v3282_v51 }
0x47de   : > { %v4799_v57 = vpop.eup %4798 }
0x47df   : > { %v3289_v61 = vmul.f32 %v4799_v57, %v3287_v54 }
0x4842   : > { %v3292_v58 = vpop.permute.xlu0 %3291 }
0x4843   : > { %v3294_v59 = vmul.f32 %v4799_v57, %v3292_v58 }
0x4845   : > { %3296 = vrot.lane.b32.xlu1 %v3294_v59, %s4916_s28 }
0x48b7   : > { %v3297_v55 = vpop.permute.xlu1 %3296 }
0x48b8   : > { %v3299_v62 = vadd.f32 %v3297_v55, %v3289_v61 }
0x48ba   : > { %4800 = vtanh.f32 %v3299_v62  ;;  %v3365_v20 = vrot.slane %v3299_v62, 7 }
0x48c4   : > { %v4801_v63 = vpop.eup %4800 }
0x48c5   : > { %3302 = vrot.lane.b32.xlu0 %v4801_v63, %s4918_s27 }
0x4937   : > { %v3303_v1 = vpop.permute.xlu0 %3302 }
0x4938   : > { %v5725_v14 = vmul.f32 %v4799_v57, %v3303_v1 }
0x493a   : > { %v3306_v3 = vpack.c.bf16 %v5725_v14, %v5725_v14 }
0x493c   : > { %3308 = vrot.lane.b32.xlu1 %v3306_v3, %s4916_s28 }
0x49ae   : > { %v3309_v5 = vpop.permute.xlu1 %3308 }
0x49af   : > { %4473 = vmatmul.mubr.msk.bf16.vlgmr.msra.gmra.mrb[60].mxu1 %vm779_vm6, %v3309_v5 }
0x49b0   : > { %4485 = vmatpush3.bf16.msra.mxu1 %v5558_v47  ;;  %4488 = vmatprep.mubr.msk.bf16.mxu1 %vm4921_vm2, %v4915_v4 }
0x49b1   : > { %4486 = vmatprep.subr.bf16.mxu1 %v4915_v4 }
0x49b4   : > { %4487 = vmatpush3.bf16.msra.mxu1 %v5567_v48 }
0x49b5   : > { %4500 = vmatprep.subr.bf16.mxu1 %v4915_v4 }
0x4a82   : > { %v3347_v6 = vpop.f32.mrb[60].mxu1 }
0x4a83   : > { %v3354_v8 = vrot.slane %v3347_v6, 7  ;;  %v4474_v10 = vpop.f32.mrb[61].mxu1 }
0x4a84   : > { %v3350_v12 = vpop.f32.mrb[62].mxu1 }
0x4a85   : > { %v3356_v13 = vadd.f32 %v3354_v8, %v5378_v60  ;;  %v4475_v15 = vpop.f32.mrb[63].mxu1 }
0x4a86   : > { %v3571_v15 = vpack.c.bf16 %v5602_v7, %v5482_v36 }
0x4a87   : > { %4802 = vtanh.f32 %v3356_v13  ;;  %v4082_v47 = vmul.f32 -1.442695, %v3356_v13 }
0x4a89   : > { %4804 = vpow2.f32 %v4082_v47 }
0x4a91   : > { %v4803_v16 = vpop.eup %4802 }
0x4a92   : > { %3369 = vrot.lane.b32.xlu0 %v4803_v16, %s4918_s27 }
0x4a93   : > { %v4805_v2 = vpop.eup %4804 }
0x4a94   : > { %v3360_v17 = vadd.f32 1.0, %v4805_v2 }
0x4a96   : > { %4806 = vrcp.f32 %v3360_v17 }
0x4aa0   : > { %v4807_v18 = vpop.eup %4806 }
0x4aa1   : > { %v3367_v21 = vmul.f32 %v4807_v18, %v3365_v20 }
0x4b04   : > { %v3370_v48 = vpop.permute.xlu0 %3369 }
0x4b05   : > { %v3372_v19 = vmul.f32 %v4807_v18, %v3370_v48  ;;  %v4597_v48 = vld [vmem:[%s5879_s8 + $0x8] sm:$0xff]  }
0x4b07   : > { %3374 = vrot.lane.b32.xlu1 %v3372_v19, %s4916_s28 }
0x4b79   : > { %v3375_v22 = vpop.permute.xlu1 %3374 }
0x4b7a   : > { %v3377_v23 = vadd.f32 %v3375_v22, %v3367_v21 }
0x4b7c   : > { %4808 = vtanh.f32 %v3377_v23  ;;  %v3445_v42 = vrot.slane %v3377_v23, 7 }
0x4b86   : > { %v4809_v24 = vpop.eup %4808 }
0x4b87   : > { %3380 = vrot.lane.b32.xlu0 %v4809_v24, %s4918_s27 }
0x4bf9   : > { %v3381_v25 = vpop.permute.xlu0 %3380 }
0x4bfa   : > { %v3383_v26 = vmul.f32 %v4807_v18, %v3381_v25  ;;  %v4596_v18 = vld [vmem:[%s5879_s8] sm:$0xff]  }
0x4bfb   : > { %4492 = vmatprep.subr.bf16.mxu0 %v4596_v18  ;;  %v3570_v25 = vld [vmem:[%s5880_s9] sm:$0x3] }
0x4bfc   : > { %v3384_v27 = vpack.c.bf16 %v3383_v26, %v3383_v26  ;;  %v3567_v51 = vsel %vm3543_vm13, %v5725_v14, %v3383_v26  ;;  %v3580_v26 = vrot.slane %v3570_v25, %v646_v53 }
0x4bfe   : > { %v3386_v28 = vshrl.u32 %v3384_v27, 16 }
0x4c00   : > { %3388 = vrot.lane.b32.xlu1 %v3386_v28, %s4916_s28 }
0x4c72   : > { %v3389_v29 = vpop.permute.xlu1 %3388 }
0x4c73   : > { %4481 = vmatmul.mubr.msk.bf16.vlgmr.msra.gmra.mrb[68].mxu0 %vm779_vm6, %v3389_v29 }
0x4c74   : > { %4493 = vmatpush3.bf16.msra.mxu0 %v4596_v18 }
0x4c75   : > { %4494 = vmatprep.subr.bf16.mxu0 %v4597_v48 }
0x4c78   : > { %4495 = vmatpush3.bf16.msra.mxu0 %v4597_v48 }
0x4c79   : > { %4508 = vmatprep.subr.bf16.mxu0 %v4915_v4 }
0x4d46   : > { %v3427_v30 = vpop.f32.mrb[68].mxu0 }
0x4d47   : > { %v3434_v31 = vrot.slane %v3427_v30, 6  ;;  %v4482_v11 = vpop.f32.mrb[69].mxu0 }
0x4d48   : > { %v3430_v32 = vpop.f32.mrb[70].mxu0 }
0x4d49   : > { %v3436_v34 = vadd.f32 %v3434_v31, %v5378_v60  ;;  %v4483_v9 = vpop.f32.mrb[71].mxu0 }
0x4d4a   : > { %v3661_v9 = vrot.slane %v3570_v25, %v763_v56  ;;  %v4598_v56 = vld [vmem:[%s5881_s10] sm:$0xff]  }
0x4d4b   : > { %4810 = vtanh.f32 %v3436_v34  ;;  %v4084_v35 = vmul.f32 -1.442695, %v3436_v34 }
0x4d4d   : > { %4812 = vpow2.f32 %v4084_v35 }
0x4d55   : > { %v4811_v33 = vpop.eup %4810 }
0x4d56   : > { %3449 = vrot.lane.b32.xlu0 %v4811_v33, %s4918_s27 }
0x4d57   : > { %v4813_v37 = vpop.eup %4812 }
0x4d58   : > { %v3440_v0 = vadd.f32 1.0, %v4813_v37 }
0x4d5a   : > { %4814 = vrcp.f32 %v3440_v0 }
0x4d64   : > { %v4815_v39 = vpop.eup %4814 }
0x4d65   : > { %v3447_v43 = vmul.f32 %v4815_v39, %v3445_v42 }
0x4dc8   : > { %v3450_v40 = vpop.permute.xlu0 %3449 }
0x4dc9   : > { %v3452_v41 = vmul.f32 %v4815_v39, %v3450_v40 }
0x4dcb   : > { %3454 = vrot.lane.b32.xlu1 %v3452_v41, %s4916_s28 }
0x4e3d   : > { %v3455_v44 = vpop.permute.xlu1 %3454 }
0x4e3e   : > { %v3457_v45 = vadd.f32 %v3455_v44, %v3447_v43 }
0x4e40   : > { %4816 = vtanh.f32 %v3457_v45 }
0x4e4a   : > { %v4817_v46 = vpop.eup %4816 }
0x4e4b   : > { %3460 = vrot.lane.b32.xlu0 %v4817_v46, %s4918_s27 }
0x4ebd   : > { %v3461_v49 = vpop.permute.xlu0 %3460 }
0x4ebe   : > { %v3463_v50 = vmul.f32 %v4815_v39, %v3461_v49 }
0x4ec0   : > { %v3464_v57 = vpack.c.bf16 %v3463_v50, %v3463_v50  ;;  %v3568_v58 = vsel %vm3545_vm14, %v3567_v51, %v3463_v50 }
0x4ec2   : > { %v3466_v59 = vrot.slane %v3464_v57, 1 }
0x4ec4   : > { %3467 = vrot.lane.b32.xlu1 %v3466_v59, %s4916_s28 }
0x4f36   : > { %v3468_v54 = vpop.permute.xlu1 %3467 }
0x4f37   : > { %4489 = vmatmul.mubr.msk.bf16.vlgmr.msra.gmra.mrb[64].mxu1 %vm779_vm6, %v3468_v54 }
0x4f38   : > { %4504 = vmatprep.mubr.msk.bf16.mxu1 %vm4921_vm2, %v4915_v4  ;;  %4501 = vmatpush3.bf16.msra.mxu1 %v4598_v56  ;;  %v4601_v56 = vld [vmem:[%s5883_s12] sm:$0xff]  }
0x4f39   : > { %4502 = vmatprep.subr.bf16.mxu1 %v4915_v4 }
0x500a   : > { %v3506_v61 = vpop.f32.mrb[64].mxu1 }
0x500b   : > { %v3513_v55 = vrot.slane %v3506_v61, 5  ;;  %v4490_v62 = vpop.f32.mrb[65].mxu1 }
0x500c   : > { %v3509_v63 = vpop.f32.mrb[66].mxu1 }
0x500d   : > { %v3515_v1 = vadd.f32 %v3513_v55, %v5378_v60  ;;  %v4491_v3 = vpop.f32.mrb[67].mxu1  ;;  %v3524_v60 = vrot.slane %v3457_v45, 7  ;;  %v4599_v45 = vld [vmem:[%s5881_s10 + $0x8] sm:$0xff]  }
0x500e   : > { %4503 = vmatpush3.bf16.msra.mxu1 %v4599_v45  ;;  %v3733_v45 = vld [vmem:[%s5884_s13] sm:$0x7] }
0x500f   : > { %4818 = vtanh.f32 %v3515_v1  ;;  %v4086_v5 = vmul.f32 -1.442695, %v3515_v1  ;;  %4514 = vmatprep.subr.bf16.mxu1 %v4915_v4 }
0x5011   : > { %4820 = vpow2.f32 %v4086_v5 }
0x5019   : > { %v4819_v14 = vpop.eup %4818 }
0x501a   : > { %3528 = vrot.lane.b32.xlu0 %v4819_v14, %s4918_s27 }
0x501b   : > { %v4821_v6 = vpop.eup %4820 }
0x501c   : > { %v3519_v8 = vadd.f32 1.0, %v4821_v6 }
0x501e   : > { %4822 = vrcp.f32 %v3519_v8 }
0x5028   : > { %v4823_v10 = vpop.eup %4822 }
0x5029   : > { %v3526_v16 = vmul.f32 %v4823_v10, %v3524_v60 }
0x508c   : > { %v3529_v12 = vpop.permute.xlu0 %3528 }
0x508d   : > { %v3531_v13 = vmul.f32 %v4823_v10, %v3529_v12 }
0x508f   : > { %3533 = vrot.lane.b32.xlu1 %v3531_v13, %s4916_s28 }
0x5093   : > { %3583 = vrot.lane.b32.xlu1 %v3571_v15, %s4916_s28 }
0x5101   : > { %v3534_v47 = vpop.permute.xlu1 %3533 }
0x5102   : > { %v3536_v2 = vadd.f32 %v3534_v47, %v3526_v16 }
0x5104   : > { %4824 = vtanh.f32 %v3536_v2 }
0x5105   : > { %v3584_v17 = vpop.permute.xlu1 %3583 }
0x5106   : > { %4496 = vmatprep.mubr.msk.bf16.mxu0 %vm779_vm6, %v3584_v17 }
0x510e   : > { %v4825_v19 = vpop.eup %4824 }
0x510f   : > { %3539 = vrot.lane.b32.xlu0 %v4825_v19, %s4918_s27  ;;  %s5828_s27 = scalar_lea.hbm %s5885_s14, %s4098_s18 }
0x5181   : > { %v3540_v20 = vpop.permute.xlu0 %3539 }
0x5182   : > { %v3542_v21 = vmul.f32 %v4823_v10, %v3540_v20 }
0x5184   : > { %v5770_v22 = vsel %vm3547_vm4, %v3568_v58, %v3542_v21 }
0x5185   : > { %v3572_v23 = vpack.c.bf16 %v5770_v22, %v5712_v38 }
0x5187   : > { %3585 = vrot.lane.b32.xlu0 %v3572_v23, %s4916_s28 }
0x51f9   : > { %v3586_v24 = vpop.permute.xlu0 %3585 }
0x51fa   : > { %4497 = vmatmul.mubr.msk.bf16.vlgmr.msra.gmra.mrb[72].mxu0 %vm779_vm6, %v3586_v24 }
0x51fb   : > { %4510 = vmatprep.mubr.msk.bf16.mxu0 %vm4921_vm2, %v4915_v4 }
0x52cd   : > { %v4498_v27 = vpop.f32.mrb[72].mxu0 }
0x52ce   : > { %v3648_v28 = vadd.f32 %v4498_v27, %v3580_v26  ;;  %v3639_v29 = vpop.f32.mrb[73].mxu0 }
0x52cf   : > { %v3640_v30 = vadd.f32 %v3639_v29, %v3580_v26  ;;  %v4499_v31 = vpop.f32.mrb[74].mxu0 }
0x52d0   : > { %4826 = vtanh.f32 %v3648_v28  ;;  %v3651_v11 = vadd.f32 %v4499_v31, %v3580_v26  ;;  %v3642_v32 = vpop.f32.mrb[75].mxu0 }
0x52d1   : > { %4828 = vtanh.f32 %v3640_v30  ;;  %v3643_v34 = vadd.f32 %v3642_v32, %v3580_v26 }
0x52d2   : > { %4830 = vtanh.f32 %v3651_v11 }
0x52d3   : > { %4832 = vtanh.f32 %v3643_v34 }
0x52da   : > { %v4827_v33 = vpop.eup %4826 }
0x52db   : > { %v4829_v35 = vpop.eup %4828  ;;  %v3664_v43 = vmul.f32 %v4827_v33, %v3661_v9 }
0x52dc   : > { %v4831_v37 = vpop.eup %4830  ;;  %v3662_v0 = vmul.f32 %v4829_v35, %v3661_v9 }
0x52dd   : > { %v4833_v53 = vpop.eup %4832  ;;  %v3665_v39 = vmul.f32 %v4831_v37, %v3661_v9  ;;  %v3672_v52 = vsel %vm779_vm6, %v3664_v43, 0.0 }
0x52de   : > { %v3666_v40 = vsel %vm779_vm6, %v3662_v0, 0.0  ;;  %v3663_v41 = vmul.f32 %v4833_v53, %v3661_v9 }
0x52df   : > { %3667 = vadd.xlane.f32.xlu0 %v3666_v40  ;;  %v3675_v42 = vsel %vm1062_vm3, %v3665_v39, 0.0 }
0x52e0   : > { %3676 = vadd.xlane.f32.xlu1 %v3675_v42  ;;  %v3669_v44 = vsel %vm779_vm6, %v3663_v41, 0.0 }
0x52e3   : > { %3670 = vadd.xlane.f32.xlu0 %v3669_v44 }
0x52e4   : > { %3673 = vadd.xlane.f32.xlu1 %v3672_v52 }
0x536c   : > { %v3668_v46 = vpop.xlane.xlu0 %3667 }
0x536d   : > { %v3677_v49 = vpop.xlane.xlu1 %3676 }
0x536e   : > { %v3678_v51 = vsel %vm870_vm7, %v3677_v49, -inf }
0x5370   : > { %v3671_v50 = vpop.xlane.xlu0 %3670 }
0x5371   : > { %v3679_v57 = vmax.f32 %v3668_v46, %v3671_v50  ;;  %v3674_v58 = vpop.xlane.xlu1 %3673 }
0x5372   : > { %v3680_v59 = vmax.f32 %v3674_v58, %v3678_v51 }
0x5374   : > { %v3681_v54 = vmax.f32 %v3679_v57, %v3680_v59 }
0x5376   : > { %v3682_v61 = vrot.slane %v3681_v54, 4 }
0x5378   : > { %v3683_v55 = vmax.f32 %v3681_v54, %v3682_v61  ;;  %v3808_v54 = vrot.slane %v3733_v45, 1 }
0x537a   : > { %v3684_v62 = vrot.slane %v3683_v55, 2 }
0x537c   : > { %v3685_v63 = vmax.f32 %v3683_v55, %v3684_v62 }
0x537e   : > { %v3686_v1 = vrot.slane %v3685_v63, 1 }
0x5380   : > { %v3687_v3 = vmax.f32 %v3685_v63, %v3686_v1 }
0x5382   : > { %v3688_v14 = vsub.f32 %v3668_v46, %v3687_v3  ;;  %v3689_v5 = vsub.f32 %v3671_v50, %v3687_v3  ;;  %v3690_v6 = vsub.f32 %v3674_v58, %v3687_v3  ;;  %v3691_v8 = vsub.f32 %v3677_v49, %v3687_v3 }
0x5384   : > { %v3692_v10 = vmul.f32 1.442695, %v3688_v14  ;;  %v3694_v12 = vmul.f32 1.442695, %v3689_v5  ;;  %v3696_v13 = vmul.f32 1.442695, %v3690_v6 }
0x5385   : > { %v3698_v15 = vmul.f32 1.442695, %v3691_v8  ;;  %v3863_v14 = vrot.slane %v3733_v45, 2 }
0x5386   : > { %4834 = vpow2.f32 %v3692_v10 }
0x5387   : > { %4836 = vpow2.f32 %v3694_v12 }
0x5388   : > { %4838 = vpow2.f32 %v3696_v13 }
0x5389   : > { %4840 = vpow2.f32 %v3698_v15 }
0x5390   : > { %v4835_v60 = vpop.eup %4834 }
0x5391   : > { %v4837_v16 = vpop.eup %4836 }
0x5392   : > { %v4839_v47 = vpop.eup %4838  ;;  %v3700_v2 = vadd.f32 %v4837_v16, %v4835_v60 }
0x5393   : > { %v4841_v17 = vpop.eup %4840 }
0x5394   : > { %v3701_v18 = vadd.f32 %v4839_v47, %v3700_v2  ;;  %v3702_v48 = vsel %vm870_vm7, %v4841_v17, 0.0  ;;  %vm3724_vm7 = vcmask 1044224  }
0x5396   : > { %v3703_v19 = vadd.f32 %v3702_v48, %v3701_v18 }
0x5398   : > { %v3704_v20 = vrot.slane %v3703_v19, 4 }
0x539a   : > { %v3705_v21 = vadd.f32 %v3704_v20, %v3703_v19 }
0x539c   : > { %v3706_v23 = vrot.slane %v3705_v21, 2 }
0x539e   : > { %v3707_v24 = vadd.f32 %v3706_v23, %v3705_v21 }
0x53a0   : > { %v3708_v25 = vrot.slane %v3707_v24, 1 }
0x53a2   : > { %v3709_v26 = vadd.f32 %v3708_v25, %v3707_v24 }
0x53a4   : > { %4842 = vrcp.f32 %v3709_v26 }
0x53ae   : > { %v4843_v27 = vpop.eup %4842 }
0x53af   : > { %v3713_v28 = vmul.f32 %v4843_v27, %v4839_v47  ;;  %v3711_v29 = vmul.f32 %v4843_v27, %v4835_v60  ;;  %v3712_v30 = vmul.f32 %v4843_v27, %v4837_v16  ;;  %v3714_v31 = vmul.f32 %v4843_v27, %v4841_v17 }
0x53b1   : > { %v3717_v11 = vmul.f32 %v3713_v28, %v5712_v38  ;;  %v3715_v32 = vmul.f32 %v3711_v29, %v5482_v36  ;;  %v3716_v34 = vmul.f32 %v3712_v30, %v5602_v7  ;;  %v3718_v9 = vmul.f32 %v3714_v31, %v5770_v22  ;;  %v4600_v36 = vld [vmem:[%s5882_s11] sm:$0xff]  }
0x53b2   : > { %4509 = vmatpush3.bf16.msra.mxu0 %v4600_v36 }
0x53b3   : > { %v3719_v33 = vsel %vm864_vm15, %v3715_v32, 0.0  ;;  %v3720_v35 = vsel %vm864_vm15, %v3716_v34, 0.0  ;;  %v3722_v0 = vsel %vm864_vm15, %v3717_v11, 0.0  ;;  %v3725_v39 = vsel %vm3724_vm7, %v3718_v9, 0.0 }
0x53b4   : > { %v3721_v37 = vadd.f32 %v3720_v35, %v3719_v33 }
0x53b6   : > { %v3723_v53 = vadd.f32 %v3722_v0, %v3721_v37 }
0x53b8   : > { %v3726_v40 = vadd.f32 %v3725_v39, %v3723_v53 }
0x53ba   : > { %v3727_v41 = vrot.slane %v3726_v40, 4 }
0x53bc   : > { %v3728_v38 = vadd.f32 %v3727_v41, %v3726_v40 }
0x53be   : > { %v3729_v7 = vrot.slane %v3728_v38, 2 }
0x53c0   : > { %v3730_v22 = vadd.f32 %v3729_v7, %v3728_v38 }
0x53c2   : > { %v3731_v42 = vrot.slane %v3730_v22, 1 }
0x53c4   : > { %v3732_v43 = vadd.f32 %v3731_v42, %v3730_v22 }
0x53c6   : > { %v3734_v44 = vpack.c.bf16 %v3732_v43, %v3732_v43 }
0x53c8   : > { %3740 = vrot.lane.b32.xlu0 %v3734_v44, %s4916_s28  ;;  %s458_s28 = sand.u32 1, %s4904_s30  }
0x53c9   : > { %s459_s22 = scalar_lea.vmem [#allocation5], %s458_s28  ;;  %s3922_s25 = scalar_lea.sflag [#allocation6], %s458_s28 }
0x53ca   : > { %s3934_s21 = sshll.u32 %s459_s22, 4  ;;  %s5830_s21 = int_to_ptr.vmem [resolvable:$true] %s3934_s21 }
0x53cb   : > { %s4850_s0 = scalar_lea.vmem %s5830_s21, 16  ;;  %p4857_p0 = scmp.lt.s32.totalorder %s5830_s21, %s4855_s1 }
0x53cc   : > { %p4851_p11 = scmp.ne.s32.totalorder %s5830_s21, %s4850_s0  ;;  %p4858_p1 = scmp.lt.s32.totalorder %s4856_s2, %s4850_s0 }
0x53ce   : > { %p4852_p12 = pnand %p4851_p11, %p5037_p5  ;;  %p4859_p2 = por %p4858_p1, %p4857_p0 }
0x53d0   : > { %p4853_p13 = pneg %p4852_p12 }
0x53d2   : > { %p4860_p3 = pnand %p4859_p2, %p4853_p13 }
0x543a   : > { %v3741_v52 = vpop.permute.xlu0 %3740 }
0x543b   : > { %4505 = vmatmul.mubr.msk.bf16.vlgmr.msra.gmra.mrb[68].mxu1 %vm779_vm6, %v3741_v52 }
0x543c   : > { %4516 = vmatprep.mubr.msk.bf16.mxu1 %vm4921_vm2, %v4915_v4  ;;  %4515 = vmatpush3.bf16.msra.mxu1 %v4601_v56  ;;  %vm3908_vm2 = vcmask 57344  }
0x550e   : > { %v3791_v46 = vpop.f32.mrb[68].mxu1 }
0x550f   : > { %v3792_v49 = vadd.f32 %v3791_v46, %v3733_v45  ;;  %v4506_v50 = vpop.f32.mrb[69].mxu1 }
0x5510   : > { %v3794_v51 = vpop.f32.mrb[70].mxu1 }
0x5511   : > { %v3797_v57 = vmax.f32 %v3792_v49, 0.0  ;;  %v4507_v58 = vpop.f32.mrb[71].mxu1 }
0x5513   : > { %v3798_v59 = vpack.c.bf16 %v3797_v57, %v3797_v57 }
0x5515   : > { %4511 = vmatmul.mubr.msk.bf16.vlgmr.msra.gmra.mrb[76].mxu0 %vm473_vm0, %v3798_v59 }
0x55e8   : > { %v3847_v4 = vpop.f32.mrb[76].mxu0 }
0x55e9   : > { %v3848_v61 = vadd.f32 %v3847_v4, %v3808_v54  ;;  %v4512_v55 = vpop.f32.mrb[77].mxu0 }
0x55ea   : > { %v3850_v62 = vpop.f32.mrb[78].mxu0 }
0x55eb   : > { %v3853_v63 = vmax.f32 %v3848_v61, 0.0  ;;  %v4513_v1 = vpop.f32.mrb[79].mxu0 }
0x55ed   : > { %v3854_v3 = vpack.c.bf16 %v3853_v63, %v3853_v63 }
0x55ef   : > { %4517 = vmatmul.mubr.msk.bf16.vlgmr.msra.gmra.mrb[72].mxu1 %vm473_vm0, %v3854_v3 }
0x56c2   : > { %v3902_v5 = vpop.f32.mrb[72].mxu1 }
0x56c3   : > { %v3903_v6 = vadd.f32 %v3902_v5, %v3863_v14  ;;  %v4518_v8 = vpop.f32.mrb[73].mxu1 }
0x56c4   : > { %v3905_v10 = vpop.f32.mrb[74].mxu1 }
0x56c5   : > { %v4519_v12 = vpop.f32.mrb[75].mxu1  ;;  %v3909_v13 = vsel %vm3908_vm2, %v3903_v6, -inf }
0x56c6   : > { %3910 = vmax.xlane.f32.xlu1 %v3909_v13 }
0x5753   : > { %v3911_v15 = vpop.xlane.xlu1 %3910 }
0x5754   : > { %v3912_v60 = vsub.f32 %v3903_v6, %v3911_v15 }
0x5756   : > { %v3913_v16 = vmul.f32 1.442695, %v3912_v60 }
0x5758   : > { %4844 = vpow2.f32 %v3913_v16 }
0x5762   : > { %v4845_v47 = vpop.eup %4844 }
0x5763   : > { %v3915_v2 = vsel %vm3908_vm2, %v4845_v47, 0.0 }
0x5764   : > { %3916 = vadd.xlane.f32.xlu1 %v3915_v2 }
0x57f1   : > { %v3917_v17 = vpop.xlane.xlu1 %3916 }
0x57f2   : > { %4846 = vrcp.f32 %v3917_v17 }
0x57fc   : > { %v4847_v18 = vpop.eup %4846 }
0x57fd   : > { %v3919_v48 = vmul.f32 %v4847_v18, %v4845_v47 }
0x57ff   : > { %3920 = vst.msk [vmem:[%s459_s22] sm:$0x1] %vm3908_vm2, %v3919_v48 }
0x5800   : > { %4863 = shalt.err (!%p4860_p3)
}
0x5801   : > { %s4864_s28 = scalar_lea.hbm %s5828_s27, 16  ;;  %s4868_s20 = scalar_lea.hbm %s5885_s14, 32 }
0x5802   : > { %p4865_p4 = scmp.ne.s32.totalorder %s5828_s27, %s4864_s28  ;;  %p4869_p9 = scmp.lt.u32.totalorder %s5828_s27, %s5885_s14 }
0x5803   : > { %p4870_p10 = scmp.lt.u32.totalorder %s4868_s20, %s4864_s28  ;;  %p4872_p12 = scmp.lt.u32.totalorder %s4864_s28, %s5828_s27 }
0x5804   : > { %p4866_p7 = pnand %p4865_p4, %p5037_p5 }
0x5805   : > { %p4871_p11 = por %p4870_p10, %p4869_p9 }
0x5806   : > { %p4867_p8 = pneg %p4866_p7 }
0x5807   : > { %p4873_p13 = por %p4872_p12, %p4871_p11 }
0x5809   : > { %p4874_p0 = pnand %p4873_p13, %p4867_p8 }
0x580b   : > { %4877 = shalt.err (!%p4874_p0)
}
0x580c   : > { %4521 = dma.vmem_to_hbm [thread:$0]  (%p5037_p5), %s5830_s21, 16, %s5828_s27, %s3922_s25  }
0x580d PF: > { %p4527_p1 = scmp.ge.s32.totalorder %s4912_s16, 2  ;;  %s3946_s2 = sand.u32 1, %s4900_s29  }
0x580e   : > { %s3947_s0 = scalar_lea.sflag [#allocation6], %s3946_s2 }
0x580f   : > { %p4524_p2 = pnand %p4527_p1, %p5041_p6 }
0x5811   : > { %4895 = dma.done.wait (!%p4524_p2), %s3947_s0, 16  }
0x5812   : > { %4897 = vsyncadd (!%p4524_p2), %s3947_s0, 4294967280  ;;  %s5898_s17 = sld [smem:[#allocation8_spill]]  ;;  %p24_p3 = scmp.ge.s32.totalorder %s5024_s19, 4  }
0x5813   : > { %s5899_s29 = smov %s4904_s30  ;;  %s5900_s30 = smov %s4908_s15 }
0x5814   : > { %s5902_s16 = smov %s5024_s19  ;;  %26 = sbr.rel (!%p24_p3) target bundleno = 7 (0x7), region = 111 }
0x5818   : > { %s5901_s15 = smov %s5898_s17 }
0x581b   :  { %3951 = vsyncpa [#allocation6], 1 }
0x581c   :  { %3953 = vsyncpa [#allocation6 + $0x1], 1 }

</bundles_post_ra>
